<compile_context>
chip_gen: v7x
topology: tpu7x:2x2x1
jax: 0.10.0
libtpu: 0.0.40
codegen_flags: <defaults>
</compile_context>

<pallas_src>
import functools

import jax
import jax.numpy as jnp
from jax.experimental import pallas as pl
from jax.experimental.pallas import tpu as pltpu

EPS_LN = 1e-5


def _silu(x):
    # SiLU via the tanh identity: x*sigmoid(x) = 0.5*x*(tanh(x/2)+1)
    # (one EUP transcendental instead of exp + divide).
    return 0.5 * x * (jnp.tanh(0.5 * x) + 1.0)


def _layer_norm(x):
    # non-affine LayerNorm over the last dim (elementwise_affine=False)
    mu = jnp.mean(x, axis=-1, keepdims=True)
    var = jnp.mean((x - mu) ** 2, axis=-1, keepdims=True)
    return (x - mu) * jax.lax.rsqrt(var + EPS_LN)


# ----------------------------------------------------------------------------
# Pallas kernel: everything in GNNLF.forward after Mol2Graph / embedding lookup
# ----------------------------------------------------------------------------
def gnnlf_kernel(s0_ref, semb_ref, adj_ref, pos_ref, post_ref, amask_ref,
                 mu_ref,
                 w_ef_ref, b_ef_ref, w_s2v_ref, b_s2v_ref, w_q_ref, w_k_ref,
                 w_d1_ref, b_d1_ref, w_d2_ref, b_d2_ref,
                 w_int_ref, b_int_ref, w_out_ref, b_out_ref,
                 out_ref,
                 mask_scr, v_scr, kv_scr, s_scr,
                 *, num_layers, hid_dim, ef_gamma, y_mean, y_std, tile_i):
    f32 = jnp.float32
    bf16 = jnp.bfloat16
    H = hid_dim
    N = adj_ref.shape[1]
    E = mu_ref.shape[1]
    TI = tile_i
    n_tiles = N // TI

    semb = semb_ref[0]          # (N, H) f32, LayerNorm already applied in wrapper
    mu = mu_ref[...]            # (1, E) RBF centers
    w_ef = w_ef_ref[...]        # (E, H) bf16
    b_ef = b_ef_ref[...]        # (1, H) f32

    def for_each_tile(body):
        # Static unroll for small trip counts (LLO gets cross-tile visibility
        # and fully static slicing); pl.loop with aligned starts otherwise.
        if n_tiles <= 4:
            for t in range(n_tiles):
                body(t * TI)
        else:
            @pl.loop(0, n_tiles)
            def _(t):
                body(pl.multiple_of(t * TI, TI))

    # ---- in-kernel pairwise geometry (lane-dense (TI, N) per component) ----
    def rel_and_dist(i0):
        rs = []
        d2 = None
        for ax in range(3):
            row = post_ref[0, ax:ax + 1, :]                      # (1, N)  pos_j
            col = pos_ref[0, pl.ds(i0, TI), ax:ax + 1]           # (TI, 1) pos_i
            rd = row - col                                       # (TI, N) = pos_j - pos_i
            rs.append(rd)
            d2 = rd * rd if d2 is None else d2 + rd * rd
        dt = jnp.sqrt(jnp.maximum(d2, 1e-12))                    # (TI, N)
        return rs, dt

    def unit_vecs(i0):
        rs, dt = rel_and_dist(i0)
        inv = 1.0 / dt
        return [rd * inv for rd in rs]                           # 3 x (TI, N)

    # ---- phase 1: mask = SiLU(RBF(d) @ W_ef + b) * adj ;  s = s0 + sum_j mask * semb
    def mask_and_s_tile(i0):
        _, dt = rel_and_dist(i0)
        adj3 = adj_ref[0, pl.ds(i0, TI), :][:, :, None]          # (TI, N, 1) bf16
        # RBF edge features on the fly (EUP exp) — ef never touches HBM.
        ef = jnp.exp(-ef_gamma * (dt[:, :, None] - mu[None, :, :]) ** 2)   # (TI, N, E)
        m = _silu(jnp.dot(ef.reshape(TI * N, E).astype(bf16), w_ef,
                          preferred_element_type=f32) + b_ef)
        mask_f = m.reshape(TI, N, H) * adj3                      # f32; kept live for the reduce
        mask_scr[pl.ds(i0, TI), :, :] = mask_f.astype(bf16)      # single cast for the store
        s_scr[pl.ds(i0, TI), :] = (
            s0_ref[0, pl.ds(i0, TI), :]
            + jnp.sum(mask_f * semb[None, :, :], axis=1))

    for_each_tile(mask_and_s_tile)

    # ---- phase 2: sp = SiLU(LN(s @ W_s2v + b)) ; v[i,d,:] = sum_j sp[j]*mask[i,j]*ev[i,j,d]
    sp = _silu(_layer_norm(
        jnp.dot(s_scr[...].astype(bf16), w_s2v_ref[...],
                preferred_element_type=f32) + b_s2v_ref[...]))   # (N, H) f32

    def v_tile(i0):
        ev = unit_vecs(i0)
        sm = sp[None, :, :] * mask_scr[pl.ds(i0, TI), :, :].astype(f32)   # (TI, N, H)
        for ax in range(3):
            v_scr[pl.ds(i0 + ax * N, TI), :] = jnp.sum(sm * ev[ax][:, :, None], axis=1)

    for_each_tile(v_tile)

    # ---- phase 3: batched q/k projections (two (3N,H) matmuls instead of six)
    v3 = v_scr[...].astype(bf16)                                 # (3N, H)
    qv = jnp.dot(v3, w_q_ref[...], preferred_element_type=f32)   # (3N, H) f32
    kv_scr[...] = jnp.dot(v3, w_k_ref[...], preferred_element_type=f32)

    w_d1 = w_d1_ref[...]        # (2H, 2H) bf16
    b_d1 = b_d1_ref[...]        # (1, 2H) f32
    w_d2 = w_d2_ref[...]        # (2H, H) bf16
    b_d2 = b_d2_ref[...]        # (1, H) f32

    # ---- phase 4: dir2/dir3 -> dir_proj -> mask update (per i-tile).
    #      dir2 is consumed by its matmul before dir3 is built (low VMEM peak);
    #      cat([dir2, dir3], -1) @ W_d1 == dir2 @ W_d1[:H] + dir3 @ W_d1[H:].
    def dir_tile(i0):
        ev = unit_vecs(i0)
        adj3 = adj_ref[0, pl.ds(i0, TI), :][:, :, None]          # (TI, N, 1) bf16

        dir2 = sum(v_scr[pl.ds(i0 + ax * N, TI), :][:, None, :] * ev[ax][:, :, None]
                   for ax in range(3)) * adj3                    # (TI, N, H) f32
        acc = jnp.dot(dir2.reshape(TI * N, H).astype(bf16), w_d1[:H, :],
                      preferred_element_type=f32)

        dir3 = sum(kv_scr[pl.ds(i0 + ax * N, TI), :][:, None, :]
                   * qv[ax * N:(ax + 1) * N, :][None, :, :]
                   for ax in range(3)) * adj3                    # (TI, N, H) f32
        acc = acc + jnp.dot(dir3.reshape(TI * N, H).astype(bf16), w_d1[H:, :],
                            preferred_element_type=f32)

        h1 = _silu(acc + b_d1)                                   # (TI*N, 2H)
        h2 = _silu(jnp.dot(h1.astype(bf16), w_d2,
                           preferred_element_type=f32) + b_d2)   # (TI*N, H)
        mask_new = mask_scr[pl.ds(i0, TI), :, :].astype(f32) * h2.reshape(TI, N, H)
        mask_scr[pl.ds(i0, TI), :, :] = mask_new.astype(bf16)

    for_each_tile(dir_tile)

    # ---- phase 5: interaction layers, mask stays resident in bf16 scratch
    for l in range(num_layers):
        spl = _silu(_layer_norm(
            jnp.dot(s_scr[...].astype(bf16), w_int_ref[l],
                    preferred_element_type=f32) + b_int_ref[l]))  # (N, H)

        def interact_tile(i0, spl=spl):
            mask = mask_scr[pl.ds(i0, TI), :, :].astype(f32)
            s_scr[pl.ds(i0, TI), :] = (
                jnp.sum(mask * spl[None, :, :], axis=1)
                + s_scr[pl.ds(i0, TI), :])

        for_each_tile(interact_tile)

    # ---- phase 6: readout: zero padded atoms, sum over atoms, Linear(H, 1)
    s_fin = s_scr[...] * amask_ref[0]                            # (N, H) * (N, 1)
    stot = jnp.sum(s_fin, axis=0, keepdims=True)                 # (1, H)
    out = jnp.sum(stot * w_out_ref[...], axis=-1, keepdims=True) + b_out_ref[...]
    out_ref[...] = jnp.reshape(out * y_std + y_mean, (1, 1, 1))


# ----------------------------------------------------------------------------
# Graph construction helpers (Mol2Graph is not in the reference module).
# TODO(synk): Mol2Graph source is not provided; a standard embedding +
# cosine-cutoff adjacency + Gaussian-RBF edge-feature builder with the
# documented output shapes is synthesized (the RBF and unit vectors are
# evaluated inside the kernel directly from atomic positions).
# ----------------------------------------------------------------------------
def _pairwise_dist(pos):
    rij = pos[:, None, :, :] - pos[:, :, None, :]             # rij[b,i,j] = pos_j - pos_i
    d2 = jnp.sum(rij * rij, axis=-1)
    d = jnp.sqrt(jnp.maximum(d2, 1e-12))
    return rij, d


def _cosine_adjacency(z, d, cutoff):
    N = z.shape[1]
    eye = jnp.eye(N, dtype=bool)[None]
    pair = (z[:, :, None] != 0) & (z[:, None, :] != 0) & (~eye)
    return jnp.where(pair & (d < cutoff),
                     0.5 * (jnp.cos(jnp.pi * d / cutoff) + 1.0), 0.0)


def mol2graph(z, pos, emb_table, cutoff):
    s0 = emb_table[z]                                          # (B, N, H)
    rij, d = _pairwise_dist(pos)
    eye = jnp.eye(z.shape[1], dtype=bool)[None]
    ev = jnp.where(eye[..., None], 0.0, rij / d[..., None])    # (B, N, N, 3)
    adj = _cosine_adjacency(z, d, cutoff)
    return (s0.astype(jnp.float32), adj.astype(jnp.float32),
            d.astype(jnp.float32), ev.astype(jnp.float32))


# ----------------------------------------------------------------------------
# VMEM / tiling planning
# ----------------------------------------------------------------------------
def _pick_vmem_limit():
    cap = 0
    try:
        info = pltpu.get_tpu_info()
        cap = int(getattr(info, "vmem_capacity_bytes", 0) or 0)
    except Exception:
        cap = 0
    if cap <= 0:
        cap = 128 * 1024 * 1024      # conservative default (v5e/v6e class)
    # ~20% headroom for double-buffered inputs and compiler temporaries;
    # never request more than ~112 MiB even on 128 MiB parts.
    return max(32 * 1024 * 1024, min(int(cap * 0.80), 112 * 1024 * 1024))


def _plan_tile(N, H, E, vmem_limit):
    # persistent scratch: bf16 (N,N,H) mask + f32 v/kv (2 x 3N,H) + f32 s (N,H)
    persistent = 2 * N * N * H + 4 * (2 * 3 * N * H + N * H)

    def tile_live(ti):
        # rough f32 live set of the heaviest (dir) phase, x2 for compiler temps
        return 2 * 4 * ti * N * (2 * H + 2 * H + H + H + H + E)

    budget = vmem_limit - persistent - 4 * 1024 * 1024
    for cand in (128, 64, 32, 16, 8):
        if N % cand == 0 and tile_live(cand) <= budget:
            return cand
    raise ValueError(
        "GNNLF Pallas kernel: the resident (N, N, H) mask scratch does not fit "
        f"VMEM (N={N}, H={H}, limit={vmem_limit} bytes). Reduce N/H or stream "
        "the mask through HBM.")  # TODO(synk): HBM-streamed mask for large N.


def _pad_atoms(z, pos):
    B, N = z.shape
    Np = max(8, ((N + 7) // 8) * 8)
    if Np != N:
        z = jnp.pad(z, ((0, 0), (0, Np - N)))
        pos = jnp.pad(pos, ((0, 0), (0, Np - N), (0, 0)))
    return z, pos


# ----------------------------------------------------------------------------
# Wrapper
# ----------------------------------------------------------------------------
def gnnlf_forward_pallas(z, pos, p):
    z = z.astype(jnp.int32)
    pos = pos.astype(jnp.float32)
    z, pos = _pad_atoms(z, pos)
    B, N = z.shape
    H = int(p['w_s2v'].shape[0])
    E = int(p['ef_mu'].shape[0])
    L = int(p['w_int'].shape[0])

    bf16 = jnp.bfloat16

    # Only the adjacency (cosine cutoff) is precomputed; distances and unit
    # vectors are rebuilt in-kernel from pos.  adj ships in bf16.
    s0 = p['m2g_emb'][z].astype(jnp.float32)                  # (B, N, H)
    _, d = _pairwise_dist(pos)
    adj = _cosine_adjacency(z, d, p['cutoff']).astype(bf16)   # (B, N, N) bf16
    semb = _layer_norm(p['nb_emb'][z]).astype(jnp.float32)    # LN precomputed in wrapper
    amask = (z != 0).astype(jnp.float32)[:, :, None]          # (B, N, 1)
    pos_t = jnp.transpose(pos, (0, 2, 1))                     # (B, 3, N) lane-dense in N

    vmem_limit = _pick_vmem_limit()
    ti = _plan_tile(N, H, E, vmem_limit)

    mu = p['ef_mu'].reshape(1, E).astype(jnp.float32)
    weights = [
        p['w_ef'].astype(bf16), p['b_ef'],
        p['w_s2v'].astype(bf16), p['b_s2v'],
        p['w_q'].astype(bf16), p['w_k'].astype(bf16),
        p['w_d1'].astype(bf16), p['b_d1'],
        p['w_d2'].astype(bf16), p['b_d2'],
        p['w_int'].astype(bf16), p['b_int'],
        p['w_out'], p['b_out'],
    ]

    def batch_spec(shape):
        nd = len(shape)
        return pl.BlockSpec((1,) + tuple(shape[1:]),
                            lambda b, nd=nd: (b,) + (0,) * (nd - 1))

    def weight_spec(arr):
        nd = arr.ndim
        return pl.BlockSpec(arr.shape, lambda b, nd=nd: (0,) * nd)

    batch_inputs = [s0, semb, adj, pos, pos_t, amask]
    in_specs = ([batch_spec(a.shape) for a in batch_inputs]
                + [weight_spec(mu)]
                + [weight_spec(w) for w in weights])

    kernel = functools.partial(
        gnnlf_kernel, num_layers=L, hid_dim=H, ef_gamma=float(p['ef_gamma']),
        y_mean=float(p['y_mean']), y_std=float(p['y_std']), tile_i=int(ti))

    out = pl.pallas_call(
        kernel,
        grid=(B,),
        in_specs=in_specs,
        out_specs=pl.BlockSpec((1, 1, 1), lambda b: (b, 0, 0)),
        out_shape=jax.ShapeDtypeStruct((B, 1, 1), jnp.float32),
        scratch_shapes=[
            pltpu.VMEM((N, N, H), jnp.bfloat16),   # shared filter mask (resident)
            pltpu.VMEM((3 * N, H), jnp.float32),   # v stacked over the 3 directions
            pltpu.VMEM((3 * N, H), jnp.float32),   # k_proj(v)
            pltpu.VMEM((N, H), jnp.float32),       # per-atom state s
        ],
        compiler_params=pltpu.CompilerParams(
            dimension_semantics=("parallel",),
            vmem_limit_bytes=int(vmem_limit)),
    )(*batch_inputs, mu, *weights)
    return out.reshape(B, 1)


# ----------------------------------------------------------------------------
# Pure-JAX reference (mirrors the PyTorch forward). With use_bf16=True it also
# mirrors the kernel's bf16 MXU-operand casts, bf16 adjacency, and bf16 mask
# storage, so it can be compared tightly against the Pallas output.
# ----------------------------------------------------------------------------
def gnnlf_forward_reference(z, pos, p, use_bf16=False):
    H = int(p['w_s2v'].shape[0])
    E = int(p['ef_mu'].shape[0])

    def mm(a, w):
        if use_bf16:
            a = a.astype(jnp.bfloat16)
            w = w.astype(jnp.bfloat16)
        return jnp.dot(a, w, preferred_element_type=jnp.float32)

    def q(x):  # storage quantization (bf16 round-trip)
        return x.astype(jnp.bfloat16).astype(jnp.float32) if use_bf16 else x

    s0, adj, d, ev = mol2graph(z, pos, p['m2g_emb'], p['cutoff'])
    adj = q(adj)                                              # kernel ships adj in bf16
    semb = _layer_norm(p['nb_emb'][z])
    ef = jnp.exp(-p['ef_gamma'] * (d[..., None] - p['ef_mu'].reshape(1, 1, 1, E)) ** 2)

    mask_f = _silu(mm(ef, p['w_ef']) + p['b_ef']) * adj[..., None]        # (B,N,N,H) f32
    s = s0 + jnp.sum(mask_f * semb[:, None, :, :], axis=2)    # kernel keeps f32 mask live here
    mask = q(mask_f)                                          # bf16-resident copy thereafter
    sp = _silu(_layer_norm(mm(s, p['w_s2v']) + p['b_s2v']))
    sm = sp[:, None, :, :] * mask
    v = jnp.sum(sm[:, :, :, None, :] * ev[..., None], axis=2)            # (B,N,3,H)

    qv = mm(v, p['w_q'])
    kv = mm(v, p['w_k'])
    dir2 = jnp.sum(v[:, :, None, :, :] * ev[..., None], axis=3) * adj[..., None]
    dir3 = jnp.sum(qv[:, None, :, :, :] * kv[:, :, None, :, :], axis=3) * adj[..., None]

    h1 = _silu(mm(dir2, p['w_d1'][:H]) + mm(dir3, p['w_d1'][H:]) + p['b_d1'])
    h2 = _silu(mm(h1, p['w_d2']) + p['b_d2'])
    mask = q(mask * h2)

    for l in range(p['w_int'].shape[0]):
        spl = _silu(_layer_norm(mm(s, p['w_int'][l]) + p['b_int'][l]))
        s = jnp.sum(mask * spl[:, None, :, :], axis=2) + s

    s = s * (z != 0).astype(jnp.float32)[..., None]
    s = jnp.sum(s, axis=1)
    out = jnp.sum(s * p['w_out'], axis=-1, keepdims=True) + p['b_out']
    return out * p['y_std'] + p['y_mean']


def init_params(key, H, E, L, max_z, cutoff=5.0, y_mean=0.5, y_std=2.0):
    ks = jax.random.split(key, 16)

    def nrm(k, shape, scale=0.2):
        return (scale * jax.random.normal(k, shape)).astype(jnp.float32)

    return dict(
        m2g_emb=nrm(ks[0], (max_z, H)).at[0].set(0.0),   # padding_idx=0
        nb_emb=nrm(ks[1], (max_z, H)).at[0].set(0.0),    # padding_idx=0
        w_ef=nrm(ks[2], (E, H)), b_ef=nrm(ks[3], (1, H)),
        w_s2v=nrm(ks[4], (H, H)), b_s2v=nrm(ks[5], (1, H)),
        w_q=nrm(ks[6], (H, H)), w_k=nrm(ks[7], (H, H)),
        w_d1=nrm(ks[8], (2 * H, 2 * H)), b_d1=nrm(ks[9], (1, 2 * H)),
        w_d2=nrm(ks[10], (2 * H, H)), b_d2=nrm(ks[11], (1, H)),
        w_int=nrm(ks[12], (L, H, H)), b_int=nrm(ks[13], (L, 1, H)),
        w_out=nrm(ks[14], (1, H)), b_out=nrm(ks[15], (1, 1)),
        ef_mu=jnp.linspace(0.0, cutoff, E).astype(jnp.float32),
        ef_gamma=10.0, cutoff=cutoff, y_mean=y_mean, y_std=y_std,
    )


if __name__ == "__main__":
    B, N, H, E, L, max_z = 2, 8, 32, 16, 2, 10
    key = jax.random.PRNGKey(0)
    kz, kp, kw = jax.random.split(key, 3)

    z = jax.random.randint(kz, (B, N), 1, max_z).astype(jnp.int32)
    z = z.at[1, -2:].set(0)                       # padding atoms in molecule 1
    pos = (1.5 * jax.random.normal(kp, (B, N, 3))).astype(jnp.float32)
    params = init_params(kw, H, E, L, max_z)

    out = gnnlf_forward_pallas(z, pos, params)
    out = jax.block_until_ready(out)

    # Primary check: reference mirroring the kernel's bf16 casts/storage.
    ref_bf16 = gnnlf_forward_reference(z, pos, params, use_bf16=True)
    # Sanity check: pure f32 reference (loose tolerance — kernel uses bf16 MXU operands).
    ref_f32 = gnnlf_forward_reference(z, pos, params, use_bf16=False)

    assert out.shape == (B, 1)
    assert bool(jnp.all(jnp.isfinite(out)))
    assert bool(jnp.allclose(out, ref_bf16, rtol=1e-2, atol=1e-2)), (out, ref_bf16)
    assert bool(jnp.allclose(out, ref_f32, rtol=2e-1, atol=2e-1)), (out, ref_f32)
    print("KERNEL_OK")
</pallas_src>

<mosaic_0001>
module attributes {stable_mosaic.version = 11 : i64} {
  func.func @gnnlf_kernel(%arg0: i32, %arg1: memref<1x8x32xf32, #tpu.memory_space<vmem>>, %arg2: memref<1x8x32xf32, #tpu.memory_space<vmem>>, %arg3: memref<1x8x8xbf16, #tpu.memory_space<vmem>>, %arg4: memref<1x8x3xf32, #tpu.memory_space<vmem>>, %arg5: memref<1x3x8xf32, #tpu.memory_space<vmem>>, %arg6: memref<1x8x1xf32, #tpu.memory_space<vmem>>, %arg7: memref<1x16xf32, #tpu.memory_space<vmem>>, %arg8: memref<16x32xbf16, #tpu.memory_space<vmem>>, %arg9: memref<1x32xf32, #tpu.memory_space<vmem>>, %arg10: memref<32x32xbf16, #tpu.memory_space<vmem>>, %arg11: memref<1x32xf32, #tpu.memory_space<vmem>>, %arg12: memref<32x32xbf16, #tpu.memory_space<vmem>>, %arg13: memref<32x32xbf16, #tpu.memory_space<vmem>>, %arg14: memref<64x64xbf16, #tpu.memory_space<vmem>>, %arg15: memref<1x64xf32, #tpu.memory_space<vmem>>, %arg16: memref<64x32xbf16, #tpu.memory_space<vmem>>, %arg17: memref<1x32xf32, #tpu.memory_space<vmem>>, %arg18: memref<2x32x32xbf16, #tpu.memory_space<vmem>>, %arg19: memref<2x1x32xf32, #tpu.memory_space<vmem>>, %arg20: memref<1x32xf32, #tpu.memory_space<vmem>>, %arg21: memref<1x1xf32, #tpu.memory_space<vmem>>, %arg22: memref<1x1x1xf32, #tpu.memory_space<vmem>>, %arg23: memref<8x8x32xbf16, #tpu.memory_space<vmem>>, %arg24: memref<24x32xf32, #tpu.memory_space<vmem>>, %arg25: memref<24x32xf32, #tpu.memory_space<vmem>>, %arg26: memref<8x32xf32, #tpu.memory_space<vmem>>) attributes {dimension_semantics = [#tpu.dimension_semantics<parallel>], iteration_bounds = array<i64: 2>, scalar_prefetch = 0 : i64, scratch_operands = 4 : i64, tpu.core_type = #tpu.core_type<tc>, window_params = [{transform_indices = @transform_0, window_bounds = array<i64: 1, 8, 32>}, {transform_indices = @transform_1, window_bounds = array<i64: 1, 8, 32>}, {transform_indices = @transform_2, window_bounds = array<i64: 1, 8, 8>}, {transform_indices = @transform_3, window_bounds = array<i64: 1, 8, 3>}, {transform_indices = @transform_4, window_bounds = array<i64: 1, 3, 8>}, {transform_indices = @transform_5, window_bounds = array<i64: 1, 8, 1>}, {pipeline_mode = #tpu.pipeline_mode<synchronous>, transform_indices = @transform_6, window_bounds = array<i64: 1, 16>}, {pipeline_mode = #tpu.pipeline_mode<synchronous>, transform_indices = @transform_7, window_bounds = array<i64: 16, 32>}, {pipeline_mode = #tpu.pipeline_mode<synchronous>, transform_indices = @transform_8, window_bounds = array<i64: 1, 32>}, {pipeline_mode = #tpu.pipeline_mode<synchronous>, transform_indices = @transform_9, window_bounds = array<i64: 32, 32>}, {pipeline_mode = #tpu.pipeline_mode<synchronous>, transform_indices = @transform_10, window_bounds = array<i64: 1, 32>}, {pipeline_mode = #tpu.pipeline_mode<synchronous>, transform_indices = @transform_11, window_bounds = array<i64: 32, 32>}, {pipeline_mode = #tpu.pipeline_mode<synchronous>, transform_indices = @transform_12, window_bounds = array<i64: 32, 32>}, {pipeline_mode = #tpu.pipeline_mode<synchronous>, transform_indices = @transform_13, window_bounds = array<i64: 64, 64>}, {pipeline_mode = #tpu.pipeline_mode<synchronous>, transform_indices = @transform_14, window_bounds = array<i64: 1, 64>}, {pipeline_mode = #tpu.pipeline_mode<synchronous>, transform_indices = @transform_15, window_bounds = array<i64: 64, 32>}, {pipeline_mode = #tpu.pipeline_mode<synchronous>, transform_indices = @transform_16, window_bounds = array<i64: 1, 32>}, {pipeline_mode = #tpu.pipeline_mode<synchronous>, transform_indices = @transform_17, window_bounds = array<i64: 2, 32, 32>}, {pipeline_mode = #tpu.pipeline_mode<synchronous>, transform_indices = @transform_18, window_bounds = array<i64: 2, 1, 32>}, {pipeline_mode = #tpu.pipeline_mode<synchronous>, transform_indices = @transform_19, window_bounds = array<i64: 1, 32>}, {pipeline_mode = #tpu.pipeline_mode<synchronous>, transform_indices = @transform_20, window_bounds = array<i64: 1, 1>}, {transform_indices = @transform_21, window_bounds = array<i64: 1, 1, 1>}]} {
    %c0 = arith.constant 0 : index
    %c0_0 = arith.constant 0 : index
    %c0_1 = arith.constant 0 : index
    %0 = vector.load %arg2[%c0, %c0_0, %c0_1] : memref<1x8x32xf32, #tpu.memory_space<vmem>>, vector<1x8x32xf32>
    %1 = vector.shape_cast %0 : vector<1x8x32xf32> to vector<8x32xf32>
    %c0_2 = arith.constant 0 : index
    %c0_3 = arith.constant 0 : index
    %2 = vector.load %arg7[%c0_2, %c0_3] : memref<1x16xf32, #tpu.memory_space<vmem>>, vector<1x16xf32>
    %c0_4 = arith.constant 0 : index
    %c0_5 = arith.constant 0 : index
    %3 = vector.load %arg8[%c0_4, %c0_5] : memref<16x32xbf16, #tpu.memory_space<vmem>>, vector<16x32xbf16>
    %c0_6 = arith.constant 0 : index
    %c0_7 = arith.constant 0 : index
    %4 = vector.load %arg9[%c0_6, %c0_7] : memref<1x32xf32, #tpu.memory_space<vmem>>, vector<1x32xf32>
    %c0_8 = arith.constant 0 : index
    %c0_9 = arith.constant 0 : index
    %c0_10 = arith.constant 0 : index
    %5 = vector.load %arg5[%c0_8, %c0_9, %c0_10] : memref<1x3x8xf32, #tpu.memory_space<vmem>>, vector<1x1x8xf32>
    %6 = vector.shape_cast %5 : vector<1x1x8xf32> to vector<1x8xf32>
    %c0_11 = arith.constant 0 : index
    %c0_12 = arith.constant 0 : index
    %c0_13 = arith.constant 0 : index
    %7 = vector.load %arg4[%c0_11, %c0_12, %c0_13] : memref<1x8x3xf32, #tpu.memory_space<vmem>>, vector<1x8x1xf32>
    %8 = vector.shape_cast %7 : vector<1x8x1xf32> to vector<8x1xf32>
    %9 = vector.broadcast %6 : vector<1x8xf32> to vector<8x8xf32>
    %10 = vector.broadcast %8 : vector<8x1xf32> to vector<8x8xf32>
    %11 = arith.subf %9, %10 : vector<8x8xf32>
    %12 = arith.mulf %11, %11 : vector<8x8xf32>
    %c0_14 = arith.constant 0 : index
    %c1 = arith.constant 1 : index
    %c0_15 = arith.constant 0 : index
    %13 = vector.load %arg5[%c0_14, %c1, %c0_15] : memref<1x3x8xf32, #tpu.memory_space<vmem>>, vector<1x1x8xf32>
    %14 = vector.shape_cast %13 : vector<1x1x8xf32> to vector<1x8xf32>
    %c0_16 = arith.constant 0 : index
    %c0_17 = arith.constant 0 : index
    %c1_18 = arith.constant 1 : index
    %15 = vector.load %arg4[%c0_16, %c0_17, %c1_18] : memref<1x8x3xf32, #tpu.memory_space<vmem>>, vector<1x8x1xf32>
    %16 = vector.shape_cast %15 : vector<1x8x1xf32> to vector<8x1xf32>
    %17 = vector.broadcast %14 : vector<1x8xf32> to vector<8x8xf32>
    %18 = vector.broadcast %16 : vector<8x1xf32> to vector<8x8xf32>
    %19 = arith.subf %17, %18 : vector<8x8xf32>
    %20 = arith.mulf %19, %19 : vector<8x8xf32>
    %21 = arith.addf %12, %20 : vector<8x8xf32>
    %c0_19 = arith.constant 0 : index
    %c2 = arith.constant 2 : index
    %c0_20 = arith.constant 0 : index
    %22 = vector.load %arg5[%c0_19, %c2, %c0_20] : memref<1x3x8xf32, #tpu.memory_space<vmem>>, vector<1x1x8xf32>
    %23 = vector.shape_cast %22 : vector<1x1x8xf32> to vector<1x8xf32>
    %c0_21 = arith.constant 0 : index
    %c0_22 = arith.constant 0 : index
    %c2_23 = arith.constant 2 : index
    %24 = vector.load %arg4[%c0_21, %c0_22, %c2_23] : memref<1x8x3xf32, #tpu.memory_space<vmem>>, vector<1x8x1xf32>
    %25 = vector.shape_cast %24 : vector<1x8x1xf32> to vector<8x1xf32>
    %26 = vector.broadcast %23 : vector<1x8xf32> to vector<8x8xf32>
    %27 = vector.broadcast %25 : vector<8x1xf32> to vector<8x8xf32>
    %28 = arith.subf %26, %27 : vector<8x8xf32>
    %29 = arith.mulf %28, %28 : vector<8x8xf32>
    %30 = arith.addf %21, %29 : vector<8x8xf32>
    %cst = arith.constant 9.99999996E-13 : f32
    %31 = vector.broadcast %cst : f32 to vector<8x8xf32>
    %32 = arith.maximumf %30, %31 : vector<8x8xf32>
    %33 = math.sqrt %32 : vector<8x8xf32>
    %c0_24 = arith.constant 0 : index
    %c0_25 = arith.constant 0 : index
    %c0_26 = arith.constant 0 : index
    %34 = vector.load %arg3[%c0_24, %c0_25, %c0_26] : memref<1x8x8xbf16, #tpu.memory_space<vmem>>, vector<1x8x8xbf16>
    %35 = vector.shape_cast %34 : vector<1x8x8xbf16> to vector<8x8xbf16>
    %36 = vector.shape_cast %35 : vector<8x8xbf16> to vector<8x8x1xbf16>
    %37 = vector.shape_cast %33 : vector<8x8xf32> to vector<8x8x1xf32>
    %38 = vector.shape_cast %2 : vector<1x16xf32> to vector<1x1x16xf32>
    %39 = vector.broadcast %37 : vector<8x8x1xf32> to vector<8x8x16xf32>
    %40 = vector.broadcast %38 : vector<1x1x16xf32> to vector<8x8x16xf32>
    %41 = arith.subf %39, %40 : vector<8x8x16xf32>
    %42 = arith.mulf %41, %41 : vector<8x8x16xf32>
    %cst_27 = arith.constant -1.000000e+01 : f32
    %43 = vector.broadcast %cst_27 : f32 to vector<8x8x16xf32>
    %44 = arith.mulf %43, %42 : vector<8x8x16xf32>
    %45 = math.exp %44 : vector<8x8x16xf32>
    %46 = vector.shape_cast %45 : vector<8x8x16xf32> to vector<64x16xf32>
    %47 = arith.truncf %46 : vector<64x16xf32> to vector<64x16xbf16>
    %cst_28 = arith.constant dense<0.000000e+00> : vector<64x32xf32>
    %48 = tpu.matmul %47, %3, %cst_28 {dimension_numbers = #tpu.dot_dimension_numbers<[1], [0], [0], [1], [0, 0, 1, 1], [], []>} : vector<64x16xbf16>, vector<16x32xbf16>, vector<64x32xf32> -> vector<64x32xf32>
    %49 = vector.broadcast %4 : vector<1x32xf32> to vector<64x32xf32>
    %50 = arith.addf %48, %49 : vector<64x32xf32>
    %cst_29 = arith.constant 5.000000e-01 : f32
    %51 = vector.broadcast %cst_29 : f32 to vector<64x32xf32>
    %52 = arith.mulf %51, %50 : vector<64x32xf32>
    %cst_30 = arith.constant 5.000000e-01 : f32
    %53 = vector.broadcast %cst_30 : f32 to vector<64x32xf32>
    %54 = arith.mulf %53, %50 : vector<64x32xf32>
    %55 = math.tanh %54 : vector<64x32xf32>
    %cst_31 = arith.constant 1.000000e+00 : f32
    %56 = vector.broadcast %cst_31 : f32 to vector<64x32xf32>
    %57 = arith.addf %55, %56 : vector<64x32xf32>
    %58 = arith.mulf %52, %57 : vector<64x32xf32>
    %59 = vector.shape_cast %58 : vector<64x32xf32> to vector<8x8x32xf32>
    %60 = arith.extf %36 : vector<8x8x1xbf16> to vector<8x8x1xf32>
    %61 = vector.broadcast %60 : vector<8x8x1xf32> to vector<8x8x32xf32>
    %62 = arith.mulf %59, %61 : vector<8x8x32xf32>
    %63 = arith.truncf %62 : vector<8x8x32xf32> to vector<8x8x32xbf16>
    %c0_32 = arith.constant 0 : index
    %c0_33 = arith.constant 0 : index
    %c0_34 = arith.constant 0 : index
    %64 = vector.load %arg23[%c0_32, %c0_33, %c0_34] : memref<8x8x32xbf16, #tpu.memory_space<vmem>>, vector<8x8x32xbf16>
    tpu.vector_store %arg23[%c0_32, %c0_33, %c0_34], %63 {strides = array<i32>} : memref<8x8x32xbf16, #tpu.memory_space<vmem>>, vector<8x8x32xbf16>,
    %c0_35 = arith.constant 0 : index
    %c0_36 = arith.constant 0 : index
    %c0_37 = arith.constant 0 : index
    %65 = vector.load %arg1[%c0_35, %c0_36, %c0_37] : memref<1x8x32xf32, #tpu.memory_space<vmem>>, vector<1x8x32xf32>
    %66 = vector.shape_cast %65 : vector<1x8x32xf32> to vector<8x32xf32>
    %67 = vector.shape_cast %1 : vector<8x32xf32> to vector<1x8x32xf32>
    %68 = vector.broadcast %67 : vector<1x8x32xf32> to vector<8x8x32xf32>
    %69 = arith.mulf %62, %68 : vector<8x8x32xf32>
    %cst_38 = arith.constant dense<0.000000e+00> : vector<8x32xf32>
    %70 = vector.multi_reduction <add>, %69, %cst_38 [1] : vector<8x8x32xf32> to vector<8x32xf32>
    %71 = arith.addf %66, %70 : vector<8x32xf32>
    %c0_39 = arith.constant 0 : index
    %c0_40 = arith.constant 0 : index
    %72 = vector.load %arg26[%c0_39, %c0_40] : memref<8x32xf32, #tpu.memory_space<vmem>>, vector<8x32xf32>
    tpu.vector_store %arg26[%c0_39, %c0_40], %71 {strides = array<i32>} : memref<8x32xf32, #tpu.memory_space<vmem>>, vector<8x32xf32>,
    %c0_41 = arith.constant 0 : index
    %c0_42 = arith.constant 0 : index
    %73 = vector.load %arg26[%c0_41, %c0_42] : memref<8x32xf32, #tpu.memory_space<vmem>>, vector<8x32xf32>
    %74 = arith.truncf %73 : vector<8x32xf32> to vector<8x32xbf16>
    %c0_43 = arith.constant 0 : index
    %c0_44 = arith.constant 0 : index
    %75 = vector.load %arg10[%c0_43, %c0_44] : memref<32x32xbf16, #tpu.memory_space<vmem>>, vector<32x32xbf16>
    %cst_45 = arith.constant dense<0.000000e+00> : vector<8x32xf32>
    %76 = tpu.matmul %74, %75, %cst_45 {dimension_numbers = #tpu.dot_dimension_numbers<[1], [0], [0], [1], [0, 0, 1, 1], [], []>} : vector<8x32xbf16>, vector<32x32xbf16>, vector<8x32xf32> -> vector<8x32xf32>
    %c0_46 = arith.constant 0 : index
    %c0_47 = arith.constant 0 : index
    %77 = vector.load %arg11[%c0_46, %c0_47] : memref<1x32xf32, #tpu.memory_space<vmem>>, vector<1x32xf32>
    %78 = vector.broadcast %77 : vector<1x32xf32> to vector<8x32xf32>
    %79 = arith.addf %76, %78 : vector<8x32xf32>
    %cst_48 = arith.constant dense<0.000000e+00> : vector<8xf32>
    %80 = vector.multi_reduction <add>, %79, %cst_48 [1] : vector<8x32xf32> to vector<8xf32>
    %81 = vector.shape_cast %80 : vector<8xf32> to vector<8x1xf32>
    %cst_49 = arith.constant 3.200000e+01 : f32
    %82 = vector.broadcast %cst_49 : f32 to vector<8x1xf32>
    %83 = arith.divf %81, %82 : vector<8x1xf32>
    %84 = vector.broadcast %83 : vector<8x1xf32> to vector<8x32xf32>
    %85 = arith.subf %79, %84 : vector<8x32xf32>
    %86 = arith.mulf %85, %85 : vector<8x32xf32>
    %cst_50 = arith.constant dense<0.000000e+00> : vector<8xf32>
    %87 = vector.multi_reduction <add>, %86, %cst_50 [1] : vector<8x32xf32> to vector<8xf32>
    %88 = vector.shape_cast %87 : vector<8xf32> to vector<8x1xf32>
    %cst_51 = arith.constant 3.200000e+01 : f32
    %89 = vector.broadcast %cst_51 : f32 to vector<8x1xf32>
    %90 = arith.divf %88, %89 : vector<8x1xf32>
    %91 = vector.broadcast %83 : vector<8x1xf32> to vector<8x32xf32>
    %92 = arith.subf %79, %91 : vector<8x32xf32>
    %cst_52 = arith.constant 9.99999974E-6 : f32
    %93 = vector.broadcast %cst_52 : f32 to vector<8x1xf32>
    %94 = arith.addf %90, %93 : vector<8x1xf32>
    %95 = math.rsqrt %94 : vector<8x1xf32>
    %96 = vector.broadcast %95 : vector<8x1xf32> to vector<8x32xf32>
    %97 = arith.mulf %92, %96 : vector<8x32xf32>
    %cst_53 = arith.constant 5.000000e-01 : f32
    %98 = vector.broadcast %cst_53 : f32 to vector<8x32xf32>
    %99 = arith.mulf %98, %97 : vector<8x32xf32>
    %cst_54 = arith.constant 5.000000e-01 : f32
    %100 = vector.broadcast %cst_54 : f32 to vector<8x32xf32>
    %101 = arith.mulf %100, %97 : vector<8x32xf32>
    %102 = math.tanh %101 : vector<8x32xf32>
    %cst_55 = arith.constant 1.000000e+00 : f32
    %103 = vector.broadcast %cst_55 : f32 to vector<8x32xf32>
    %104 = arith.addf %102, %103 : vector<8x32xf32>
    %105 = arith.mulf %99, %104 : vector<8x32xf32>
    %c0_56 = arith.constant 0 : index
    %c0_57 = arith.constant 0 : index
    %c0_58 = arith.constant 0 : index
    %106 = vector.load %arg5[%c0_56, %c0_57, %c0_58] : memref<1x3x8xf32, #tpu.memory_space<vmem>>, vector<1x1x8xf32>
    %107 = vector.shape_cast %106 : vector<1x1x8xf32> to vector<1x8xf32>
    %c0_59 = arith.constant 0 : index
    %c0_60 = arith.constant 0 : index
    %c0_61 = arith.constant 0 : index
    %108 = vector.load %arg4[%c0_59, %c0_60, %c0_61] : memref<1x8x3xf32, #tpu.memory_space<vmem>>, vector<1x8x1xf32>
    %109 = vector.shape_cast %108 : vector<1x8x1xf32> to vector<8x1xf32>
    %110 = vector.broadcast %107 : vector<1x8xf32> to vector<8x8xf32>
    %111 = vector.broadcast %109 : vector<8x1xf32> to vector<8x8xf32>
    %112 = arith.subf %110, %111 : vector<8x8xf32>
    %113 = arith.mulf %112, %112 : vector<8x8xf32>
    %c0_62 = arith.constant 0 : index
    %c1_63 = arith.constant 1 : index
    %c0_64 = arith.constant 0 : index
    %114 = vector.load %arg5[%c0_62, %c1_63, %c0_64] : memref<1x3x8xf32, #tpu.memory_space<vmem>>, vector<1x1x8xf32>
    %115 = vector.shape_cast %114 : vector<1x1x8xf32> to vector<1x8xf32>
    %c0_65 = arith.constant 0 : index
    %c0_66 = arith.constant 0 : index
    %c1_67 = arith.constant 1 : index
    %116 = vector.load %arg4[%c0_65, %c0_66, %c1_67] : memref<1x8x3xf32, #tpu.memory_space<vmem>>, vector<1x8x1xf32>
    %117 = vector.shape_cast %116 : vector<1x8x1xf32> to vector<8x1xf32>
    %118 = vector.broadcast %115 : vector<1x8xf32> to vector<8x8xf32>
    %119 = vector.broadcast %117 : vector<8x1xf32> to vector<8x8xf32>
    %120 = arith.subf %118, %119 : vector<8x8xf32>
    %121 = arith.mulf %120, %120 : vector<8x8xf32>
    %122 = arith.addf %113, %121 : vector<8x8xf32>
    %c0_68 = arith.constant 0 : index
    %c2_69 = arith.constant 2 : index
    %c0_70 = arith.constant 0 : index
    %123 = vector.load %arg5[%c0_68, %c2_69, %c0_70] : memref<1x3x8xf32, #tpu.memory_space<vmem>>, vector<1x1x8xf32>
    %124 = vector.shape_cast %123 : vector<1x1x8xf32> to vector<1x8xf32>
    %c0_71 = arith.constant 0 : index
    %c0_72 = arith.constant 0 : index
    %c2_73 = arith.constant 2 : index
    %125 = vector.load %arg4[%c0_71, %c0_72, %c2_73] : memref<1x8x3xf32, #tpu.memory_space<vmem>>, vector<1x8x1xf32>
    %126 = vector.shape_cast %125 : vector<1x8x1xf32> to vector<8x1xf32>
    %127 = vector.broadcast %124 : vector<1x8xf32> to vector<8x8xf32>
    %128 = vector.broadcast %126 : vector<8x1xf32> to vector<8x8xf32>
    %129 = arith.subf %127, %128 : vector<8x8xf32>
    %130 = arith.mulf %129, %129 : vector<8x8xf32>
    %131 = arith.addf %122, %130 : vector<8x8xf32>
    %cst_74 = arith.constant 9.99999996E-13 : f32
    %132 = vector.broadcast %cst_74 : f32 to vector<8x8xf32>
    %133 = arith.maximumf %131, %132 : vector<8x8xf32>
    %134 = math.sqrt %133 : vector<8x8xf32>
    %cst_75 = arith.constant 1.000000e+00 : f32
    %135 = vector.broadcast %cst_75 : f32 to vector<8x8xf32>
    %136 = arith.divf %135, %134 : vector<8x8xf32>
    %137 = arith.mulf %112, %136 : vector<8x8xf32>
    %138 = arith.mulf %120, %136 : vector<8x8xf32>
    %139 = arith.mulf %129, %136 : vector<8x8xf32>
    %140 = vector.shape_cast %105 : vector<8x32xf32> to vector<1x8x32xf32>
    %c0_76 = arith.constant 0 : index
    %c0_77 = arith.constant 0 : index
    %c0_78 = arith.constant 0 : index
    %141 = vector.load %arg23[%c0_76, %c0_77, %c0_78] : memref<8x8x32xbf16, #tpu.memory_space<vmem>>, vector<8x8x32xbf16>
    %142 = arith.extf %141 : vector<8x8x32xbf16> to vector<8x8x32xf32>
    %143 = vector.broadcast %140 : vector<1x8x32xf32> to vector<8x8x32xf32>
    %144 = arith.mulf %143, %142 : vector<8x8x32xf32>
    %145 = vector.shape_cast %137 : vector<8x8xf32> to vector<8x8x1xf32>
    %146 = vector.broadcast %145 : vector<8x8x1xf32> to vector<8x8x32xf32>
    %147 = arith.mulf %144, %146 : vector<8x8x32xf32>
    %cst_79 = arith.constant dense<0.000000e+00> : vector<8x32xf32>
    %148 = vector.multi_reduction <add>, %147, %cst_79 [1] : vector<8x8x32xf32> to vector<8x32xf32>
    %c0_80 = arith.constant 0 : index
    %c0_81 = arith.constant 0 : index
    %149 = vector.load %arg24[%c0_80, %c0_81] : memref<24x32xf32, #tpu.memory_space<vmem>>, vector<8x32xf32>
    tpu.vector_store %arg24[%c0_80, %c0_81], %148 {strides = array<i32>} : memref<24x32xf32, #tpu.memory_space<vmem>>, vector<8x32xf32>,
    %150 = vector.shape_cast %138 : vector<8x8xf32> to vector<8x8x1xf32>
    %151 = vector.broadcast %150 : vector<8x8x1xf32> to vector<8x8x32xf32>
    %152 = arith.mulf %144, %151 : vector<8x8x32xf32>
    %cst_82 = arith.constant dense<0.000000e+00> : vector<8x32xf32>
    %153 = vector.multi_reduction <add>, %152, %cst_82 [1] : vector<8x8x32xf32> to vector<8x32xf32>
    %c8 = arith.constant 8 : index
    %c0_83 = arith.constant 0 : index
    %154 = vector.load %arg24[%c8, %c0_83] : memref<24x32xf32, #tpu.memory_space<vmem>>, vector<8x32xf32>
    tpu.vector_store %arg24[%c8, %c0_83], %153 {strides = array<i32>} : memref<24x32xf32, #tpu.memory_space<vmem>>, vector<8x32xf32>,
    %155 = vector.shape_cast %139 : vector<8x8xf32> to vector<8x8x1xf32>
    %156 = vector.broadcast %155 : vector<8x8x1xf32> to vector<8x8x32xf32>
    %157 = arith.mulf %144, %156 : vector<8x8x32xf32>
    %cst_84 = arith.constant dense<0.000000e+00> : vector<8x32xf32>
    %158 = vector.multi_reduction <add>, %157, %cst_84 [1] : vector<8x8x32xf32> to vector<8x32xf32>
    %c16 = arith.constant 16 : index
    %c0_85 = arith.constant 0 : index
    %159 = vector.load %arg24[%c16, %c0_85] : memref<24x32xf32, #tpu.memory_space<vmem>>, vector<8x32xf32>
    tpu.vector_store %arg24[%c16, %c0_85], %158 {strides = array<i32>} : memref<24x32xf32, #tpu.memory_space<vmem>>, vector<8x32xf32>,
    %c0_86 = arith.constant 0 : index
    %c0_87 = arith.constant 0 : index
    %160 = vector.load %arg24[%c0_86, %c0_87] : memref<24x32xf32, #tpu.memory_space<vmem>>, vector<24x32xf32>
    %161 = arith.truncf %160 : vector<24x32xf32> to vector<24x32xbf16>
    %c0_88 = arith.constant 0 : index
    %c0_89 = arith.constant 0 : index
    %162 = vector.load %arg12[%c0_88, %c0_89] : memref<32x32xbf16, #tpu.memory_space<vmem>>, vector<32x32xbf16>
    %cst_90 = arith.constant dense<0.000000e+00> : vector<24x32xf32>
    %163 = tpu.matmul %161, %162, %cst_90 {dimension_numbers = #tpu.dot_dimension_numbers<[1], [0], [0], [1], [0, 0, 1, 1], [], []>} : vector<24x32xbf16>, vector<32x32xbf16>, vector<24x32xf32> -> vector<24x32xf32>
    %c0_91 = arith.constant 0 : index
    %c0_92 = arith.constant 0 : index
    %164 = vector.load %arg13[%c0_91, %c0_92] : memref<32x32xbf16, #tpu.memory_space<vmem>>, vector<32x32xbf16>
    %cst_93 = arith.constant dense<0.000000e+00> : vector<24x32xf32>
    %165 = tpu.matmul %161, %164, %cst_93 {dimension_numbers = #tpu.dot_dimension_numbers<[1], [0], [0], [1], [0, 0, 1, 1], [], []>} : vector<24x32xbf16>, vector<32x32xbf16>, vector<24x32xf32> -> vector<24x32xf32>
    %c0_94 = arith.constant 0 : index
    %c0_95 = arith.constant 0 : index
    %166 = vector.load %arg25[%c0_94, %c0_95] : memref<24x32xf32, #tpu.memory_space<vmem>>, vector<24x32xf32>
    tpu.vector_store %arg25[%c0_94, %c0_95], %165 {strides = array<i32>} : memref<24x32xf32, #tpu.memory_space<vmem>>, vector<24x32xf32>,
    %c0_96 = arith.constant 0 : index
    %c0_97 = arith.constant 0 : index
    %167 = vector.load %arg14[%c0_96, %c0_97] : memref<64x64xbf16, #tpu.memory_space<vmem>>, vector<64x64xbf16>
    %c0_98 = arith.constant 0 : index
    %c0_99 = arith.constant 0 : index
    %168 = vector.load %arg15[%c0_98, %c0_99] : memref<1x64xf32, #tpu.memory_space<vmem>>, vector<1x64xf32>
    %c0_100 = arith.constant 0 : index
    %c0_101 = arith.constant 0 : index
    %169 = vector.load %arg16[%c0_100, %c0_101] : memref<64x32xbf16, #tpu.memory_space<vmem>>, vector<64x32xbf16>
    %c0_102 = arith.constant 0 : index
    %c0_103 = arith.constant 0 : index
    %170 = vector.load %arg17[%c0_102, %c0_103] : memref<1x32xf32, #tpu.memory_space<vmem>>, vector<1x32xf32>
    %c0_104 = arith.constant 0 : index
    %c0_105 = arith.constant 0 : index
    %c0_106 = arith.constant 0 : index
    %171 = vector.load %arg5[%c0_104, %c0_105, %c0_106] : memref<1x3x8xf32, #tpu.memory_space<vmem>>, vector<1x1x8xf32>
    %172 = vector.shape_cast %171 : vector<1x1x8xf32> to vector<1x8xf32>
    %c0_107 = arith.constant 0 : index
    %c0_108 = arith.constant 0 : index
    %c0_109 = arith.constant 0 : index
    %173 = vector.load %arg4[%c0_107, %c0_108, %c0_109] : memref<1x8x3xf32, #tpu.memory_space<vmem>>, vector<1x8x1xf32>
    %174 = vector.shape_cast %173 : vector<1x8x1xf32> to vector<8x1xf32>
    %175 = vector.broadcast %172 : vector<1x8xf32> to vector<8x8xf32>
    %176 = vector.broadcast %174 : vector<8x1xf32> to vector<8x8xf32>
    %177 = arith.subf %175, %176 : vector<8x8xf32>
    %178 = arith.mulf %177, %177 : vector<8x8xf32>
    %c0_110 = arith.constant 0 : index
    %c1_111 = arith.constant 1 : index
    %c0_112 = arith.constant 0 : index
    %179 = vector.load %arg5[%c0_110, %c1_111, %c0_112] : memref<1x3x8xf32, #tpu.memory_space<vmem>>, vector<1x1x8xf32>
    %180 = vector.shape_cast %179 : vector<1x1x8xf32> to vector<1x8xf32>
    %c0_113 = arith.constant 0 : index
    %c0_114 = arith.constant 0 : index
    %c1_115 = arith.constant 1 : index
    %181 = vector.load %arg4[%c0_113, %c0_114, %c1_115] : memref<1x8x3xf32, #tpu.memory_space<vmem>>, vector<1x8x1xf32>
    %182 = vector.shape_cast %181 : vector<1x8x1xf32> to vector<8x1xf32>
    %183 = vector.broadcast %180 : vector<1x8xf32> to vector<8x8xf32>
    %184 = vector.broadcast %182 : vector<8x1xf32> to vector<8x8xf32>
    %185 = arith.subf %183, %184 : vector<8x8xf32>
    %186 = arith.mulf %185, %185 : vector<8x8xf32>
    %187 = arith.addf %178, %186 : vector<8x8xf32>
    %c0_116 = arith.constant 0 : index
    %c2_117 = arith.constant 2 : index
    %c0_118 = arith.constant 0 : index
    %188 = vector.load %arg5[%c0_116, %c2_117, %c0_118] : memref<1x3x8xf32, #tpu.memory_space<vmem>>, vector<1x1x8xf32>
    %189 = vector.shape_cast %188 : vector<1x1x8xf32> to vector<1x8xf32>
    %c0_119 = arith.constant 0 : index
    %c0_120 = arith.constant 0 : index
    %c2_121 = arith.constant 2 : index
    %190 = vector.load %arg4[%c0_119, %c0_120, %c2_121] : memref<1x8x3xf32, #tpu.memory_space<vmem>>, vector<1x8x1xf32>
    %191 = vector.shape_cast %190 : vector<1x8x1xf32> to vector<8x1xf32>
    %192 = vector.broadcast %189 : vector<1x8xf32> to vector<8x8xf32>
    %193 = vector.broadcast %191 : vector<8x1xf32> to vector<8x8xf32>
    %194 = arith.subf %192, %193 : vector<8x8xf32>
    %195 = arith.mulf %194, %194 : vector<8x8xf32>
    %196 = arith.addf %187, %195 : vector<8x8xf32>
    %cst_122 = arith.constant 9.99999996E-13 : f32
    %197 = vector.broadcast %cst_122 : f32 to vector<8x8xf32>
    %198 = arith.maximumf %196, %197 : vector<8x8xf32>
    %199 = math.sqrt %198 : vector<8x8xf32>
    %cst_123 = arith.constant 1.000000e+00 : f32
    %200 = vector.broadcast %cst_123 : f32 to vector<8x8xf32>
    %201 = arith.divf %200, %199 : vector<8x8xf32>
    %202 = arith.mulf %177, %201 : vector<8x8xf32>
    %203 = arith.mulf %185, %201 : vector<8x8xf32>
    %204 = arith.mulf %194, %201 : vector<8x8xf32>
    %c0_124 = arith.constant 0 : index
    %c0_125 = arith.constant 0 : index
    %c0_126 = arith.constant 0 : index
    %205 = vector.load %arg3[%c0_124, %c0_125, %c0_126] : memref<1x8x8xbf16, #tpu.memory_space<vmem>>, vector<1x8x8xbf16>
    %206 = vector.shape_cast %205 : vector<1x8x8xbf16> to vector<8x8xbf16>
    %207 = vector.shape_cast %206 : vector<8x8xbf16> to vector<8x8x1xbf16>
    %c0_127 = arith.constant 0 : index
    %c0_128 = arith.constant 0 : index
    %208 = vector.load %arg24[%c0_127, %c0_128] : memref<24x32xf32, #tpu.memory_space<vmem>>, vector<8x32xf32>
    %209 = vector.shape_cast %208 : vector<8x32xf32> to vector<8x1x32xf32>
    %210 = vector.shape_cast %202 : vector<8x8xf32> to vector<8x8x1xf32>
    %211 = vector.broadcast %209 : vector<8x1x32xf32> to vector<8x8x32xf32>
    %212 = vector.broadcast %210 : vector<8x8x1xf32> to vector<8x8x32xf32>
    %213 = arith.mulf %211, %212 : vector<8x8x32xf32>
    %cst_129 = arith.constant 0.000000e+00 : f32
    %214 = vector.broadcast %cst_129 : f32 to vector<8x8x32xf32>
    %215 = arith.addf %214, %213 : vector<8x8x32xf32>
    %c8_130 = arith.constant 8 : index
    %c0_131 = arith.constant 0 : index
    %216 = vector.load %arg24[%c8_130, %c0_131] : memref<24x32xf32, #tpu.memory_space<vmem>>, vector<8x32xf32>
    %217 = vector.shape_cast %216 : vector<8x32xf32> to vector<8x1x32xf32>
    %218 = vector.shape_cast %203 : vector<8x8xf32> to vector<8x8x1xf32>
    %219 = vector.broadcast %217 : vector<8x1x32xf32> to vector<8x8x32xf32>
    %220 = vector.broadcast %218 : vector<8x8x1xf32> to vector<8x8x32xf32>
    %221 = arith.mulf %219, %220 : vector<8x8x32xf32>
    %222 = arith.addf %215, %221 : vector<8x8x32xf32>
    %c16_132 = arith.constant 16 : index
    %c0_133 = arith.constant 0 : index
    %223 = vector.load %arg24[%c16_132, %c0_133] : memref<24x32xf32, #tpu.memory_space<vmem>>, vector<8x32xf32>
    %224 = vector.shape_cast %223 : vector<8x32xf32> to vector<8x1x32xf32>
    %225 = vector.shape_cast %204 : vector<8x8xf32> to vector<8x8x1xf32>
    %226 = vector.broadcast %224 : vector<8x1x32xf32> to vector<8x8x32xf32>
    %227 = vector.broadcast %225 : vector<8x8x1xf32> to vector<8x8x32xf32>
    %228 = arith.mulf %226, %227 : vector<8x8x32xf32>
    %229 = arith.addf %222, %228 : vector<8x8x32xf32>
    %230 = arith.extf %207 : vector<8x8x1xbf16> to vector<8x8x1xf32>
    %231 = vector.broadcast %230 : vector<8x8x1xf32> to vector<8x8x32xf32>
    %232 = arith.mulf %229, %231 : vector<8x8x32xf32>
    %233 = vector.shape_cast %232 : vector<8x8x32xf32> to vector<64x32xf32>
    %234 = arith.truncf %233 : vector<64x32xf32> to vector<64x32xbf16>
    %235 = vector.extract_strided_slice %167 {offsets = [0, 0], sizes = [32, 64], strides = [1, 1]} : vector<64x64xbf16> to vector<32x64xbf16>
    %cst_134 = arith.constant dense<0.000000e+00> : vector<64x64xf32>
    %236 = tpu.matmul %234, %235, %cst_134 {dimension_numbers = #tpu.dot_dimension_numbers<[1], [0], [0], [1], [0, 0, 1, 1], [], []>} : vector<64x32xbf16>, vector<32x64xbf16>, vector<64x64xf32> -> vector<64x64xf32>
    %c0_135 = arith.constant 0 : index
    %c0_136 = arith.constant 0 : index
    %237 = vector.load %arg25[%c0_135, %c0_136] : memref<24x32xf32, #tpu.memory_space<vmem>>, vector<8x32xf32>
    %238 = vector.shape_cast %237 : vector<8x32xf32> to vector<8x1x32xf32>
    %239 = vector.extract_strided_slice %163 {offsets = [0, 0], sizes = [8, 32], strides = [1, 1]} : vector<24x32xf32> to vector<8x32xf32>
    %240 = vector.shape_cast %239 : vector<8x32xf32> to vector<1x8x32xf32>
    %241 = vector.broadcast %238 : vector<8x1x32xf32> to vector<8x8x32xf32>
    %242 = vector.broadcast %240 : vector<1x8x32xf32> to vector<8x8x32xf32>
    %243 = arith.mulf %241, %242 : vector<8x8x32xf32>
    %cst_137 = arith.constant 0.000000e+00 : f32
    %244 = vector.broadcast %cst_137 : f32 to vector<8x8x32xf32>
    %245 = arith.addf %244, %243 : vector<8x8x32xf32>
    %c8_138 = arith.constant 8 : index
    %c0_139 = arith.constant 0 : index
    %246 = vector.load %arg25[%c8_138, %c0_139] : memref<24x32xf32, #tpu.memory_space<vmem>>, vector<8x32xf32>
    %247 = vector.shape_cast %246 : vector<8x32xf32> to vector<8x1x32xf32>
    %248 = vector.extract_strided_slice %163 {offsets = [8, 0], sizes = [8, 32], strides = [1, 1]} : vector<24x32xf32> to vector<8x32xf32>
    %249 = vector.shape_cast %248 : vector<8x32xf32> to vector<1x8x32xf32>
    %250 = vector.broadcast %247 : vector<8x1x32xf32> to vector<8x8x32xf32>
    %251 = vector.broadcast %249 : vector<1x8x32xf32> to vector<8x8x32xf32>
    %252 = arith.mulf %250, %251 : vector<8x8x32xf32>
    %253 = arith.addf %245, %252 : vector<8x8x32xf32>
    %c16_140 = arith.constant 16 : index
    %c0_141 = arith.constant 0 : index
    %254 = vector.load %arg25[%c16_140, %c0_141] : memref<24x32xf32, #tpu.memory_space<vmem>>, vector<8x32xf32>
    %255 = vector.shape_cast %254 : vector<8x32xf32> to vector<8x1x32xf32>
    %256 = vector.extract_strided_slice %163 {offsets = [16, 0], sizes = [8, 32], strides = [1, 1]} : vector<24x32xf32> to vector<8x32xf32>
    %257 = vector.shape_cast %256 : vector<8x32xf32> to vector<1x8x32xf32>
    %258 = vector.broadcast %255 : vector<8x1x32xf32> to vector<8x8x32xf32>
    %259 = vector.broadcast %257 : vector<1x8x32xf32> to vector<8x8x32xf32>
    %260 = arith.mulf %258, %259 : vector<8x8x32xf32>
    %261 = arith.addf %253, %260 : vector<8x8x32xf32>
    %262 = arith.extf %207 : vector<8x8x1xbf16> to vector<8x8x1xf32>
    %263 = vector.broadcast %262 : vector<8x8x1xf32> to vector<8x8x32xf32>
    %264 = arith.mulf %261, %263 : vector<8x8x32xf32>
    %265 = vector.shape_cast %264 : vector<8x8x32xf32> to vector<64x32xf32>
    %266 = arith.truncf %265 : vector<64x32xf32> to vector<64x32xbf16>
    %267 = vector.extract_strided_slice %167 {offsets = [32, 0], sizes = [32, 64], strides = [1, 1]} : vector<64x64xbf16> to vector<32x64xbf16>
    %cst_142 = arith.constant dense<0.000000e+00> : vector<64x64xf32>
    %268 = tpu.matmul %266, %267, %cst_142 {dimension_numbers = #tpu.dot_dimension_numbers<[1], [0], [0], [1], [0, 0, 1, 1], [], []>} : vector<64x32xbf16>, vector<32x64xbf16>, vector<64x64xf32> -> vector<64x64xf32>
    %269 = arith.addf %236, %268 : vector<64x64xf32>
    %270 = vector.broadcast %168 : vector<1x64xf32> to vector<64x64xf32>
    %271 = arith.addf %269, %270 : vector<64x64xf32>
    %cst_143 = arith.constant 5.000000e-01 : f32
    %272 = vector.broadcast %cst_143 : f32 to vector<64x64xf32>
    %273 = arith.mulf %272, %271 : vector<64x64xf32>
    %cst_144 = arith.constant 5.000000e-01 : f32
    %274 = vector.broadcast %cst_144 : f32 to vector<64x64xf32>
    %275 = arith.mulf %274, %271 : vector<64x64xf32>
    %276 = math.tanh %275 : vector<64x64xf32>
    %cst_145 = arith.constant 1.000000e+00 : f32
    %277 = vector.broadcast %cst_145 : f32 to vector<64x64xf32>
    %278 = arith.addf %276, %277 : vector<64x64xf32>
    %279 = arith.mulf %273, %278 : vector<64x64xf32>
    %280 = arith.truncf %279 : vector<64x64xf32> to vector<64x64xbf16>
    %cst_146 = arith.constant dense<0.000000e+00> : vector<64x32xf32>
    %281 = tpu.matmul %280, %169, %cst_146 {dimension_numbers = #tpu.dot_dimension_numbers<[1], [0], [0], [1], [0, 0, 1, 1], [], []>} : vector<64x64xbf16>, vector<64x32xbf16>, vector<64x32xf32> -> vector<64x32xf32>
    %282 = vector.broadcast %170 : vector<1x32xf32> to vector<64x32xf32>
    %283 = arith.addf %281, %282 : vector<64x32xf32>
    %cst_147 = arith.constant 5.000000e-01 : f32
    %284 = vector.broadcast %cst_147 : f32 to vector<64x32xf32>
    %285 = arith.mulf %284, %283 : vector<64x32xf32>
    %cst_148 = arith.constant 5.000000e-01 : f32
    %286 = vector.broadcast %cst_148 : f32 to vector<64x32xf32>
    %287 = arith.mulf %286, %283 : vector<64x32xf32>
    %288 = math.tanh %287 : vector<64x32xf32>
    %cst_149 = arith.constant 1.000000e+00 : f32
    %289 = vector.broadcast %cst_149 : f32 to vector<64x32xf32>
    %290 = arith.addf %288, %289 : vector<64x32xf32>
    %291 = arith.mulf %285, %290 : vector<64x32xf32>
    %c0_150 = arith.constant 0 : index
    %c0_151 = arith.constant 0 : index
    %c0_152 = arith.constant 0 : index
    %292 = vector.load %arg23[%c0_150, %c0_151, %c0_152] : memref<8x8x32xbf16, #tpu.memory_space<vmem>>, vector<8x8x32xbf16>
    %293 = arith.extf %292 : vector<8x8x32xbf16> to vector<8x8x32xf32>
    %294 = vector.shape_cast %291 : vector<64x32xf32> to vector<8x8x32xf32>
    %295 = arith.mulf %293, %294 : vector<8x8x32xf32>
    %296 = arith.truncf %295 : vector<8x8x32xf32> to vector<8x8x32xbf16>
    %c0_153 = arith.constant 0 : index
    %c0_154 = arith.constant 0 : index
    %c0_155 = arith.constant 0 : index
    %297 = vector.load %arg23[%c0_153, %c0_154, %c0_155] : memref<8x8x32xbf16, #tpu.memory_space<vmem>>, vector<8x8x32xbf16>
    tpu.vector_store %arg23[%c0_153, %c0_154, %c0_155], %296 {strides = array<i32>} : memref<8x8x32xbf16, #tpu.memory_space<vmem>>, vector<8x8x32xbf16>,
    %c0_156 = arith.constant 0 : index
    %c0_157 = arith.constant 0 : index
    %298 = vector.load %arg26[%c0_156, %c0_157] : memref<8x32xf32, #tpu.memory_space<vmem>>, vector<8x32xf32>
    %299 = arith.truncf %298 : vector<8x32xf32> to vector<8x32xbf16>
    %c0_158 = arith.constant 0 : index
    %c0_159 = arith.constant 0 : index
    %c0_160 = arith.constant 0 : index
    %300 = vector.load %arg18[%c0_158, %c0_159, %c0_160] : memref<2x32x32xbf16, #tpu.memory_space<vmem>>, vector<1x32x32xbf16>
    %301 = vector.shape_cast %300 : vector<1x32x32xbf16> to vector<32x32xbf16>
    %cst_161 = arith.constant dense<0.000000e+00> : vector<8x32xf32>
    %302 = tpu.matmul %299, %301, %cst_161 {dimension_numbers = #tpu.dot_dimension_numbers<[1], [0], [0], [1], [0, 0, 1, 1], [], []>} : vector<8x32xbf16>, vector<32x32xbf16>, vector<8x32xf32> -> vector<8x32xf32>
    %c0_162 = arith.constant 0 : index
    %c0_163 = arith.constant 0 : index
    %c0_164 = arith.constant 0 : index
    %303 = vector.load %arg19[%c0_162, %c0_163, %c0_164] : memref<2x1x32xf32, #tpu.memory_space<vmem>>, vector<1x1x32xf32>
    %304 = vector.shape_cast %303 : vector<1x1x32xf32> to vector<1x32xf32>
    %305 = vector.broadcast %304 : vector<1x32xf32> to vector<8x32xf32>
    %306 = arith.addf %302, %305 : vector<8x32xf32>
    %cst_165 = arith.constant dense<0.000000e+00> : vector<8xf32>
    %307 = vector.multi_reduction <add>, %306, %cst_165 [1] : vector<8x32xf32> to vector<8xf32>
    %308 = vector.shape_cast %307 : vector<8xf32> to vector<8x1xf32>
    %cst_166 = arith.constant 3.200000e+01 : f32
    %309 = vector.broadcast %cst_166 : f32 to vector<8x1xf32>
    %310 = arith.divf %308, %309 : vector<8x1xf32>
    %311 = vector.broadcast %310 : vector<8x1xf32> to vector<8x32xf32>
    %312 = arith.subf %306, %311 : vector<8x32xf32>
    %313 = arith.mulf %312, %312 : vector<8x32xf32>
    %cst_167 = arith.constant dense<0.000000e+00> : vector<8xf32>
    %314 = vector.multi_reduction <add>, %313, %cst_167 [1] : vector<8x32xf32> to vector<8xf32>
    %315 = vector.shape_cast %314 : vector<8xf32> to vector<8x1xf32>
    %cst_168 = arith.constant 3.200000e+01 : f32
    %316 = vector.broadcast %cst_168 : f32 to vector<8x1xf32>
    %317 = arith.divf %315, %316 : vector<8x1xf32>
    %318 = vector.broadcast %310 : vector<8x1xf32> to vector<8x32xf32>
    %319 = arith.subf %306, %318 : vector<8x32xf32>
    %cst_169 = arith.constant 9.99999974E-6 : f32
    %320 = vector.broadcast %cst_169 : f32 to vector<8x1xf32>
    %321 = arith.addf %317, %320 : vector<8x1xf32>
    %322 = math.rsqrt %321 : vector<8x1xf32>
    %323 = vector.broadcast %322 : vector<8x1xf32> to vector<8x32xf32>
    %324 = arith.mulf %319, %323 : vector<8x32xf32>
    %cst_170 = arith.constant 5.000000e-01 : f32
    %325 = vector.broadcast %cst_170 : f32 to vector<8x32xf32>
    %326 = arith.mulf %325, %324 : vector<8x32xf32>
    %cst_171 = arith.constant 5.000000e-01 : f32
    %327 = vector.broadcast %cst_171 : f32 to vector<8x32xf32>
    %328 = arith.mulf %327, %324 : vector<8x32xf32>
    %329 = math.tanh %328 : vector<8x32xf32>
    %cst_172 = arith.constant 1.000000e+00 : f32
    %330 = vector.broadcast %cst_172 : f32 to vector<8x32xf32>
    %331 = arith.addf %329, %330 : vector<8x32xf32>
    %332 = arith.mulf %326, %331 : vector<8x32xf32>
    %c0_173 = arith.constant 0 : index
    %c0_174 = arith.constant 0 : index
    %c0_175 = arith.constant 0 : index
    %333 = vector.load %arg23[%c0_173, %c0_174, %c0_175] : memref<8x8x32xbf16, #tpu.memory_space<vmem>>, vector<8x8x32xbf16>
    %334 = arith.extf %333 : vector<8x8x32xbf16> to vector<8x8x32xf32>
    %335 = vector.shape_cast %332 : vector<8x32xf32> to vector<1x8x32xf32>
    %336 = vector.broadcast %335 : vector<1x8x32xf32> to vector<8x8x32xf32>
    %337 = arith.mulf %334, %336 : vector<8x8x32xf32>
    %cst_176 = arith.constant dense<0.000000e+00> : vector<8x32xf32>
    %338 = vector.multi_reduction <add>, %337, %cst_176 [1] : vector<8x8x32xf32> to vector<8x32xf32>
    %c0_177 = arith.constant 0 : index
    %c0_178 = arith.constant 0 : index
    %339 = vector.load %arg26[%c0_177, %c0_178] : memref<8x32xf32, #tpu.memory_space<vmem>>, vector<8x32xf32>
    %340 = arith.addf %338, %339 : vector<8x32xf32>
    %c0_179 = arith.constant 0 : index
    %c0_180 = arith.constant 0 : index
    %341 = vector.load %arg26[%c0_179, %c0_180] : memref<8x32xf32, #tpu.memory_space<vmem>>, vector<8x32xf32>
    tpu.vector_store %arg26[%c0_179, %c0_180], %340 {strides = array<i32>} : memref<8x32xf32, #tpu.memory_space<vmem>>, vector<8x32xf32>,
    %c0_181 = arith.constant 0 : index
    %c0_182 = arith.constant 0 : index
    %342 = vector.load %arg26[%c0_181, %c0_182] : memref<8x32xf32, #tpu.memory_space<vmem>>, vector<8x32xf32>
    %343 = arith.truncf %342 : vector<8x32xf32> to vector<8x32xbf16>
    %c1_183 = arith.constant 1 : index
    %c0_184 = arith.constant 0 : index
    %c0_185 = arith.constant 0 : index
    %344 = vector.load %arg18[%c1_183, %c0_184, %c0_185] : memref<2x32x32xbf16, #tpu.memory_space<vmem>>, vector<1x32x32xbf16>
    %345 = vector.shape_cast %344 : vector<1x32x32xbf16> to vector<32x32xbf16>
    %cst_186 = arith.constant dense<0.000000e+00> : vector<8x32xf32>
    %346 = tpu.matmul %343, %345, %cst_186 {dimension_numbers = #tpu.dot_dimension_numbers<[1], [0], [0], [1], [0, 0, 1, 1], [], []>} : vector<8x32xbf16>, vector<32x32xbf16>, vector<8x32xf32> -> vector<8x32xf32>
    %c1_187 = arith.constant 1 : index
    %c0_188 = arith.constant 0 : index
    %c0_189 = arith.constant 0 : index
    %347 = vector.load %arg19[%c1_187, %c0_188, %c0_189] : memref<2x1x32xf32, #tpu.memory_space<vmem>>, vector<1x1x32xf32>
    %348 = vector.shape_cast %347 : vector<1x1x32xf32> to vector<1x32xf32>
    %349 = vector.broadcast %348 : vector<1x32xf32> to vector<8x32xf32>
    %350 = arith.addf %346, %349 : vector<8x32xf32>
    %cst_190 = arith.constant dense<0.000000e+00> : vector<8xf32>
    %351 = vector.multi_reduction <add>, %350, %cst_190 [1] : vector<8x32xf32> to vector<8xf32>
    %352 = vector.shape_cast %351 : vector<8xf32> to vector<8x1xf32>
    %cst_191 = arith.constant 3.200000e+01 : f32
    %353 = vector.broadcast %cst_191 : f32 to vector<8x1xf32>
    %354 = arith.divf %352, %353 : vector<8x1xf32>
    %355 = vector.broadcast %354 : vector<8x1xf32> to vector<8x32xf32>
    %356 = arith.subf %350, %355 : vector<8x32xf32>
    %357 = arith.mulf %356, %356 : vector<8x32xf32>
    %cst_192 = arith.constant dense<0.000000e+00> : vector<8xf32>
    %358 = vector.multi_reduction <add>, %357, %cst_192 [1] : vector<8x32xf32> to vector<8xf32>
    %359 = vector.shape_cast %358 : vector<8xf32> to vector<8x1xf32>
    %cst_193 = arith.constant 3.200000e+01 : f32
    %360 = vector.broadcast %cst_193 : f32 to vector<8x1xf32>
    %361 = arith.divf %359, %360 : vector<8x1xf32>
    %362 = vector.broadcast %354 : vector<8x1xf32> to vector<8x32xf32>
    %363 = arith.subf %350, %362 : vector<8x32xf32>
    %cst_194 = arith.constant 9.99999974E-6 : f32
    %364 = vector.broadcast %cst_194 : f32 to vector<8x1xf32>
    %365 = arith.addf %361, %364 : vector<8x1xf32>
    %366 = math.rsqrt %365 : vector<8x1xf32>
    %367 = vector.broadcast %366 : vector<8x1xf32> to vector<8x32xf32>
    %368 = arith.mulf %363, %367 : vector<8x32xf32>
    %cst_195 = arith.constant 5.000000e-01 : f32
    %369 = vector.broadcast %cst_195 : f32 to vector<8x32xf32>
    %370 = arith.mulf %369, %368 : vector<8x32xf32>
    %cst_196 = arith.constant 5.000000e-01 : f32
    %371 = vector.broadcast %cst_196 : f32 to vector<8x32xf32>
    %372 = arith.mulf %371, %368 : vector<8x32xf32>
    %373 = math.tanh %372 : vector<8x32xf32>
    %cst_197 = arith.constant 1.000000e+00 : f32
    %374 = vector.broadcast %cst_197 : f32 to vector<8x32xf32>
    %375 = arith.addf %373, %374 : vector<8x32xf32>
    %376 = arith.mulf %370, %375 : vector<8x32xf32>
    %c0_198 = arith.constant 0 : index
    %c0_199 = arith.constant 0 : index
    %c0_200 = arith.constant 0 : index
    %377 = vector.load %arg23[%c0_198, %c0_199, %c0_200] : memref<8x8x32xbf16, #tpu.memory_space<vmem>>, vector<8x8x32xbf16>
    %378 = arith.extf %377 : vector<8x8x32xbf16> to vector<8x8x32xf32>
    %379 = vector.shape_cast %376 : vector<8x32xf32> to vector<1x8x32xf32>
    %380 = vector.broadcast %379 : vector<1x8x32xf32> to vector<8x8x32xf32>
    %381 = arith.mulf %378, %380 : vector<8x8x32xf32>
    %cst_201 = arith.constant dense<0.000000e+00> : vector<8x32xf32>
    %382 = vector.multi_reduction <add>, %381, %cst_201 [1] : vector<8x8x32xf32> to vector<8x32xf32>
    %c0_202 = arith.constant 0 : index
    %c0_203 = arith.constant 0 : index
    %383 = vector.load %arg26[%c0_202, %c0_203] : memref<8x32xf32, #tpu.memory_space<vmem>>, vector<8x32xf32>
    %384 = arith.addf %382, %383 : vector<8x32xf32>
    %c0_204 = arith.constant 0 : index
    %c0_205 = arith.constant 0 : index
    %385 = vector.load %arg26[%c0_204, %c0_205] : memref<8x32xf32, #tpu.memory_space<vmem>>, vector<8x32xf32>
    tpu.vector_store %arg26[%c0_204, %c0_205], %384 {strides = array<i32>} : memref<8x32xf32, #tpu.memory_space<vmem>>, vector<8x32xf32>,
    %c0_206 = arith.constant 0 : index
    %c0_207 = arith.constant 0 : index
    %386 = vector.load %arg26[%c0_206, %c0_207] : memref<8x32xf32, #tpu.memory_space<vmem>>, vector<8x32xf32>
    %c0_208 = arith.constant 0 : index
    %c0_209 = arith.constant 0 : index
    %c0_210 = arith.constant 0 : index
    %387 = vector.load %arg6[%c0_208, %c0_209, %c0_210] : memref<1x8x1xf32, #tpu.memory_space<vmem>>, vector<1x8x1xf32>
    %388 = vector.shape_cast %387 : vector<1x8x1xf32> to vector<8x1xf32>
    %389 = vector.broadcast %388 : vector<8x1xf32> to vector<8x32xf32>
    %390 = arith.mulf %386, %389 : vector<8x32xf32>
    %cst_211 = arith.constant dense<0.000000e+00> : vector<32xf32>
    %391 = vector.multi_reduction <add>, %390, %cst_211 [0] : vector<8x32xf32> to vector<32xf32>
    %392 = vector.shape_cast %391 : vector<32xf32> to vector<1x32xf32>
    %c0_212 = arith.constant 0 : index
    %c0_213 = arith.constant 0 : index
    %393 = vector.load %arg20[%c0_212, %c0_213] : memref<1x32xf32, #tpu.memory_space<vmem>>, vector<1x32xf32>
    %394 = arith.mulf %392, %393 : vector<1x32xf32>
    %cst_214 = arith.constant dense<0.000000e+00> : vector<1xf32>
    %395 = vector.multi_reduction <add>, %394, %cst_214 [1] : vector<1x32xf32> to vector<1xf32>
    %396 = vector.shape_cast %395 : vector<1xf32> to vector<1x1xf32>
    %c0_215 = arith.constant 0 : index
    %c0_216 = arith.constant 0 : index
    %397 = vector.load %arg21[%c0_215, %c0_216] : memref<1x1xf32, #tpu.memory_space<vmem>>, vector<1x1xf32>
    %398 = arith.addf %396, %397 : vector<1x1xf32>
    %cst_217 = arith.constant 2.000000e+00 : f32
    %399 = vector.broadcast %cst_217 : f32 to vector<1x1xf32>
    %400 = arith.mulf %398, %399 : vector<1x1xf32>
    %cst_218 = arith.constant 5.000000e-01 : f32
    %401 = vector.broadcast %cst_218 : f32 to vector<1x1xf32>
    %402 = arith.addf %400, %401 : vector<1x1xf32>
    %403 = vector.shape_cast %402 : vector<1x1xf32> to vector<1x1x1xf32>
    %c0_219 = arith.constant 0 : index
    %c0_220 = arith.constant 0 : index
    %c0_221 = arith.constant 0 : index
    %404 = vector.load %arg22[%c0_219, %c0_220, %c0_221] : memref<1x1x1xf32, #tpu.memory_space<vmem>>, vector<1x1x1xf32>
    tpu.vector_store %arg22[%c0_219, %c0_220, %c0_221], %403 {strides = array<i32>} : memref<1x1x1xf32, #tpu.memory_space<vmem>>, vector<1x1x1xf32>,
    return
  }
  func.func @transform_0(%arg0: i32) -> (i32, i32, i32) {
    %c0_i32 = arith.constant 0 : i32
    %c0_i32_0 = arith.constant 0 : i32
    %c0_i32_1 = arith.constant 0 : i32
    return %arg0, %c0_i32, %c0_i32_0 : i32, i32, i32
  }
  func.func @transform_1(%arg0: i32) -> (i32, i32, i32) {
    %c0_i32 = arith.constant 0 : i32
    %c0_i32_0 = arith.constant 0 : i32
    %c0_i32_1 = arith.constant 0 : i32
    return %arg0, %c0_i32, %c0_i32_0 : i32, i32, i32
  }
  func.func @transform_2(%arg0: i32) -> (i32, i32, i32) {
    %c0_i32 = arith.constant 0 : i32
    %c0_i32_0 = arith.constant 0 : i32
    %c0_i32_1 = arith.constant 0 : i32
    return %arg0, %c0_i32, %c0_i32_0 : i32, i32, i32
  }
  func.func @transform_3(%arg0: i32) -> (i32, i32, i32) {
    %c0_i32 = arith.constant 0 : i32
    %c0_i32_0 = arith.constant 0 : i32
    %c0_i32_1 = arith.constant 0 : i32
    return %arg0, %c0_i32, %c0_i32_0 : i32, i32, i32
  }
  func.func @transform_4(%arg0: i32) -> (i32, i32, i32) {
    %c0_i32 = arith.constant 0 : i32
    %c0_i32_0 = arith.constant 0 : i32
    %c0_i32_1 = arith.constant 0 : i32
    return %arg0, %c0_i32, %c0_i32_0 : i32, i32, i32
  }
  func.func @transform_5(%arg0: i32) -> (i32, i32, i32) {
    %c0_i32 = arith.constant 0 : i32
    %c0_i32_0 = arith.constant 0 : i32
    %c0_i32_1 = arith.constant 0 : i32
    return %arg0, %c0_i32, %c0_i32_0 : i32, i32, i32
  }
  func.func @transform_6(%arg0: i32) -> (i32, i32) {
    %c0_i32 = arith.constant 0 : i32
    %c0_i32_0 = arith.constant 0 : i32
    %c0_i32_1 = arith.constant 0 : i32
    return %c0_i32, %c0_i32_0 : i32, i32
  }
  func.func @transform_7(%arg0: i32) -> (i32, i32) {
    %c0_i32 = arith.constant 0 : i32
    %c0_i32_0 = arith.constant 0 : i32
    %c0_i32_1 = arith.constant 0 : i32
    return %c0_i32, %c0_i32_0 : i32, i32
  }
  func.func @transform_8(%arg0: i32) -> (i32, i32) {
    %c0_i32 = arith.constant 0 : i32
    %c0_i32_0 = arith.constant 0 : i32
    %c0_i32_1 = arith.constant 0 : i32
    return %c0_i32, %c0_i32_0 : i32, i32
  }
  func.func @transform_9(%arg0: i32) -> (i32, i32) {
    %c0_i32 = arith.constant 0 : i32
    %c0_i32_0 = arith.constant 0 : i32
    %c0_i32_1 = arith.constant 0 : i32
    return %c0_i32, %c0_i32_0 : i32, i32
  }
  func.func @transform_10(%arg0: i32) -> (i32, i32) {
    %c0_i32 = arith.constant 0 : i32
    %c0_i32_0 = arith.constant 0 : i32
    %c0_i32_1 = arith.constant 0 : i32
    return %c0_i32, %c0_i32_0 : i32, i32
  }
  func.func @transform_11(%arg0: i32) -> (i32, i32) {
    %c0_i32 = arith.constant 0 : i32
    %c0_i32_0 = arith.constant 0 : i32
    %c0_i32_1 = arith.constant 0 : i32
    return %c0_i32, %c0_i32_0 : i32, i32
  }
  func.func @transform_12(%arg0: i32) -> (i32, i32) {
    %c0_i32 = arith.constant 0 : i32
    %c0_i32_0 = arith.constant 0 : i32
    %c0_i32_1 = arith.constant 0 : i32
    return %c0_i32, %c0_i32_0 : i32, i32
  }
  func.func @transform_13(%arg0: i32) -> (i32, i32) {
    %c0_i32 = arith.constant 0 : i32
    %c0_i32_0 = arith.constant 0 : i32
    %c0_i32_1 = arith.constant 0 : i32
    return %c0_i32, %c0_i32_0 : i32, i32
  }
  func.func @transform_14(%arg0: i32) -> (i32, i32) {
    %c0_i32 = arith.constant 0 : i32
    %c0_i32_0 = arith.constant 0 : i32
    %c0_i32_1 = arith.constant 0 : i32
    return %c0_i32, %c0_i32_0 : i32, i32
  }
  func.func @transform_15(%arg0: i32) -> (i32, i32) {
    %c0_i32 = arith.constant 0 : i32
    %c0_i32_0 = arith.constant 0 : i32
    %c0_i32_1 = arith.constant 0 : i32
    return %c0_i32, %c0_i32_0 : i32, i32
  }
  func.func @transform_16(%arg0: i32) -> (i32, i32) {
    %c0_i32 = arith.constant 0 : i32
    %c0_i32_0 = arith.constant 0 : i32
    %c0_i32_1 = arith.constant 0 : i32
    return %c0_i32, %c0_i32_0 : i32, i32
  }
  func.func @transform_17(%arg0: i32) -> (i32, i32, i32) {
    %c0_i32 = arith.constant 0 : i32
    %c0_i32_0 = arith.constant 0 : i32
    %c0_i32_1 = arith.constant 0 : i32
    %c0_i32_2 = arith.constant 0 : i32
    return %c0_i32, %c0_i32_0, %c0_i32_1 : i32, i32, i32
  }
  func.func @transform_18(%arg0: i32) -> (i32, i32, i32) {
    %c0_i32 = arith.constant 0 : i32
    %c0_i32_0 = arith.constant 0 : i32
    %c0_i32_1 = arith.constant 0 : i32
    %c0_i32_2 = arith.constant 0 : i32
    return %c0_i32, %c0_i32_0, %c0_i32_1 : i32, i32, i32
  }
  func.func @transform_19(%arg0: i32) -> (i32, i32) {
    %c0_i32 = arith.constant 0 : i32
    %c0_i32_0 = arith.constant 0 : i32
    %c0_i32_1 = arith.constant 0 : i32
    return %c0_i32, %c0_i32_0 : i32, i32
  }
  func.func @transform_20(%arg0: i32) -> (i32, i32) {
    %c0_i32 = arith.constant 0 : i32
    %c0_i32_0 = arith.constant 0 : i32
    %c0_i32_1 = arith.constant 0 : i32
    return %c0_i32, %c0_i32_0 : i32, i32
  }
  func.func @transform_21(%arg0: i32) -> (i32, i32, i32) {
    %c0_i32 = arith.constant 0 : i32
    %c0_i32_0 = arith.constant 0 : i32
    %c0_i32_1 = arith.constant 0 : i32
    return %arg0, %c0_i32, %c0_i32_0 : i32, i32, i32
  }
}

</mosaic_0001>

<bundles_post_ra>
// kernel: tpu_custom_call.1
= control target key start
LH: loop header
LB: loop body
LE: loop exit
PB: predicated region body
PF: predicated region fallthrough
CT: control target
= control target key end

     0   :  { %s7432_s0 = inlined_call_operand.hbm [shape: f32[2,8,32], index: 0, kind: input, shape index: {}]   ;;  %s7433_s1 = inlined_call_operand.hbm [shape: f32[2,8,32], index: 1, kind: input, shape index: {}]   ;;  %s7434_s2 = inlined_call_operand.hbm [shape: bf16[2,8,8], index: 2, kind: input, shape index: {}]   ;;  %s7435_s3 = inlined_call_operand.hbm [shape: f32[2,8,3], index: 3, kind: input, shape index: {}]   ;;  %s7436_s4 = inlined_call_operand.hbm [shape: f32[2,3,8], index: 4, kind: input, shape index: {}]   ;;  %s7437_s5 = inlined_call_operand.hbm [shape: f32[2,8,1], index: 5, kind: input, shape index: {}]   ;;  %s7438_s6 = inlined_call_operand.hbm [shape: f32[1,16], index: 6, kind: input, shape index: {}]   ;;  %s7439_s7 = inlined_call_operand.hbm [shape: bf16[16,32], index: 7, kind: input, shape index: {}]   ;;  %s7440_s8 = inlined_call_operand.hbm [shape: f32[1,32], index: 8, kind: input, shape index: {}]   ;;  %s7441_s9 = inlined_call_operand.hbm [shape: bf16[32,32], index: 9, kind: input, shape index: {}]   ;;  %s7442_s10 = inlined_call_operand.hbm [shape: f32[1,32], index: 10, kind: input, shape index: {}]   ;;  %s7443_s11 = inlined_call_operand.hbm [shape: bf16[32,32], index: 11, kind: input, shape index: {}]   ;;  %s7444_s12 = inlined_call_operand.hbm [shape: bf16[32,32], index: 12, kind: input, shape index: {}]   ;;  %s7445_s13 = inlined_call_operand.hbm [shape: bf16[64,64], index: 13, kind: input, shape index: {}]   ;;  %s7446_s14 = inlined_call_operand.hbm [shape: f32[1,64], index: 14, kind: input, shape index: {}]   ;;  %s7447_s15 = inlined_call_operand.hbm [shape: bf16[64,32], index: 15, kind: input, shape index: {}]   ;;  %s7448_s16 = inlined_call_operand.hbm [shape: f32[1,32], index: 16, kind: input, shape index: {}]   ;;  %s7449_s17 = inlined_call_operand.hbm [shape: bf16[2,32,32], index: 17, kind: input, shape index: {}]   ;;  %s7450_s18 = inlined_call_operand.hbm [shape: f32[2,1,32], index: 18, kind: input, shape index: {}]   ;;  %s7451_s19 = inlined_call_operand.hbm [shape: f32[1,32], index: 19, kind: input, shape index: {}]   ;;  %s7452_s20 = inlined_call_operand.<no memory space> [shape: f32[1,1], index: 20, kind: input, shape index: {}]   ;;  %s7453_s21 = inlined_call_operand.hbm [shape: f32[2,1,1], index: 21, kind: output, shape index: {}]  }
   0x1   :  { %7498 = sst [smem:[#allocation63_spill]] %s7432_s0  ;;  %v26_v0 = vstv %s7452_s20 }
   0x2   :  { %7499 = sst [smem:[#allocation64_spill]] %s7433_s1  ;;  %27 = vst [vmem:[#allocation6] sm:$0x1] %v26_v0 }
   0x3   :  { %7500 = sst [smem:[#allocation65_spill]] %s7434_s2 }
   0x4   :  { %7501 = sst [smem:[#allocation66_spill]] %s7435_s3 }
   0x5   :  { %7502 = sst [smem:[#allocation67_spill]] %s7436_s4 }
   0x6   :  { %7503 = sst [smem:[#allocation68_spill]] %s7437_s5 }
   0x7   :  { %7504 = sst [smem:[#allocation69_spill]] %s7438_s6 }
   0x8   :  { %7505 = sst [smem:[#allocation70_spill]] %s7439_s7 }
   0x9   :  { %7506 = sst [smem:[#allocation71_spill]] %s7440_s8 }
   0xa   :  { %7507 = sst [smem:[#allocation72_spill]] %s7441_s9 }
   0xb   :  { %7508 = sst [smem:[#allocation73_spill]] %s7442_s10 }
   0xc   :  { %7509 = sst [smem:[#allocation74_spill]] %s7443_s11 }
   0xd   :  { %7510 = sst [smem:[#allocation75_spill]] %s7444_s12 }
   0xe   :  { %7511 = sst [smem:[#allocation76_spill]] %s7445_s13 }
   0xf   :  { %7512 = sst [smem:[#allocation77_spill]] %s7446_s14 }
  0x10   :  { %7513 = sst [smem:[#allocation78_spill]] %s7447_s15 }
  0x11   :  { %7514 = sst [smem:[#allocation79_spill]] %s7448_s16 }
  0x12   :  { %7515 = sst [smem:[#allocation80_spill]] %s7449_s17 }
  0x13   :  { %7516 = sst [smem:[#allocation81_spill]] %s7450_s18 }
  0x14   :  { %7517 = sst [smem:[#allocation82_spill]] %s7451_s19 }
  0x15   :  { %7518 = sst [smem:[#allocation83_spill]] %s7453_s21 }
  0x16   :  { %28 = vsyncpa [#allocation8], 0 }
  0x17   :  { %30 = vsyncpa [#allocation8 + $0x1], 0 }
  0x18   :  { %31 = vsyncpa [#allocation11], 0 }
  0x19   :  { %33 = vsyncpa [#allocation11 + $0x1], 0 }
  0x1a   :  { %34 = vsyncpa [#allocation14], 0 }
  0x1b   :  { %36 = vsyncpa [#allocation14 + $0x1], 0 }
  0x1c   :  { %37 = vsyncpa [#allocation17], 0 }
  0x1d   :  { %39 = vsyncpa [#allocation17 + $0x1], 0 }
  0x1e   :  { %40 = vsyncpa [#allocation20], 0 }
  0x1f   :  { %41 = vsyncpa [#allocation23], 0 }
  0x20   :  { %42 = vsyncpa [#allocation26], 0 }
  0x21   :  { %43 = vsyncpa [#allocation29], 0 }
  0x22   :  { %44 = vsyncpa [#allocation32], 0 }
  0x23   :  { %45 = vsyncpa [#allocation35], 0 }
  0x24   :  { %46 = vsyncpa [#allocation38], 0 }
  0x25   :  { %47 = vsyncpa [#allocation9], 0 }
  0x26   :  { %49 = vsyncpa [#allocation9 + $0x1], 0  ;;  %s5878_s26 = smov 0   ;;  %s5880_s20 = smov 0  }
  0x27   :  { %s5882_s27 = smov 0   ;;  %s5884_s3 = smov 0  }
  0x28 LB: > { %7519 = sst [smem:[#allocation53_spill]] %s5720_s26  ;;  %s5734_s28 = smov [#allocation18]   ;;  %s5732_s3 = sphi %s5884_s3, %s7602_s3   ;;  %s5728_s27 = sphi %s5882_s27, %s7604_s27   ;;  %s5724_s20 = sphi %s5880_s20, %s7606_s20   ;;  %s5720_s26 = sphi %s5878_s26, %s7605_s26  }
  0x29   : > { %7520 = sst [smem:[#allocation54_spill]] %s5728_s27  ;;  %s570_s29 = sshll.u32 %s5734_s28, 4  ;;  %s5904_s29 = int_to_ptr.vmem [resolvable:$true] %s570_s29 }
  0x2a   : > { %s5899_s0 = sadd.s32 4294967295, %s5732_s3   ;;  %p4380_p0 = scmp.ge.s32.totalorder %s5732_s3, 1 }
  0x2b   : > { %p7465_p1 = scmp.eq.s32.totalorder %s5899_s0, 0  ;;  %p557_p2 = scmp.lt.s32.totalorder %s5732_s3, 3 }
  0x2c   : > { %s5735_s30 = smov [#allocation19]   ;;  %s5736_s23 = smov [#allocation22]  }
  0x2d   : > { %p5906_p3 = pnand %p4380_p0, %p557_p2  ;;  %s580_s5 = sshll.u32 %s5735_s30, 4  ;;  %s5913_s5 = int_to_ptr.vmem [resolvable:$true] %s580_s5 }
  0x2e   : > { %s604_s1 = sshll.u32 %s5736_s23, 4  ;;  %s7524_s6 = sld [smem:[#allocation69_spill]]  ;;  %s5921_s1 = int_to_ptr.vmem [resolvable:$true] %s604_s1 }
  0x2f   : > { %s7521_s4 = scalar_select %p5906_p3, 1, 0 }
  0x30   : > { %p4776_p5 = pneg %p5906_p3 }
  0x31   : > { %7522 = sst [smem:[#allocation55_spill]] %s7521_s4 }
  0x32   : > { %p5917_p6 = pnand %p4776_p5, %p7465_p1 }
  0x34   : > { %s7523_s22 = scalar_select %p5917_p6, 1, 0 }
  0x35   : > { %s5050_s25 = scalar_lea.hbm %s7524_s6, 16  ;;  %p5931_p8 = pneg %p5917_p6 }
  0x36   : > { %p5051_p7 = scmp.ne.s32.totalorder %s7524_s6, %s5050_s25  ;;  %p5057_p11 = scmp.lt.u32.totalorder %s5050_s25, %s7524_s6 }
  0x37   : > { %s7525_s30 = scalar_select %p5931_p8, 1, 0 }
  0x38   : > { %p5053_p9 = pnand %p5931_p8, %p5051_p7 }
  0x3a   : > { %p5054_p10 = pneg %p5053_p9 }
  0x3c   : > { %p5059_p12 = pnand %p5057_p11, %p5054_p10 }
  0x3e   : > { %5062 = shalt.err (!%p5059_p12)
}
  0x3f   : > { %s5063_s21 = scalar_lea.vmem %s5904_s29, 16  ;;  %s5070_s24 = scalar_lea.vmem %s5904_s29, 32 }
  0x40   : > { %p5064_p13 = scmp.ne.s32.totalorder %s5904_s29, %s5063_s21  ;;  %p5071_p5 = scmp.lt.s32.totalorder %s5904_s29, %s5904_s29 }
  0x41   : > { %p5072_p7 = scmp.lt.s32.totalorder %s5070_s24, %s5063_s21 }
  0x42   : > { %p5066_p0 = pnand %p5064_p13, %p5931_p8 }
  0x43   : > { %p5073_p9 = por %p5072_p7, %p5071_p5 }
  0x44   : > { %p5067_p2 = pneg %p5066_p0 }
  0x46   : > { %p5074_p4 = pnand %p5073_p9, %p5067_p2 }
  0x48   : > { %5077 = shalt.err (!%p5074_p4)
}
  0x49   : > { %4779 = dma.hbm_to_vmem [thread:$0]  (!%p5917_p6), %s7524_s6, 16, %s5904_s29, [#allocation17]  }
  0x4a   : > { %s7526_s7 = sld [smem:[#allocation70_spill]] }
  0x50   : > { %s5078_s23 = scalar_lea.hbm %s7526_s7, 128 }
  0x51   : > { %p5079_p10 = scmp.ne.s32.totalorder %s7526_s7, %s5078_s23  ;;  %p5085_p4 = scmp.lt.u32.totalorder %s5078_s23, %s7526_s7 }
  0x53   : > { %p5081_p11 = pnand %p5079_p10, %p5931_p8 }
  0x55   : > { %p5082_p12 = pneg %p5081_p11 }
  0x57   : > { %p5087_p13 = pnand %p5085_p4, %p5082_p12 }
  0x59   : > { %5090 = shalt.err (!%p5087_p13)
}
  0x5a   : > { %s5091_s29 = scalar_lea.vmem %s5913_s5, 128  ;;  %p5099_p7 = scmp.lt.s32.totalorder %s5913_s5, %s5913_s5 }
  0x5b   : > { %p5092_p0 = scmp.ne.s32.totalorder %s5913_s5, %s5091_s29  ;;  %p5100_p9 = scmp.lt.s32.totalorder %s5091_s29, %s5091_s29 }
  0x5d   : > { %p5094_p2 = pnand %p5092_p0, %p5931_p8  ;;  %p5101_p10 = por %p5100_p9, %p5099_p7 }
  0x5f   : > { %p5095_p5 = pneg %p5094_p2 }
  0x61   : > { %p5102_p11 = pnand %p5101_p10, %p5095_p5 }
  0x63   : > { %5105 = shalt.err (!%p5102_p11)
}
  0x64   : > { %s7467_s18 = smov 64   ;;  %s7468_s19 = smov 4  }
  0x65   : > { %4782 = dma.hbm_to_vmem [thread:$0]  (!%p5917_p6), %s7526_s7, 128, %s5913_s5, [#allocation20], %s7467_s18, %s7467_s18, %s7468_s19  }
  0x66   : > { %s7527_s9 = sld [smem:[#allocation72_spill]] }
  0x6c   : > { %s5106_s23 = scalar_lea.hbm %s7527_s9, 256 }
  0x6d   : > { %p5107_p12 = scmp.ne.s32.totalorder %s7527_s9, %s5106_s23  ;;  %p5113_p0 = scmp.lt.u32.totalorder %s5106_s23, %s7527_s9 }
  0x6f   : > { %p5109_p4 = pnand %p5107_p12, %p5931_p8 }
  0x71   : > { %p5110_p13 = pneg %p5109_p4 }
  0x73   : > { %p5115_p2 = pnand %p5113_p0, %p5110_p13 }
  0x75   : > { %5118 = shalt.err (!%p5115_p2)
}
  0x76   : > { %s5119_s5 = scalar_lea.vmem %s5921_s1, 256  ;;  %p5127_p10 = scmp.lt.s32.totalorder %s5921_s1, %s5921_s1 }
  0x77   : > { %p5120_p5 = scmp.ne.s32.totalorder %s5921_s1, %s5119_s5  ;;  %p5128_p11 = scmp.lt.s32.totalorder %s5119_s5, %s5119_s5 }
  0x79   : > { %p5122_p7 = pnand %p5120_p5, %p5931_p8  ;;  %p5129_p12 = por %p5128_p11, %p5127_p10 }
  0x7b   : > { %p5123_p9 = pneg %p5122_p7 }
  0x7d   : > { %p5130_p4 = pnand %p5129_p12, %p5123_p9 }
  0x7f   : > { %5133 = shalt.err (!%p5130_p4)
}
  0x80   : > { %4788 = dma.hbm_to_vmem [thread:$0]  (!%p5917_p6), %s7527_s9, 256, %s5921_s1, [#allocation23], %s7467_s18, %s7467_s18, %s7468_s19  }
  0x81   : > { %s5739_s2 = smov [#allocation25]   ;;  %s5740_s28 = smov [#allocation28]  }
  0x82   : > { %s628_s25 = sshll.u32 %s5739_s2, 4  ;;  %s654_s23 = sshll.u32 %s5740_s28, 4  ;;  %s629_s25 = int_to_ptr.vmem [resolvable:$true] %s628_s25  ;;  %s655_s23 = int_to_ptr.vmem [resolvable:$true] %s654_s23 }
  0x83   : > { %s7528_s11 = sld [smem:[#allocation74_spill]] }
  0x89   : > { %s5134_s29 = scalar_lea.hbm %s7528_s11, 256 }
  0x8a   : > { %p5135_p13 = scmp.ne.s32.totalorder %s7528_s11, %s5134_s29  ;;  %p5141_p5 = scmp.lt.u32.totalorder %s5134_s29, %s7528_s11 }
  0x8c   : > { %p5137_p0 = pnand %p5135_p13, %p5931_p8 }
  0x8e   : > { %p5138_p2 = pneg %p5137_p0 }
  0x90   : > { %p5143_p7 = pnand %p5141_p5, %p5138_p2 }
  0x92   : > { %5146 = shalt.err (!%p5143_p7)
}
  0x93   : > { %s5147_s1 = scalar_lea.vmem %s629_s25, 256  ;;  %p5155_p12 = scmp.lt.s32.totalorder %s629_s25, %s629_s25 }
  0x94   : > { %p5148_p9 = scmp.ne.s32.totalorder %s629_s25, %s5147_s1  ;;  %p5156_p4 = scmp.lt.s32.totalorder %s5147_s1, %s5147_s1 }
  0x96   : > { %p5150_p10 = pnand %p5148_p9, %p5931_p8  ;;  %p5157_p1 = por %p5156_p4, %p5155_p12 }
  0x98   : > { %p5151_p11 = pneg %p5150_p10 }
  0x9a   : > { %p5158_p3 = pnand %p5157_p1, %p5151_p11 }
  0x9c   : > { %5161 = shalt.err (!%p5158_p3)
}
  0x9d   : > { %4794 = dma.hbm_to_vmem [thread:$0]  (!%p5917_p6), %s7528_s11, 256, %s629_s25, [#allocation26], %s7467_s18, %s7467_s18, %s7468_s19  }
  0x9e   : > { %s7529_s13 = sld [smem:[#allocation76_spill]] }
  0xa4   : > { %s5162_s28 = scalar_lea.hbm %s7529_s13, 512 }
  0xa5   : > { %p5163_p1 = scmp.ne.s32.totalorder %s7529_s13, %s5162_s28  ;;  %p5169_p0 = scmp.lt.u32.totalorder %s5162_s28, %s7529_s13 }
  0xa7   : > { %p5165_p3 = pnand %p5163_p1, %p5931_p8 }
  0xa9   : > { %p5166_p13 = pneg %p5165_p3 }
  0xab   : > { %p5171_p2 = pnand %p5169_p0, %p5166_p13 }
  0xad   : > { %5174 = shalt.err (!%p5171_p2)
}
  0xae   : > { %s5175_s6 = scalar_lea.vmem %s655_s23, 512  ;;  %p5183_p10 = scmp.lt.s32.totalorder %s655_s23, %s655_s23 }
  0xaf   : > { %p5176_p5 = scmp.ne.s32.totalorder %s655_s23, %s5175_s6  ;;  %p5184_p11 = scmp.lt.s32.totalorder %s5175_s6, %s5175_s6 }
  0xb1   : > { %p5178_p7 = pnand %p5176_p5, %p5931_p8  ;;  %p5185_p12 = por %p5184_p11, %p5183_p10 }
  0xb3   : > { %p5179_p9 = pneg %p5178_p7 }
  0xb5   : > { %p5186_p4 = pnand %p5185_p12, %p5179_p9 }
  0xb7   : > { %5189 = shalt.err (!%p5186_p4)
}
  0xb8   : > { %4800 = dma.hbm_to_vmem [thread:$0]  (!%p5917_p6), %s7529_s13, 512, %s655_s23, [#allocation29], %s7467_s18, %s7467_s18, %s7468_s19  }
  0xb9   : > { %s5741_s7 = smov [#allocation31]   ;;  %s5742_s4 = smov [#allocation34]  }
  0xba   : > { %s678_s16 = sshll.u32 %s5741_s7, 4  ;;  %s702_s2 = sshll.u32 %s5742_s4, 4  ;;  %s679_s16 = int_to_ptr.vmem [resolvable:$true] %s678_s16  ;;  %s703_s2 = int_to_ptr.vmem [resolvable:$true] %s702_s2 }
  0xbb   : > { %s7530_s15 = sld [smem:[#allocation78_spill]] }
  0xc1   : > { %s5190_s24 = scalar_lea.hbm %s7530_s15, 512 }
  0xc2   : > { %p5191_p1 = scmp.ne.s32.totalorder %s7530_s15, %s5190_s24  ;;  %p5197_p0 = scmp.lt.u32.totalorder %s5190_s24, %s7530_s15 }
  0xc4   : > { %p5193_p3 = pnand %p5191_p1, %p5931_p8 }
  0xc6   : > { %p5194_p13 = pneg %p5193_p3 }
  0xc8   : > { %p5199_p2 = pnand %p5197_p0, %p5194_p13 }
  0xca   : > { %5202 = shalt.err (!%p5199_p2)
}
  0xcb   : > { %s5203_s23 = scalar_lea.vmem %s679_s16, 512  ;;  %p5211_p10 = scmp.lt.s32.totalorder %s679_s16, %s679_s16 }
  0xcc   : > { %p5204_p5 = scmp.ne.s32.totalorder %s679_s16, %s5203_s23  ;;  %p5212_p11 = scmp.lt.s32.totalorder %s5203_s23, %s5203_s23 }
  0xce   : > { %p5206_p7 = pnand %p5204_p5, %p5931_p8  ;;  %p5213_p12 = por %p5212_p11, %p5211_p10 }
  0xd0   : > { %p5207_p9 = pneg %p5206_p7 }
  0xd2   : > { %p5214_p4 = pnand %p5213_p12, %p5207_p9 }
  0xd4   : > { %5217 = shalt.err (!%p5214_p4)
}
  0xd5   : > { %4806 = dma.hbm_to_vmem [thread:$0]  (!%p5917_p6), %s7530_s15, 512, %s679_s16, [#allocation32], %s7467_s18, %s7467_s18, %s7468_s19  }
  0xd6   : > { %s7531_s17 = sld [smem:[#allocation80_spill]] }
  0xdc   : > { %s5218_s21 = scalar_lea.hbm %s7531_s17, 512 }
  0xdd   : > { %p5219_p1 = scmp.ne.s32.totalorder %s7531_s17, %s5218_s21  ;;  %p5225_p0 = scmp.lt.u32.totalorder %s5218_s21, %s7531_s17 }
  0xdf   : > { %p5221_p3 = pnand %p5219_p1, %p5931_p8 }
  0xe1   : > { %p5222_p13 = pneg %p5221_p3 }
  0xe3   : > { %p5227_p2 = pnand %p5225_p0, %p5222_p13 }
  0xe5   : > { %5230 = shalt.err (!%p5227_p2)
}
  0xe6   : > { %s5231_s25 = scalar_lea.vmem %s703_s2, 512  ;;  %p5239_p10 = scmp.lt.s32.totalorder %s703_s2, %s703_s2 }
  0xe7   : > { %p5232_p5 = scmp.ne.s32.totalorder %s703_s2, %s5231_s25  ;;  %p5240_p11 = scmp.lt.s32.totalorder %s5231_s25, %s5231_s25 }
  0xe9   : > { %p5234_p7 = pnand %p5232_p5, %p5931_p8  ;;  %p5241_p12 = por %p5240_p11, %p5239_p10 }
  0xeb   : > { %p5235_p9 = pneg %p5234_p7 }
  0xed   : > { %p5242_p4 = pnand %p5241_p12, %p5235_p9 }
  0xef   : > { %5245 = shalt.err (!%p5242_p4)
}
  0xf0   : > { %4812 = dma.hbm_to_vmem [thread:$0]  (!%p5917_p6), %s7531_s17, 512, %s703_s2, [#allocation35], %s7467_s18, %s7467_s18, %s7468_s19  }
  0xf1   : > { %s4379_s1 = sadd.s32 4294967294, %s5732_s3   ;;  %s6091_s7 = sadd.s32 1, %s5732_s3  }
  0xf2   : > { %7532 = sst [smem:[#allocation56_spill]] %s6091_s7  ;;  %s62_s4 = sadd.s32 1, %s5728_s27 }
  0xf3   : > { %s59_s28 = ssub.s32 %s5732_s3, %s6091_s7  ;;  %p69_p1 = scmp.ne.s32.totalorder %s5728_s27, %s5724_s20 }
  0xf4   : > { %p60_p3 = scmp.eq.s32.totalorder %s59_s28, 0  ;;  %p70_p13 = scmp.eq.s32.totalorder %s5732_s3, 0 }
  0xf5   : > { %p75_p0 = scmp.ne.s32.totalorder %s5724_s20, %s5720_s26  ;;  %p544_p2 = scmp.eq.s32.totalorder %s5899_s0, 1 }
  0xf6   : > { %s6103_s21 = scalar_select %p60_p3, %s5728_s27, %s62_s4  }
  0xf7   : > { %p71_p5 = por %p70_p13, %p69_p1  ;;  %p7534_p7 = scmp.eq.s32.totalorder %s5899_s0, 0 }
  0xf8   : > { %7533 = sst [smem:[#allocation57_spill]] %s6103_s21  ;;  %p6111_p10 = por %p544_p2, %p69_p1 }
  0xf9   : > { %p6107_p9 = por %p7534_p7, %p75_p0  ;;  %p550_p11 = scmp.eq.s32.totalorder %s4379_s1, 1 }
  0xfa   : > { %s7536_s24 = scalar_select %p6111_p10, 1, 0 }
  0xfb   : > { %s7535_s2 = scalar_select %p6107_p9, 1, 0 }
  0xfc   : > { %p4856_p12 = scmp.lt.s32.totalorder %s5732_s3, 2  ;;  %s6117_s29 = sand.u32 1, %s5728_s27  }
  0xfd   : > { %p6119_p4 = por %p550_p11, %p75_p0  ;;  %s6124_s6 = sshll.u32 %s6117_s29, 3 }
  0xfe   : > { %s6127_s25 = sshll.u32 %s5732_s3, 7  ;;  %p6129_p3 = pnand %p4856_p12, %p71_p5 }
  0xff   : > { %s7537_s5 = scalar_select %p6119_p4, 1, 0 }
 0x100   : > { %s7539_s16 = scalar_select %p6129_p3, 1, 0 }
 0x101   : > { %7538 = sst [smem:[#allocation58_spill]] %s7537_s5  ;;  %s6134_s23 = sand.u32 1, %s5732_s3  }
 0x102   : > { %s7540_s28 = sld [smem:[#allocation64_spill]]  ;;  %s765_s19 = scalar_lea.vmem [#allocation10], %s6124_s6 }
 0x103   : > { %s772_s9 = sshll.u32 %s765_s19, 4  ;;  %p6150_p13 = pneg %p6129_p3  ;;  %s6143_s9 = int_to_ptr.vmem [resolvable:$true] %s772_s9 }
 0x105   : > { %s7541_s15 = scalar_select %p6150_p13, 1, 0 }
 0x108   : > { %s6140_s18 = scalar_lea.hbm %s7540_s28, %s6127_s25  ;;  %s5251_s17 = scalar_lea.hbm %s7540_s28, 256 }
 0x109   : > { %s5246_s13 = scalar_lea.hbm %s6140_s18, 128  ;;  %p5252_p5 = scmp.lt.u32.totalorder %s6140_s18, %s7540_s28 }
 0x10a   : > { %p5247_p1 = scmp.ne.s32.totalorder %s6140_s18, %s5246_s13  ;;  %p5253_p7 = scmp.lt.u32.totalorder %s5251_s17, %s5246_s13 }
 0x10b   : > { %p5255_p12 = scmp.lt.u32.totalorder %s5246_s13, %s6140_s18 }
 0x10c   : > { %p5249_p0 = pnand %p6150_p13, %p5247_p1  ;;  %p5254_p11 = por %p5253_p7, %p5252_p5 }
 0x10e   : > { %p5250_p2 = pneg %p5249_p0  ;;  %p5256_p4 = por %p5255_p12, %p5254_p11 }
 0x110   : > { %p5257_p10 = pnand %p5256_p4, %p5250_p2 }
 0x112   : > { %5260 = shalt.err (!%p5257_p10)
}
 0x113   : > { %s5261_s11 = scalar_lea.vmem %s6143_s9, 128  ;;  %s5743_s1 = smov [#allocation10]  }
 0x114   : > { %p5262_p1 = scmp.ne.s32.totalorder %s6143_s9, %s5261_s11  ;;  %s5266_s4 = sshll.u32 %s5743_s1, 4  ;;  %s5267_s4 = int_to_ptr.vmem [resolvable:$false] %s5266_s4 }
 0x115   : > { %s5268_s21 = scalar_lea.vmem %s5267_s4, 256  ;;  %p5269_p6 = scmp.lt.s32.totalorder %s6143_s9, %s5267_s4 }
 0x116   : > { %p5264_p0 = pnand %p5262_p1, %p6150_p13  ;;  %p5270_p8 = scmp.lt.s32.totalorder %s5268_s21, %s5261_s11 }
 0x118   : > { %p5265_p9 = pneg %p5264_p0  ;;  %p5271_p5 = por %p5270_p8, %p5269_p6 }
 0x11a   : > { %p5272_p7 = pnand %p5271_p5, %p5265_p9 }
 0x11c   : > { %5275 = shalt.err (!%p5272_p7)
}
 0x11d   : > { %s7542_s13 = scalar_lea.sflag [#allocation11], %s6134_s23  ;;  %s7543_s1 = sld [smem:[#allocation66_spill]] }
 0x11e   : > { %4825 = dma.hbm_to_vmem [thread:$0]  (!%p6129_p3), %s6140_s18, 128, %s6143_s9, %s7542_s13  }
 0x11f   : > { %s801_s11 = scalar_lea.vmem [#allocation13], %s6124_s6  ;;  %s5744_s21 = smov [#allocation21]  }
 0x120   : > { %s808_s4 = sshll.u32 %s801_s11, 4  ;;  %s6184_s27 = sshll.u32 %s5744_s21, 4  ;;  %s6182_s4 = int_to_ptr.vmem [resolvable:$true] %s808_s4  ;;  %s595_s27 = int_to_ptr.vmem [resolvable:$true] %s6184_s27 }
 0x121   : > { %s7482_s7 = scalar_lea.sflag [#allocation14], %s6134_s23 }
 0x123   : > { %s6179_s28 = scalar_lea.hbm %s7543_s1, %s6127_s25  ;;  %s5281_s13 = scalar_lea.hbm %s7543_s1, 256 }
 0x124   : > { %s5276_s5 = scalar_lea.hbm %s6179_s28, 128  ;;  %p5282_p10 = scmp.lt.u32.totalorder %s6179_s28, %s7543_s1 }
 0x125   : > { %p5277_p6 = scmp.ne.s32.totalorder %s6179_s28, %s5276_s5  ;;  %p5283_p4 = scmp.lt.u32.totalorder %s5281_s13, %s5276_s5 }
 0x126   : > { %p5285_p11 = scmp.lt.u32.totalorder %s5276_s5, %s6179_s28 }
 0x127   : > { %p5279_p8 = pnand %p5277_p6, %p6150_p13  ;;  %p5284_p2 = por %p5283_p4, %p5282_p10 }
 0x129   : > { %p5280_p9 = pneg %p5279_p8  ;;  %p5286_p12 = por %p5285_p11, %p5284_p2 }
 0x12b   : > { %p5287_p1 = pnand %p5286_p12, %p5280_p9 }
 0x12d   : > { %5290 = shalt.err (!%p5287_p1)
}
 0x12e   : > { %s5291_s11 = scalar_lea.vmem %s6182_s4, 128  ;;  %s5745_s21 = smov [#allocation13]  }
 0x12f   : > { %p5292_p0 = scmp.ne.s32.totalorder %s6182_s4, %s5291_s11  ;;  %s5296_s9 = sshll.u32 %s5745_s21, 4  ;;  %s5297_s9 = int_to_ptr.vmem [resolvable:$false] %s5296_s9 }
 0x130   : > { %s5298_s18 = scalar_lea.vmem %s5297_s9, 256  ;;  %p5299_p6 = scmp.lt.s32.totalorder %s6182_s4, %s5297_s9 }
 0x131   : > { %p5294_p5 = pnand %p5292_p0, %p6150_p13  ;;  %p5300_p8 = scmp.lt.s32.totalorder %s5298_s18, %s5291_s11 }
 0x133   : > { %p5295_p7 = pneg %p5294_p5  ;;  %p5301_p10 = por %p5300_p8, %p5299_p6 }
 0x135   : > { %p5302_p4 = pnand %p5301_p10, %p5295_p7 }
 0x137   : > { %5305 = shalt.err (!%p5302_p4)
}
 0x138   : > { %4831 = dma.hbm_to_vmem [thread:$0]  (!%p6129_p3), %s6179_s28, 128, %s6182_s4, %s7482_s7  }
 0x139   : > { %s7544_s8 = sld [smem:[#allocation71_spill]]  ;;  %p7545_p2 = scmp.ne.s32.totalorder %s7525_s30, 0 }
 0x13f   : > { %s5306_s17 = scalar_lea.hbm %s7544_s8, 16 }
 0x140   : > { %p5307_p9 = scmp.ne.s32.totalorder %s7544_s8, %s5306_s17  ;;  %p5313_p1 = scmp.lt.u32.totalorder %s5306_s17, %s7544_s8 }
 0x142   : > { %p5309_p11 = pnand %p5307_p9, %p7545_p2 }
 0x144   : > { %p5310_p12 = pneg %p5309_p11 }
 0x146   : > { %p5315_p0 = pnand %p5313_p1, %p5310_p12 }
 0x148   : > { %5318 = shalt.err (!%p5315_p0)
}
 0x149   : > { %s5319_s18 = scalar_lea.vmem %s595_s27, 16  ;;  %s5326_s28 = scalar_lea.vmem %s595_s27, 32 }
 0x14a   : > { %p5320_p5 = scmp.ne.s32.totalorder %s595_s27, %s5319_s18  ;;  %p5327_p8 = scmp.lt.s32.totalorder %s595_s27, %s595_s27 }
 0x14b   : > { %p5328_p10 = scmp.lt.s32.totalorder %s5326_s28, %s5319_s18 }
 0x14c   : > { %p5322_p7 = pnand %p5320_p5, %p7545_p2 }
 0x14d   : > { %p5329_p4 = por %p5328_p10, %p5327_p8 }
 0x14e   : > { %p5323_p6 = pneg %p5322_p7 }
 0x150   : > { %p5330_p3 = pnand %p5329_p4, %p5323_p6 }
 0x152   : > { %5333 = shalt.err (!%p5330_p3)
}
 0x153   : > { %p7546_p9 = scmp.ne.s32.totalorder %s7523_s22, 0  ;;  %s5746_s13 = smov [#allocation24]  }
 0x154   : > { %s618_s17 = sshll.u32 %s5746_s13, 4  ;;  %s5747_s19 = smov [#allocation27]   ;;  %s619_s17 = int_to_ptr.vmem [resolvable:$true] %s618_s17 }
 0x155   : > { %4785 = dma.hbm_to_vmem [thread:$0]  (!%p7546_p9), %s7544_s8, 16, %s595_s27, [#allocation20]  }
 0x156   : > { %s641_s21 = sshll.u32 %s5747_s19, 4  ;;  %s7547_s10 = sld [smem:[#allocation73_spill]]  ;;  %s642_s21 = int_to_ptr.vmem [resolvable:$true] %s641_s21 }
 0x15c   : > { %s5334_s7 = scalar_lea.hbm %s7547_s10, 16 }
 0x15d   : > { %p5335_p3 = scmp.ne.s32.totalorder %s7547_s10, %s5334_s7  ;;  %p5341_p1 = scmp.lt.u32.totalorder %s5334_s7, %s7547_s10 }
 0x15f   : > { %p5337_p11 = pnand %p5335_p3, %p7545_p2 }
 0x161   : > { %p5338_p12 = pneg %p5337_p11 }
 0x163   : > { %p5343_p0 = pnand %p5341_p1, %p5338_p12 }
 0x165   : > { %5346 = shalt.err (!%p5343_p0)
}
 0x166   : > { %s5347_s27 = scalar_lea.vmem %s619_s17, 16  ;;  %s5354_s5 = scalar_lea.vmem %s619_s17, 32 }
 0x167   : > { %p5348_p5 = scmp.ne.s32.totalorder %s619_s17, %s5347_s27  ;;  %p5355_p8 = scmp.lt.s32.totalorder %s619_s17, %s619_s17 }
 0x168   : > { %p5356_p10 = scmp.lt.s32.totalorder %s5354_s5, %s5347_s27 }
 0x169   : > { %p5350_p7 = pnand %p5348_p5, %p7545_p2 }
 0x16a   : > { %p5357_p4 = por %p5356_p10, %p5355_p8 }
 0x16b   : > { %p5351_p6 = pneg %p5350_p7 }
 0x16d   : > { %p5358_p13 = pnand %p5357_p4, %p5351_p6 }
 0x16f   : > { %5361 = shalt.err (!%p5358_p13)
}
 0x170   : > { %4791 = dma.hbm_to_vmem [thread:$0]  (!%p7546_p9), %s7547_s10, 16, %s619_s17, [#allocation23]  }
 0x171   : > { %s7548_s12 = sld [smem:[#allocation75_spill]] }
 0x177   : > { %s5362_s11 = scalar_lea.hbm %s7548_s12, 256 }
 0x178   : > { %p5363_p3 = scmp.ne.s32.totalorder %s7548_s12, %s5362_s11  ;;  %p5369_p13 = scmp.lt.u32.totalorder %s5362_s11, %s7548_s12 }
 0x17a   : > { %p5365_p11 = pnand %p5363_p3, %p7545_p2 }
 0x17c   : > { %p5366_p12 = pneg %p5365_p11 }
 0x17e   : > { %p5371_p1 = pnand %p5369_p13, %p5366_p12 }
 0x180   : > { %5374 = shalt.err (!%p5371_p1)
}
 0x181   : > { %s5375_s27 = scalar_lea.vmem %s642_s21, 256  ;;  %p5383_p6 = scmp.lt.s32.totalorder %s642_s21, %s642_s21 }
 0x182   : > { %p5376_p0 = scmp.ne.s32.totalorder %s642_s21, %s5375_s27  ;;  %p5384_p8 = scmp.lt.s32.totalorder %s5375_s27, %s5375_s27 }
 0x184   : > { %p5378_p5 = pnand %p5376_p0, %p7545_p2  ;;  %p5385_p10 = por %p5384_p8, %p5383_p6 }
 0x186   : > { %p5379_p7 = pneg %p5378_p5 }
 0x188   : > { %p5386_p4 = pnand %p5385_p10, %p5379_p7 }
 0x18a   : > { %5389 = shalt.err (!%p5386_p4)
}
 0x18b   : > { %s7549_s17 = smov 4   ;;  %s7550_s5 = smov 64  }
 0x18c   : > { %4797 = dma.hbm_to_vmem [thread:$0]  (!%p7546_p9), %s7548_s12, 256, %s642_s21, [#allocation26], %s7550_s5, %s7550_s5, %s7549_s17  }
 0x18d   : > { %s5748_s7 = smov [#allocation30]   ;;  %s5749_s11 = smov [#allocation33]  }
 0x18e   : > { %s668_s1 = sshll.u32 %s5748_s7, 4  ;;  %s692_s9 = sshll.u32 %s5749_s11, 4  ;;  %s669_s1 = int_to_ptr.vmem [resolvable:$true] %s668_s1  ;;  %s693_s9 = int_to_ptr.vmem [resolvable:$true] %s692_s9 }
 0x18f   : > { %s7551_s14 = sld [smem:[#allocation77_spill]] }
 0x195   : > { %s5390_s4 = scalar_lea.hbm %s7551_s14, 16 }
 0x196   : > { %p5391_p3 = scmp.ne.s32.totalorder %s7551_s14, %s5390_s4  ;;  %p5397_p13 = scmp.lt.u32.totalorder %s5390_s4, %s7551_s14 }
 0x198   : > { %p5393_p11 = pnand %p5391_p3, %p7545_p2 }
 0x19a   : > { %p5394_p12 = pneg %p5393_p11 }
 0x19c   : > { %p5399_p1 = pnand %p5397_p13, %p5394_p12 }
 0x19e   : > { %5402 = shalt.err (!%p5399_p1)
}
 0x19f   : > { %s5403_s21 = scalar_lea.vmem %s669_s1, 16  ;;  %s5410_s17 = scalar_lea.vmem %s669_s1, 32 }
 0x1a0   : > { %p5404_p0 = scmp.ne.s32.totalorder %s669_s1, %s5403_s21  ;;  %p5411_p6 = scmp.lt.s32.totalorder %s669_s1, %s669_s1 }
 0x1a1   : > { %p5412_p8 = scmp.lt.s32.totalorder %s5410_s17, %s5403_s21 }
 0x1a2   : > { %p5406_p5 = pnand %p5404_p0, %p7545_p2 }
 0x1a3   : > { %p5413_p10 = por %p5412_p8, %p5411_p6 }
 0x1a4   : > { %p5407_p7 = pneg %p5406_p5 }
 0x1a6   : > { %p5414_p4 = pnand %p5413_p10, %p5407_p7 }
 0x1a8   : > { %5417 = shalt.err (!%p5414_p4)
}
 0x1a9   : > { %4803 = dma.hbm_to_vmem [thread:$0]  (!%p7546_p9), %s7551_s14, 16, %s669_s1, [#allocation29]  }
 0x1aa   : > { %s7552_s7 = sld [smem:[#allocation79_spill]] }
 0x1b0   : > { %s5418_s11 = scalar_lea.hbm %s7552_s7, 16 }
 0x1b1   : > { %p5419_p3 = scmp.ne.s32.totalorder %s7552_s7, %s5418_s11  ;;  %p5425_p13 = scmp.lt.u32.totalorder %s5418_s11, %s7552_s7 }
 0x1b3   : > { %p5421_p11 = pnand %p5419_p3, %p7545_p2 }
 0x1b5   : > { %p5422_p12 = pneg %p5421_p11 }
 0x1b7   : > { %p5427_p1 = pnand %p5425_p13, %p5422_p12 }
 0x1b9   : > { %5430 = shalt.err (!%p5427_p1)
}
 0x1ba   : > { %s5431_s13 = scalar_lea.vmem %s693_s9, 16  ;;  %s5438_s1 = scalar_lea.vmem %s693_s9, 32 }
 0x1bb   : > { %p5432_p0 = scmp.ne.s32.totalorder %s693_s9, %s5431_s13  ;;  %p5439_p6 = scmp.lt.s32.totalorder %s693_s9, %s693_s9 }
 0x1bc   : > { %p5440_p8 = scmp.lt.s32.totalorder %s5438_s1, %s5431_s13 }
 0x1bd   : > { %p5434_p5 = pnand %p5432_p0, %p7545_p2 }
 0x1be   : > { %p5441_p10 = por %p5440_p8, %p5439_p6 }
 0x1bf   : > { %p5435_p7 = pneg %p5434_p5 }
 0x1c1   : > { %p5442_p4 = pnand %p5441_p10, %p5435_p7 }
 0x1c3   : > { %5445 = shalt.err (!%p5442_p4)
}
 0x1c4   : > { %4809 = dma.hbm_to_vmem [thread:$0]  (!%p7546_p9), %s7552_s7, 16, %s693_s9, [#allocation32]  }
 0x1c5   : > { %s5750_s8 = smov [#allocation36]   ;;  %s7553_s11 = sld [smem:[#allocation81_spill]] }
 0x1c6   : > { %s715_s5 = sshll.u32 %s5750_s8, 4  ;;  %s716_s5 = int_to_ptr.vmem [resolvable:$true] %s715_s5 }
 0x1cb   : > { %s5446_s18 = scalar_lea.hbm %s7553_s11, 32 }
 0x1cc   : > { %p5447_p3 = scmp.ne.s32.totalorder %s7553_s11, %s5446_s18  ;;  %p5453_p13 = scmp.lt.u32.totalorder %s5446_s18, %s7553_s11 }
 0x1ce   : > { %p5449_p11 = pnand %p5447_p3, %p7545_p2 }
 0x1d0   : > { %p5450_p12 = pneg %p5449_p11 }
 0x1d2   : > { %p5455_p1 = pnand %p5453_p13, %p5450_p12 }
 0x1d4   : > { %5458 = shalt.err (!%p5455_p1)
}
 0x1d5   : > { %s5459_s9 = scalar_lea.vmem %s716_s5, 32  ;;  %p5467_p6 = scmp.lt.s32.totalorder %s716_s5, %s716_s5 }
 0x1d6   : > { %p5460_p0 = scmp.ne.s32.totalorder %s716_s5, %s5459_s9  ;;  %p5468_p8 = scmp.lt.s32.totalorder %s5459_s9, %s5459_s9 }
 0x1d8   : > { %p5462_p5 = pnand %p5460_p0, %p7545_p2  ;;  %p5469_p10 = por %p5468_p8, %p5467_p6 }
 0x1da   : > { %p5463_p7 = pneg %p5462_p5 }
 0x1dc   : > { %p5470_p4 = pnand %p5469_p10, %p5463_p7 }
 0x1de   : > { %5473 = shalt.err (!%p5470_p4)
}
 0x1df   : > { %s5751_s1 = smov 16   ;;  %s5752_s21 = smov 1  }
 0x1e0   : > { %4815 = dma.hbm_to_vmem [thread:$0]  (!%p7546_p9), %s7553_s11, 32, %s716_s5, [#allocation35], %s5751_s1, %s5751_s1, %s5752_s21  }
 0x1e1   : > { %s5753_s10 = smov [#allocation37]   ;;  %s7554_s4 = sld [smem:[#allocation63_spill]] }
 0x1e2   : > { %s729_s19 = sshll.u32 %s5753_s10, 4  ;;  %s7555_s7 = sld [smem:[#allocation82_spill]]  ;;  %s730_s19 = int_to_ptr.vmem [resolvable:$true] %s729_s19 }
 0x1e7   : > { %s6326_s27 = scalar_lea.hbm %s7554_s4, %s6127_s25 }
 0x1e8   : > { %s5474_s12 = scalar_lea.hbm %s7555_s7, 16 }
 0x1e9   : > { %p5475_p3 = scmp.ne.s32.totalorder %s7555_s7, %s5474_s12  ;;  %p5481_p13 = scmp.lt.u32.totalorder %s5474_s12, %s7555_s7 }
 0x1eb   : > { %p5477_p11 = pnand %p5475_p3, %p7545_p2 }
 0x1ed   : > { %p5478_p12 = pneg %p5477_p11 }
 0x1ef   : > { %p5483_p1 = pnand %p5481_p13, %p5478_p12 }
 0x1f1   : > { %5486 = shalt.err (!%p5483_p1)
}
 0x1f2   : > { %s5487_s21 = scalar_lea.vmem %s730_s19, 16  ;;  %s5494_s17 = scalar_lea.vmem %s730_s19, 32 }
 0x1f3   : > { %p5488_p0 = scmp.ne.s32.totalorder %s730_s19, %s5487_s21  ;;  %p5495_p6 = scmp.lt.s32.totalorder %s730_s19, %s730_s19 }
 0x1f4   : > { %p5496_p8 = scmp.lt.s32.totalorder %s5494_s17, %s5487_s21 }
 0x1f5   : > { %p5490_p5 = pnand %p5488_p0, %p7545_p2 }
 0x1f6   : > { %p5497_p10 = por %p5496_p8, %p5495_p6 }
 0x1f7   : > { %p5491_p7 = pneg %p5490_p5 }
 0x1f9   : > { %p5498_p4 = pnand %p5497_p10, %p5491_p7 }
 0x1fb   : > { %5501 = shalt.err (!%p5498_p4)
}
 0x1fc   : > { %4818 = dma.hbm_to_vmem [thread:$0]  (!%p7546_p9), %s7555_s7, 16, %s730_s19, [#allocation38]  }
 0x1fd   : > { %s747_s12 = scalar_lea.vmem [#allocation7], %s6124_s6  ;;  %s4400_s8 = sshll.u32 %s6117_s29, 2 }
 0x1fe   : > { %s754_s30 = sshll.u32 %s747_s12, 4  ;;  %s744_s10 = scalar_lea.sflag [#allocation8], %s6117_s29  ;;  %s755_s30 = int_to_ptr.vmem [resolvable:$true] %s754_s30 }
 0x1ff   : > { %s5502_s18 = scalar_lea.hbm %s6326_s27, 128  ;;  %p7556_p3 = scmp.ne.s32.totalorder %s7541_s15, 0 }
 0x200   : > { %p5503_p2 = scmp.ne.s32.totalorder %s6326_s27, %s5502_s18  ;;  %s5507_s13 = scalar_lea.hbm %s7554_s4, 256 }
 0x201   : > { %p5508_p13 = scmp.lt.u32.totalorder %s6326_s27, %s7554_s4  ;;  %p5509_p1 = scmp.lt.u32.totalorder %s5507_s13, %s5502_s18 }
 0x202   : > { %p5505_p11 = pnand %p5503_p2, %p7556_p3  ;;  %p5511_p0 = scmp.lt.u32.totalorder %s5502_s18, %s6326_s27 }
 0x203   : > { %p5510_p9 = por %p5509_p1, %p5508_p13 }
 0x204   : > { %p5506_p12 = pneg %p5505_p11 }
 0x205   : > { %p5512_p5 = por %p5511_p0, %p5510_p9 }
 0x207   : > { %p5513_p7 = pnand %p5512_p5, %p5506_p12 }
 0x209   : > { %5516 = shalt.err (!%p5513_p7)
}
 0x20a   : > { %s5517_s19 = scalar_lea.vmem %s755_s30, 128  ;;  %s5754_s1 = smov [#allocation7]  }
 0x20b   : > { %p5518_p6 = scmp.ne.s32.totalorder %s755_s30, %s5517_s19  ;;  %s5522_s21 = sshll.u32 %s5754_s1, 4  ;;  %s5523_s21 = int_to_ptr.vmem [resolvable:$false] %s5522_s21 }
 0x20c   : > { %s5524_s17 = scalar_lea.vmem %s5523_s21, 256  ;;  %p5525_p4 = scmp.lt.s32.totalorder %s755_s30, %s5523_s21 }
 0x20d   : > { %p5520_p8 = pnand %p5518_p6, %p7556_p3  ;;  %p5526_p2 = scmp.lt.s32.totalorder %s5524_s17, %s5517_s19 }
 0x20f   : > { %p5521_p10 = pneg %p5520_p8  ;;  %p5527_p11 = por %p5526_p2, %p5525_p4 }
 0x211   : > { %p5528_p1 = pnand %p5527_p11, %p5521_p10 }
 0x213   : > { %5531 = shalt.err (!%p5528_p1)
}
 0x214   : > { %p7557_p13 = scmp.ne.s32.totalorder %s7539_s16, 0  ;;  %s4401_s14 = sshll.u32 %s5732_s3, 6 }
 0x215   : > { %s783_s26 = scalar_lea.vmem [#allocation12], %s4400_s8  ;;  %s7558_s28 = sld [smem:[#allocation65_spill]] }
 0x216   : > { %4822 = dma.hbm_to_vmem [thread:$0]  (!%p7557_p13), %s6326_s27, 128, %s755_s30, %s744_s10  }
 0x217   : > { %s790_s12 = sshll.u32 %s783_s26, 4  ;;  %s791_s12 = int_to_ptr.vmem [resolvable:$true] %s790_s12 }
 0x21b   : > { %s788_s13 = scalar_lea.hbm %s7558_s28, %s4401_s14  ;;  %s5537_s1 = scalar_lea.hbm %s7558_s28, 128 }
 0x21c   : > { %s5532_s9 = scalar_lea.hbm %s788_s13, 64  ;;  %p5538_p5 = scmp.lt.u32.totalorder %s788_s13, %s7558_s28 }
 0x21d   : > { %p5533_p12 = scmp.ne.s32.totalorder %s788_s13, %s5532_s9  ;;  %p5539_p7 = scmp.lt.u32.totalorder %s5537_s1, %s5532_s9 }
 0x21e   : > { %p5541_p8 = scmp.lt.u32.totalorder %s5532_s9, %s788_s13 }
 0x21f   : > { %p5535_p9 = pnand %p5533_p12, %p7556_p3  ;;  %p5540_p6 = por %p5539_p7, %p5538_p5 }
 0x221   : > { %p5536_p0 = pneg %p5535_p9  ;;  %p5542_p10 = por %p5541_p8, %p5540_p6 }
 0x223   : > { %p5543_p4 = pnand %p5542_p10, %p5536_p0 }
 0x225   : > { %5546 = shalt.err (!%p5543_p4)
}
 0x226   : > { %s5547_s10 = scalar_lea.vmem %s791_s12, 64  ;;  %s5755_s21 = smov [#allocation12]  }
 0x227   : > { %p5548_p2 = scmp.ne.s32.totalorder %s791_s12, %s5547_s10  ;;  %s5552_s17 = sshll.u32 %s5755_s21, 4  ;;  %s5553_s17 = int_to_ptr.vmem [resolvable:$false] %s5552_s17 }
 0x228   : > { %s5554_s26 = scalar_lea.vmem %s5553_s17, 128  ;;  %p5555_p12 = scmp.lt.s32.totalorder %s791_s12, %s5553_s17 }
 0x229   : > { %p5550_p11 = pnand %p5548_p2, %p7556_p3  ;;  %p5556_p9 = scmp.lt.s32.totalorder %s5554_s26, %s5547_s10 }
 0x22b   : > { %p5551_p1 = pneg %p5550_p11  ;;  %p5557_p13 = por %p5556_p9, %p5555_p12 }
 0x22d   : > { %p5558_p5 = pnand %p5557_p13, %p5551_p1 }
 0x22f   : > { %5561 = shalt.err (!%p5558_p5)
}
 0x230   : > { %p7559_p7 = scmp.ne.s32.totalorder %s7539_s16, 0  ;;  %s7560_s18 = scalar_lea.sflag [#allocation11], %s6134_s23 }
 0x231   : > { %s7561_s5 = sld [smem:[#allocation67_spill]]  ;;  %s819_s1 = scalar_lea.vmem [#allocation15], %s4400_s8 }
 0x232   : > { %4828 = dma.hbm_to_vmem [thread:$0]  (!%p7559_p7), %s788_s13, 64, %s791_s12, %s7560_s18  }
 0x233   : > { %s826_s27 = sshll.u32 %s819_s1, 4  ;;  %s827_s27 = int_to_ptr.vmem [resolvable:$true] %s826_s27 }
 0x237   : > { %s6393_s19 = scalar_lea.hbm %s7561_s5, %s4401_s14  ;;  %s5567_s10 = scalar_lea.hbm %s7561_s5, 128 }
 0x238   : > { %s5562_s30 = scalar_lea.hbm %s6393_s19, 64  ;;  %p5568_p8 = scmp.lt.u32.totalorder %s6393_s19, %s7561_s5 }
 0x239   : > { %p5563_p13 = scmp.ne.s32.totalorder %s6393_s19, %s5562_s30  ;;  %p5569_p10 = scmp.lt.u32.totalorder %s5567_s10, %s5562_s30 }
 0x23a   : > { %p5571_p2 = scmp.lt.u32.totalorder %s5562_s30, %s6393_s19 }
 0x23b   : > { %p5565_p0 = pnand %p5563_p13, %p7556_p3  ;;  %p5570_p4 = por %p5569_p10, %p5568_p8 }
 0x23d   : > { %p5566_p6 = pneg %p5565_p0  ;;  %p5572_p11 = por %p5571_p2, %p5570_p4 }
 0x23f   : > { %p5573_p1 = pnand %p5572_p11, %p5566_p6 }
 0x241   : > { %5576 = shalt.err (!%p5573_p1)
}
 0x242   : > { %s5577_s29 = scalar_lea.vmem %s827_s27, 64  ;;  %s5756_s8 = smov [#allocation15]  }
 0x243   : > { %p5578_p12 = scmp.ne.s32.totalorder %s827_s27, %s5577_s29  ;;  %s5582_s17 = sshll.u32 %s5756_s8, 4  ;;  %s5583_s17 = int_to_ptr.vmem [resolvable:$false] %s5582_s17 }
 0x244   : > { %s5584_s26 = scalar_lea.vmem %s5583_s17, 128  ;;  %p5585_p13 = scmp.lt.s32.totalorder %s827_s27, %s5583_s17 }
 0x245   : > { %p5580_p9 = pnand %p5578_p12, %p7556_p3  ;;  %p5586_p0 = scmp.lt.s32.totalorder %s5584_s26, %s5577_s29 }
 0x247   : > { %p5581_p5 = pneg %p5580_p9  ;;  %p5587_p7 = por %p5586_p0, %p5585_p13 }
 0x249   : > { %p5588_p8 = pnand %p5587_p7, %p5581_p5 }
 0x24b   : > { %5591 = shalt.err (!%p5588_p8)
}
 0x24c   : > { %p7562_p10 = scmp.ne.s32.totalorder %s7539_s16, 0  ;;  %s7563_s18 = scalar_lea.sflag [#allocation14], %s6134_s23 }
 0x24d   : > { %s7564_s1 = sld [smem:[#allocation68_spill]]  ;;  %s837_s12 = scalar_lea.vmem [#allocation16], %s6124_s6 }
 0x24e   : > { %4834 = dma.hbm_to_vmem [thread:$0]  (!%p7562_p10), %s6393_s19, 64, %s827_s27, %s7563_s18  }
 0x24f   : > { %s844_s13 = sshll.u32 %s837_s12, 4  ;;  %s834_s10 = scalar_lea.sflag [#allocation17], %s6134_s23  ;;  %s845_s13 = int_to_ptr.vmem [resolvable:$true] %s844_s13 }
 0x253   : > { %s6420_s30 = scalar_lea.hbm %s7564_s1, %s6127_s25  ;;  %s5597_s27 = scalar_lea.hbm %s7564_s1, 256 }
 0x254   : > { %s5592_s21 = scalar_lea.hbm %s6420_s30, 128  ;;  %p5598_p2 = scmp.lt.u32.totalorder %s6420_s30, %s7564_s1 }
 0x255   : > { %p5593_p7 = scmp.ne.s32.totalorder %s6420_s30, %s5592_s21  ;;  %p5599_p11 = scmp.lt.u32.totalorder %s5597_s27, %s5592_s21 }
 0x256   : > { %p5601_p12 = scmp.lt.u32.totalorder %s5592_s21, %s6420_s30 }
 0x257   : > { %p5595_p6 = pnand %p5593_p7, %p7556_p3  ;;  %p5600_p1 = por %p5599_p11, %p5598_p2 }
 0x259   : > { %p5596_p4 = pneg %p5595_p6  ;;  %p5602_p9 = por %p5601_p12, %p5600_p1 }
 0x25b   : > { %p5603_p5 = pnand %p5602_p9, %p5596_p4 }
 0x25d   : > { %5606 = shalt.err (!%p5603_p5)
}
 0x25e   : > { %s5607_s6 = scalar_lea.vmem %s845_s13, 128  ;;  %s5757_s23 = smov [#allocation16]  }
 0x25f   : > { %p5608_p13 = scmp.ne.s32.totalorder %s845_s13, %s5607_s6  ;;  %s5612_s8 = sshll.u32 %s5757_s23, 4  ;;  %s5613_s8 = int_to_ptr.vmem [resolvable:$false] %s5612_s8 }
 0x260   : > { %s5614_s17 = scalar_lea.vmem %s5613_s8, 256  ;;  %p5615_p7 = scmp.lt.s32.totalorder %s845_s13, %s5613_s8 }
 0x261   : > { %p5610_p0 = pnand %p5608_p13, %p7556_p3  ;;  %p5616_p6 = scmp.lt.s32.totalorder %s5614_s17, %s5607_s6 }
 0x263   : > { %p5611_p8 = pneg %p5610_p0  ;;  %p5617_p10 = por %p5616_p6, %p5615_p7 }
 0x265   : > { %p5618_p2 = pnand %p5617_p10, %p5611_p8 }
 0x267   : > { %5621 = shalt.err (!%p5618_p2)
}
 0x268   : > { %p7565_p11 = scmp.ne.s32.totalorder %s7539_s16, 0  ;;  %s7566_s26 = sld [smem:[#allocation55_spill]] }
 0x26a   : > { %4837 = dma.hbm_to_vmem [thread:$0]  (!%p7565_p11), %s6420_s30, 128, %s845_s13, %s834_s10  }
 0x26e   : > { %p7567_p4 = scmp.ne.s32.totalorder %s7566_s26, 0 }
 0x270   : > { %853 = sbr.rel (%p7567_p4) target bundleno = 3714 (0xe82), region = 104 }
 0x277   : > { %s6444_s15 = sand.u32 1, %s5724_s20   ;;  %p7568_p3 = scmp.ne.s32.totalorder %s7535_s2, 0 }
 0x278   : > { %s6447_s18 = sshll.u32 %s6444_s15, 3  ;;  %s856_s22 = scalar_lea.sflag [#allocation8], %s6444_s15 }
 0x279   : > { %s859_s9 = scalar_lea.vmem [#allocation7], %s6447_s18 }
 0x27a   : > { %5667 = dma.done.wait (%p7568_p3), %s856_s22, 128  }
 0x27b   : > { %5669 = vsyncadd (%p7568_p3), %s856_s22, 4294967168  ;;  %s864_s16 = sand.u32 1, %s5899_s0   ;;  %s868_s12 = scalar_lea.vmem [#allocation10], %s6447_s18 }
 0x27c   : > { %s865_s30 = scalar_lea.sflag [#allocation11], %s864_s16 }
 0x27d   : > { %5671 = dma.done.wait (%p7568_p3), %s865_s30, 192  }
 0x27e   : > { %5673 = vsyncadd (%p7568_p3), %s865_s30, 4294967104  ;;  %s4411_s13 = sshll.u32 %s6444_s15, 2  ;;  %s883_s21 = scalar_lea.sflag [#allocation14], %s864_s16 }
 0x27f   : > { %s6462_s10 = scalar_lea.vmem [#allocation12], %s4411_s13  ;;  %s886_s14 = scalar_lea.vmem [#allocation13], %s6447_s18 }
 0x280   : > { %5675 = dma.done.wait (%p7568_p3), %s883_s21, 192  }
 0x281   : > { %5677 = vsyncadd (%p7568_p3), %s883_s21, 4294967104  ;;  %s6469_s19 = scalar_lea.vmem [#allocation15], %s4411_s13  ;;  %s901_s27 = scalar_lea.sflag [#allocation17], %s864_s16 }
 0x282   : > { %s904_s29 = scalar_lea.vmem [#allocation16], %s6447_s18 }
 0x283   : > { %5679 = dma.done.wait (%p7568_p3), %s901_s27, 128  }
 0x284   : > { %5681 = vsyncadd (%p7568_p3), %s901_s27, 4294967168  ;;  %p7569_p10 = scmp.eq.s32.totalorder %s5899_s0, 0 }
 0x286   : > { %5683 = dma.done.wait (%p7569_p10), [#allocation17], 16   ;;  %p7570_p1 = pmov %p7569_p10 }
 0x288   : > { %5685 = vsyncadd (%p7570_p1), [#allocation17], 4294967280  ;;  %p7571_p12 = pmov %p7570_p1 }
 0x289   : > { %p7572_p9 = pmov %p7570_p1 }
 0x28a   : > { %5687 = dma.done.wait (%p7571_p12), [#allocation20], 144  }
 0x28b   : > { %5689 = vsyncadd (%p7572_p9), [#allocation20], 4294967152  ;;  %p7573_p5 = pmov %p7570_p1 }
 0x28c   : > { %p7574_p13 = pmov %p7570_p1 }
 0x28d   : > { %5691 = dma.done.wait (%p7573_p5), [#allocation23], 272  }
 0x28e   : > { %5693 = vsyncadd (%p7574_p13), [#allocation23], 4294967024  ;;  %p7575_p0 = pmov %p7570_p1 }
 0x290   : > { %5695 = dma.done.wait (%p7575_p0), [#allocation26], 512   ;;  %p7576_p8 = pmov %p7575_p0 }
 0x291   : > { %p7577_p7 = pmov %p7575_p0 }
 0x292   : > { %5697 = vsyncadd (%p7576_p8), [#allocation26], 4294966784 }
 0x293   : > { %5699 = dma.done.wait (%p7577_p7), [#allocation29], 528   ;;  %p7578_p6 = pmov %p7575_p0 }
 0x294   : > { %p7579_p2 = pmov %p7575_p0 }
 0x295   : > { %5701 = vsyncadd (%p7578_p6), [#allocation29], 4294966768 }
 0x296   : > { %5703 = dma.done.wait (%p7579_p2), [#allocation32], 528   ;;  %p7580_p11 = pmov %p7575_p0 }
 0x297   : > { %p7581_p4 = pmov %p7575_p0 }
 0x298   : > { %5705 = vsyncadd (%p7580_p11), [#allocation32], 4294966768 }
 0x299   : > { %5707 = dma.done.wait (%p7581_p4), [#allocation35], 544   ;;  %p7582_p3 = pmov %p7575_p0 }
 0x29a   : > { %p7583_p10 = pmov %p7575_p0 }
 0x29b   : > { %5709 = vsyncadd (%p7582_p3), [#allocation35], 4294966752 }
 0x29c   : > { %5711 = dma.done.wait (%p7583_p10), [#allocation38], 16   ;;  %p7584_p1 = pmov %p7575_p0 }
 0x29d   : > { %v5758_v1 = vmov 0   ;;  %v5759_v2 = vmov 2   ;;  %v6510_v3 = vld [vmem:[%s886_s14] sm:$0xff]  ;;  %v5760_v4 = vmov 1   ;;  %v6518_v6 = vld [vmem:[%s6469_s19] ss:$0 sm:$0xff]  ;;  %v1098_v20 = vlaneseq }
 0x29e   : > { %5713 = vsyncadd (%p7584_p1), [#allocation38], 4294967280  ;;  %4928 = vset.pattern.permute.xlu0 %v5758_v1  ;;  %4930 = vset.pattern.permute.xlu1 %v5759_v2  ;;  %v6521_v7 = vld [vmem:[%s6469_s19 + $0x2] ss:$0 sm:$0xff]  ;;  %v6524_v9 = vld [vmem:[%s6469_s19 + $0x1] ss:$0 sm:$0xff] }
 0x29f   : > { %1057 = vperm.xlu0 %4928, %v6510_v3   ;;  %1080 = vperm.xlu1 %4930, %v6510_v3   ;;  %v6529_v21 = vshrl.u32 %v1098_v20, 7  ;;  %v4938_v42 = vld [vmem:[#allocation19] sm:$0xff]   ;;  %v1094_v44 = vld [vmem:[%s6462_s10] sm:$0xf]  ;;  %v4432_v56 = vld [vmem:[#allocation18] ss:$0 sm:$0xff] }
 0x2a0   : > { %4608 = vmatprep.subr.bf16.mxu0 %v4938_v42  ;;  %v1096_v45 = vpack.i.b16 %v1094_v44, %v1094_v44  ;;  %v1105_v46 = vshrl.u32 %v1094_v44, 16  ;;  %vm1275_vm2 = vcmask 130048   ;;  %vm5762_vm3 = vmmov 0   ;;  %s4487_s2 = sshll.u32 %s5899_s0, 4  ;;  %s1042_s25 = scalar_lea.vmem [#allocation39], %s6444_s15 }
 0x2a1   : > { %v6532_v24 = vsub.s32 0, %v6529_v21  ;;  %v6535_v25 = vsub.s32 2, %v6529_v21  ;;  %v6540_v31 = vsub.s32 4, %v6529_v21  ;;  %v6543_v32 = vsub.s32 1, %v6529_v21  ;;  %4609 = vmatpush3.bf16.msra.mxu0 %v4938_v42  ;;  %s4071_s6 = sshll.u32 %s1042_s25, 4  ;;  %s7596_s17 = sld [smem:[#allocation83_spill]]  ;;  %s7390_s6 = int_to_ptr.vmem [resolvable:$true] %s4071_s6 }
 0x2a2   : > { %v6548_v35 = vsub.s32 6, %v6529_v21  ;;  %v6551_v36 = vsub.s32 3, %v6529_v21  ;;  %v6556_v39 = vsub.s32 5, %v6529_v21  ;;  %v6560_v41 = vsub.s32 7, %v6529_v21  ;;  %s4059_s18 = scalar_lea.sflag [#allocation9], %s6444_s15  ;;  %s5622_s22 = scalar_lea.vmem %s7390_s6, 16 }
 0x2a3   : > { %4929 = vset.pattern.permute.xlu0 %v5760_v4  ;;  %4931 = vset.pattern.permute.xlu1 %v5758_v1  ;;  %7585 = vst [vmem:[#allocation59_spill] sm:$0xff] %v6540_v31  ;;  %v1101_v47 = vrot.slane %v1096_v45, %v6532_v24  ;;  %v1106_v48 = vpack.i.b16 %v1105_v46, %v1105_v46  ;;  %vm1409_vm4 = vcmask 257024   ;;  %vm1427_vm5 = vcmask 261120   ;;  %p5623_p12 = scmp.ne.s32.totalorder %s7390_s6, %s5622_s22  ;;  %p7597_p9 = scmp.ne.s32.totalorder %s7536_s24, 0 }
 0x2a4   : > { %1068 = vperm.xlu0 %4929, %v6510_v3   ;;  %7586 = vst [vmem:[#allocation60_spill] sm:$0xff] %v6548_v35  ;;  %7587 = vst [vmem:[#allocation61_spill] sm:$0xff] %v6556_v39  ;;  %v1118_v50 = vrot.slane %v1096_v45, %v6543_v32  ;;  %v1132_v52 = vrot.slane %v1096_v45, %v6535_v25  ;;  %v1146_v54 = vrot.slane %v1096_v45, %v6551_v36  ;;  %vm1492_vm6 = vcmask 1041409   ;;  %s5764_s0 = smov [#allocation39]  }
 0x2a5   : > { %7588 = vst [vmem:[#allocation62_spill] sm:$0xff] %v6560_v41  ;;  %v1111_v49 = vrot.slane %v1106_v48, %v6532_v24  ;;  %v1125_v51 = vrot.slane %v1106_v48, %v6543_v32  ;;  %v1139_v53 = vrot.slane %v1106_v48, %v6535_v25  ;;  %v1153_v55 = vrot.slane %v1106_v48, %v6551_v36  ;;  %p5624_p5 = pnand %p5623_p12, %p7597_p9 }
 0x2a6   : > { %vm1494_vm7 = vcmask 1042434   ;;  %vm1496_vm8 = vcmask 1043459   ;;  %vm1498_vm9 = vcmask 1044484   ;;  %vm1500_vm10 = vcmask 1045509  }
 0x2a7   : > { %vm1502_vm11 = vcmask 1046534   ;;  %vm1504_vm12 = vcmask 1047559   ;;  %s7388_s26 = scalar_lea.hbm %s7596_s17, %s4487_s2  ;;  %p5625_p13 = pneg %p5624_p5 }
 0x31e   : > { %v1058_v5 = vpop.permute.xlu0 %1057  ;;  %v1081_v8 = vpop.permute.xlu1 %1080 }
 0x31f   : > { %v1060_v10 = vsub.f32 %v6518_v6, %v1058_v5  ;;  %v1083_v11 = vsub.f32 %v6521_v7, %v1081_v8 }
 0x321   : > { %v1061_v14 = vmul.f32 %v1060_v10, %v1060_v10  ;;  %v1084_v16 = vmul.f32 %v1083_v11, %v1083_v11 }
 0x323   : > { %v1069_v12 = vpop.permute.xlu0 %1068 }
 0x324   : > { %v1071_v13 = vsub.f32 %v6524_v9, %v1069_v12 }
 0x326   : > { %v1072_v15 = vmul.f32 %v1071_v13, %v1071_v13 }
 0x328   : > { %v1073_v17 = vadd.f32 %v1072_v15, %v1061_v14 }
 0x32a   : > { %v1085_v18 = vadd.f32 %v1084_v16, %v1073_v17 }
 0x32c   : > { %v1086_v19 = vmax.f32 %v1085_v18, 1e-12 }
 0x32e   : > { %4963 = vrsqrt.f32 %v1086_v19  ;;  %vm1089_vm0 = vcmp.eq.f32.partialorder %v1086_v19, inf  ;;  %v1092_v26 = vand.u32 2147483648, %v1086_v19  ;;  %vm1091_vm1 = vcmp.eq.f32.partialorder %v1086_v19, 0.0 }
 0x338   : > { %v4964_v22 = vpop.eup %4963 }
 0x339   : > { %v1088_v23 = vmul.f32 %v4964_v22, %v1086_v19 }
 0x33b   : > { %v1090_v27 = vsel %vm1089_vm0, %v1086_v19, %v1088_v23 }
 0x33c   : > { %v1093_v28 = vsel %vm1091_vm1, %v1092_v26, %v1090_v27  ;;  %vm3453_vm1 = vcmask 523264  }
 0x33d   : > { %v1174_v29 = vrot.slane %v1093_v28, %v6535_v25  ;;  %v1160_v30 = vrot.slane %v1093_v28, %v6532_v24  ;;  %v1188_v33 = vrot.slane %v1093_v28, %v6540_v31  ;;  %v1167_v34 = vrot.slane %v1093_v28, %v6543_v32 }
 0x33e   : > { %v1202_v37 = vrot.slane %v1093_v28, %v6548_v35  ;;  %v1181_v38 = vrot.slane %v1093_v28, %v6551_v36  ;;  %v1195_v40 = vrot.slane %v1093_v28, %v6556_v39  ;;  %v1209_v43 = vrot.slane %v1093_v28, %v6560_v41 }
 0x33f   : > { %1176 = vbcast.lane.b32.xlu0 %v1174_v29, 256  ;;  %1162 = vbcast.lane.b32.xlu1 %v1160_v30, 256 }
 0x343   : > { %1190 = vbcast.lane.b32.xlu0 %v1188_v33, 256  ;;  %1169 = vbcast.lane.b32.xlu1 %v1167_v34, 256 }
 0x347   : > { %1204 = vbcast.lane.b32.xlu0 %v1202_v37, 256  ;;  %1183 = vbcast.lane.b32.xlu1 %v1181_v38, 256 }
 0x34b   : > { %1197 = vbcast.lane.b32.xlu1 %v1195_v40, 256  ;;  %1103 = vbcast.lane.c.b16.xlu0 %v1101_v47, 256 }
 0x34f   : > { %1211 = vbcast.lane.b32.xlu1 %v1209_v43, 256  ;;  %1120 = vbcast.lane.c.b16.xlu0 %v1118_v50, 256 }
 0x353   : > { %1113 = vbcast.lane.c.b16.xlu1 %v1111_v49, 256  ;;  %1134 = vbcast.lane.c.b16.xlu0 %v1132_v52, 256 }
 0x357   : > { %1127 = vbcast.lane.c.b16.xlu1 %v1125_v51, 256  ;;  %1148 = vbcast.lane.c.b16.xlu0 %v1146_v54, 256 }
 0x35b   : > { %1141 = vbcast.lane.c.b16.xlu1 %v1139_v53, 256 }
 0x35f   : > { %1155 = vbcast.lane.c.b16.xlu1 %v1153_v55, 256 }
 0x363   : > { %1603 = vperm.xlu1 %4931, %v6510_v3  }
 0x367   : > { %4932 = vset.pattern.permute.xlu1 %v5760_v4 }
 0x368   : > { %1614 = vperm.xlu1 %4932, %v6510_v3  }
 0x36c   : > { %4933 = vset.pattern.permute.xlu1 %v5759_v2 }
 0x36d   : > { %1626 = vperm.xlu1 %4933, %v6510_v3  }
 0x371   : > { %4934 = vset.pattern.permute.xlu1 %v5758_v1 }
 0x3b1   : > { %v1177_v57 = vpop.permute.xlu0 %1176  ;;  %v1163_v58 = vpop.permute.xlu1 %1162 }
 0x3b2   : > { %v1221_v59 = vsub.f32 %v1177_v57, %v4432_v56  ;;  %v1219_v60 = vsub.f32 %v1163_v58, %v4432_v56 }
 0x3b4   : > { %v1227_v61 = vmul.f32 %v1219_v60, %v1219_v60  ;;  %v1229_v0 = vmul.f32 %v1221_v59, %v1221_v59  ;;  %v4939_v60 = vld [vmem:[#allocation22] sm:$0xff]  }
 0x3b5   : > { %v1191_v62 = vpop.permute.xlu0 %1190  ;;  %v1170_v63 = vpop.permute.xlu1 %1169 }
 0x3b6   : > { %v1235_v5 = vmul.f32 -10.0, %v1227_v61  ;;  %v1223_v8 = vsub.f32 %v1191_v62, %v4432_v56  ;;  %v1220_v4 = vsub.f32 %v1170_v63, %v4432_v56  ;;  %v1237_v14 = vmul.f32 -10.0, %v1229_v0  ;;  %v4940_v62 = vld [vmem:[#allocation22 + $0x8] sm:$0xff]   ;;  %v4433_v63 = vld [vmem:[#allocation21] ss:$0 sm:$0xff] }
 0x3b7   : > { %v7488_v61 = vmov 0.0  }
 0x3b8   : > { %v1228_v10 = vmul.f32 %v1220_v4, %v1220_v4  ;;  %v1231_v11 = vmul.f32 %v1223_v8, %v1223_v8  ;;  %v1243_v15 = vmul.f32 1.442695, %v1235_v5  ;;  %v1247_v27 = vmul.f32 1.442695, %v1237_v14  ;;  %4618 = vmatprep.subr.bf16.mxu1 %v7488_v61  ;;  %4622 = vmatprep.mubr.msk.bf16.mxu1 %vm5762_vm3, %v7488_v61 }
 0x3b9   : > { %v1205_v12 = vpop.permute.xlu0 %1204  ;;  %v1184_v13 = vpop.permute.xlu1 %1183  ;;  %4619 = vmatpush3.bf16.msra.mxu1 %v4939_v60 }
 0x3ba   : > { %v1236_v16 = vmul.f32 -10.0, %v1228_v10  ;;  %v1225_v17 = vsub.f32 %v1205_v12, %v4432_v56  ;;  %v1222_v18 = vsub.f32 %v1184_v13, %v4432_v56  ;;  %v1239_v20 = vmul.f32 -10.0, %v1231_v11  ;;  %4620 = vmatprep.subr.bf16.mxu1 %v7488_v61 }
 0x3bb   : > { %4965 = vpow2.f32 %v1243_v15 }
 0x3bc   : > { %v1245_v19 = vmul.f32 1.442695, %v1236_v16  ;;  %v1233_v22 = vmul.f32 %v1225_v17, %v1225_v17  ;;  %v1230_v23 = vmul.f32 %v1222_v18, %v1222_v18  ;;  %v1251_v33 = vmul.f32 1.442695, %v1239_v20 }
 0x3bd   : > { %v1198_v26 = vpop.permute.xlu1 %1197  ;;  %4621 = vmatpush3.bf16.msra.mxu1 %v4940_v62  ;;  %v1104_v5 = vpop.permute.xlu0 %1103 }
 0x3be   : > { %v1224_v28 = vsub.f32 %v1198_v26, %v4432_v56  ;;  %4967 = vpow2.f32 %v1245_v19  ;;  %v1238_v29 = vmul.f32 -10.0, %v1230_v23  ;;  %v1241_v34 = vmul.f32 -10.0, %v1233_v22 }
 0x3bf   : > { %4969 = vpow2.f32 %v1247_v27 }
 0x3c0   : > { %v1232_v30 = vmul.f32 %v1224_v28, %v1224_v28  ;;  %v1249_v37 = vmul.f32 1.442695, %v1238_v29  ;;  %v1255_v45 = vmul.f32 1.442695, %v1241_v34 }
 0x3c1   : > { %v1212_v38 = vpop.permute.xlu1 %1211  ;;  %v1121_v20 = vpop.permute.xlu0 %1120 }
 0x3c2   : > { %v1240_v40 = vmul.f32 -10.0, %v1232_v30  ;;  %v1226_v42 = vsub.f32 %v1212_v38, %v4432_v56  ;;  %4971 = vpow2.f32 %v1249_v37 }
 0x3c3   : > { %4973 = vpow2.f32 %v1251_v33 }
 0x3c4   : > { %v1253_v43 = vmul.f32 1.442695, %v1240_v40  ;;  %v1234_v44 = vmul.f32 %v1226_v42, %v1226_v42 }
 0x3c5   : > { %v4966_v47 = vpop.eup %4965  ;;  %v6582_v12 = vpop.permute.xlu1 %1113 }
 0x3c6   : > { %4975 = vpow2.f32 %v1253_v43  ;;  %v1242_v46 = vmul.f32 -10.0, %v1234_v44  ;;  %v6584_v40 = vpop.permute.xlu0 %1134  ;;  %v1386_v60 = vunpack.c.l.bf16 %v6582_v12 }
 0x3c7   : > { %4977 = vpow2.f32 %v1255_v45 }
 0x3c8   : > { %v1257_v48 = vmul.f32 1.442695, %v1242_v46  ;;  %v4968_v49 = vpop.eup %4967 }
 0x3c9   : > { %v1259_v50 = vpack.c.bf16 %v4968_v49, %v4966_v47  ;;  %v4970_v51 = vpop.eup %4969  ;;  %v1128_v23 = vpop.permute.xlu1 %1127 }
 0x3ca   : > { %4979 = vpow2.f32 %v1257_v48  ;;  %v1387_v48 = vunpack.c.l.bf16 %v1121_v20 }
 0x3cb   : > { %4610 = vmatprep.mubr.msk.bf16.mxu0 %vm1275_vm2, %v1259_v50 }
 0x3cc   : > { %v4972_v52 = vpop.eup %4971 }
 0x3cd   : > { %v1260_v53 = vpack.c.bf16 %v4972_v52, %v4970_v51  ;;  %v4974_v54 = vpop.eup %4973  ;;  %v6590_v44 = vpop.permute.xlu1 %1141  ;;  %v1385_v51 = vunpack.c.l.bf16 %v1104_v5  ;;  %v1389_v5 = vunpack.c.l.bf16 %v6584_v40 }
 0x3cf   : > { %4611 = vmatmul.mubr.msk.bf16.vlgmr.msra.gmra.mrb[0].mxu0 %vm1275_vm2, %v1260_v53 }
 0x3d0   : > { %v4976_v55 = vpop.eup %4975 }
 0x3d1   : > { %v1261_v56 = vpack.c.bf16 %v4976_v55, %v4974_v54  ;;  %v4978_v57 = vpop.eup %4977  ;;  %v1388_v55 = vunpack.c.l.bf16 %v1128_v23 }
 0x3d3   : > { %4614 = vmatprep.mubr.msk.bf16.mxu0 %vm1275_vm2, %v1261_v56  ;;  %v1149_v56 = vpop.permute.xlu0 %1148 }
 0x3d4   : > { %v4980_v58 = vpop.eup %4979 }
 0x3d5   : > { %v1262_v59 = vpack.c.bf16 %v4980_v58, %v4978_v57 }
 0x3d7   : > { %4615 = vmatmul.mubr.msk.bf16.gmra.mrb[4].mxu0 %vm1275_vm2, %v1262_v59  ;;  %v6596_v59 = vld [vmem:[%s868_s12] sm:$0xff]  ;;  %vm4048_vm2 = vcmask 253952  }
 0x4a2   : > { %v4612_v0 = vpop.f32.mrb[0].mxu0 }
 0x4a3   : > { %v1331_v8 = vadd.f32 %v4612_v0, %v4433_v63  ;;  %v1322_v4 = vpop.f32.mrb[1].mxu0  ;;  %v1156_v0 = vpop.permute.xlu1 %1155 }
 0x4a4   : > { %v1323_v10 = vadd.f32 %v4433_v63, %v1322_v4  ;;  %v4613_v11 = vpop.f32.mrb[2].mxu0  ;;  %v1392_v20 = vunpack.c.l.bf16 %v1156_v0 }
 0x4a5   : > { %v1355_v13 = vmul.f32 0.5, %v1331_v8  ;;  %v1334_v14 = vadd.f32 %v4613_v11, %v4433_v63  ;;  %v1325_v15 = vpop.f32.mrb[3].mxu0 }
 0x4a6   : > { %v1353_v16 = vmul.f32 0.5, %v1323_v10  ;;  %v1326_v17 = vadd.f32 %v4433_v63, %v1325_v15  ;;  %v1391_v10 = vunpack.c.l.bf16 %v1149_v56  ;;  %v1390_v15 = vunpack.c.l.bf16 %v6590_v44 }
 0x4a7   : > { %4981 = vtanh.f32 %v1355_v13  ;;  %v1356_v18 = vmul.f32 0.5, %v1334_v14 }
 0x4a8   : > { %4983 = vtanh.f32 %v1353_v16  ;;  %v1354_v19 = vmul.f32 0.5, %v1326_v17 }
 0x4a9   : > { %4985 = vtanh.f32 %v1356_v18 }
 0x4aa   : > { %4987 = vtanh.f32 %v1354_v19  ;;  %v4616_v22 = vpop.f32.mrb[4].mxu0 }
 0x4ab   : > { %v1347_v26 = vadd.f32 %v4616_v22, %v4433_v63  ;;  %v1338_v27 = vpop.f32.mrb[5].mxu0 }
 0x4ac   : > { %v1339_v28 = vadd.f32 %v4433_v63, %v1338_v27  ;;  %v4617_v29 = vpop.f32.mrb[6].mxu0 }
 0x4ad   : > { %v1359_v30 = vmul.f32 0.5, %v1347_v26  ;;  %v1350_v33 = vadd.f32 %v4617_v29, %v4433_v63  ;;  %v1341_v34 = vpop.f32.mrb[7].mxu0 }
 0x4ae   : > { %v1357_v37 = vmul.f32 0.5, %v1339_v28  ;;  %v1342_v38 = vadd.f32 %v4433_v63, %v1341_v34 }
 0x4af   : > { %4989 = vtanh.f32 %v1359_v30  ;;  %v6586_v42 = vmul.f32 0.5, %v1350_v33 }
 0x4b0   : > { %4991 = vtanh.f32 %v1357_v37  ;;  %v6588_v43 = vmul.f32 0.5, %v1342_v38 }
 0x4b1   : > { %v4982_v45 = vpop.eup %4981  ;;  %4993 = vtanh.f32 %v6586_v42 }
 0x4b2   : > { %v4984_v46 = vpop.eup %4983  ;;  %v1371_v47 = vadd.f32 1.0, %v4982_v45  ;;  %4995 = vtanh.f32 %v6588_v43 }
 0x4b3   : > { %v4986_v49 = vpop.eup %4985  ;;  %v1369_v50 = vadd.f32 1.0, %v4984_v46 }
 0x4b4   : > { %v4988_v52 = vpop.eup %4987  ;;  %v1379_v53 = vmul.f32 %v1371_v47, %v1355_v13  ;;  %v1372_v54 = vadd.f32 1.0, %v4986_v49 }
 0x4b5   : > { %v1377_v57 = vmul.f32 %v1369_v50, %v1353_v16  ;;  %v1370_v58 = vadd.f32 1.0, %v4988_v52 }
 0x4b6   : > { %v1380_v62 = vmul.f32 %v1372_v54, %v1356_v18  ;;  %v1395_v63 = vmul.f32 %v1387_v48, %v1379_v53 }
 0x4b7   : > { %v1378_v8 = vmul.f32 %v1370_v58, %v1354_v19  ;;  %v1393_v4 = vmul.f32 %v1385_v51, %v1377_v57 }
 0x4b8   : > { %v1403_v11 = vpack.c.bf16 %v1395_v63, %v1395_v63  ;;  %v1421_v13 = vmul.f32 %v1395_v63, %v6596_v59  ;;  %v1396_v14 = vmul.f32 %v1388_v55, %v1380_v62 }
 0x4b9   : > { %v4990_v16 = vpop.eup %4989  ;;  %v1401_v17 = vpack.c.bf16 %v1393_v4, %v1393_v4  ;;  %v1419_v12 = vmul.f32 %v1393_v4, %v6596_v59  ;;  %v1394_v18 = vmul.f32 %v1386_v60, %v1378_v8 }
 0x4ba   : > { %v4992_v22 = vpop.eup %4991  ;;  %v1375_v23 = vadd.f32 1.0, %v4990_v16  ;;  %1412 = vst.msk [vmem:[#allocation2 + $0x8] sm:$0xf] %vm1409_vm4, %v1403_v11  ;;  %v1442_v19 = vsel %vm1427_vm5, %v1421_v13, 0.0  ;;  %v1404_v26 = vpack.c.bf16 %v1396_v14, %v1396_v14  ;;  %v1422_v27 = vmul.f32 %v1396_v14, %v6596_v59 }
 0x4bb   : > { %v4994_v28 = vpop.eup %4993  ;;  %v1373_v29 = vadd.f32 1.0, %v4992_v22  ;;  %1410 = vst.msk [vmem:[#allocation2] sm:$0xf] %vm1409_vm4, %v1401_v17  ;;  %v1428_v33 = vsel %vm1427_vm5, %v1419_v12, 0.0  ;;  %v1402_v34 = vpack.c.bf16 %v1394_v18, %v1394_v18  ;;  %v1420_v38 = vmul.f32 %v1394_v18, %v6596_v59 }
 0x4bc   : > { %v4996_v40 = vpop.eup %4995  ;;  %v1383_v44 = vmul.f32 %v1375_v23, %v1359_v30  ;;  %v1376_v45 = vadd.f32 1.0, %v4994_v28  ;;  %v1429_v46 = vrot.slane %v1428_v33, 4  ;;  %v1443_v47 = vrot.slane %v1442_v19, 4  ;;  %1413 = vst.msk [vmem:[#allocation2 + $0xc] sm:$0xf] %vm1409_vm4, %v1404_v26 }
 0x4bd   : > { %v1381_v48 = vmul.f32 %v1373_v29, %v1357_v37  ;;  %v1374_v49 = vadd.f32 1.0, %v4996_v40  ;;  %1411 = vst.msk [vmem:[#allocation2 + $0x4] sm:$0xf] %vm1409_vm4, %v1402_v34  ;;  %v1435_v50 = vsel %vm1427_vm5, %v1420_v38, 0.0  ;;  %v1449_v51 = vsel %vm1427_vm5, %v1422_v27, 0.0 }
 0x4be   : > { %v1384_v52 = vmul.f32 %v1376_v45, %v6586_v42  ;;  %v1430_v53 = vadd.f32 %v1429_v46, %v1428_v33  ;;  %v1436_v54 = vrot.slane %v1435_v50, 4  ;;  %v1444_v55 = vadd.f32 %v1443_v47, %v1442_v19 }
 0x4bf   : > { %v1382_v30 = vmul.f32 %v1374_v49, %v6588_v43  ;;  %v1450_v56 = vrot.slane %v1449_v51, 4  ;;  %v1397_v57 = vmul.f32 %v1389_v5, %v1381_v48  ;;  %v1399_v58 = vmul.f32 %v1391_v10, %v1383_v44 }
 0x4c0   : > { %v1431_v60 = vrot.slane %v1430_v53, 2  ;;  %v1437_v37 = vadd.f32 %v1436_v54, %v1435_v50  ;;  %v1445_v62 = vrot.slane %v1444_v55, 2  ;;  %v1400_v63 = vmul.f32 %v1392_v20, %v1384_v52 }
 0x4c1   : > { %v1451_v0 = vadd.f32 %v1450_v56, %v1449_v51  ;;  %v1405_v8 = vpack.c.bf16 %v1397_v57, %v1397_v57  ;;  %v1423_v4 = vmul.f32 %v1397_v57, %v6596_v59  ;;  %v1398_v11 = vmul.f32 %v1390_v15, %v1382_v30 }
 0x4c2   : > { %v1432_v13 = vadd.f32 %v1431_v60, %v1430_v53  ;;  %v1438_v42 = vrot.slane %v1437_v37, 2  ;;  %v1446_v14 = vadd.f32 %v1445_v62, %v1444_v55  ;;  %v1407_v16 = vpack.c.bf16 %v1399_v58, %v1399_v58 }
 0x4c3   : > { %v1452_v17 = vrot.slane %v1451_v0, 2  ;;  %1414 = vst.msk [vmem:[#allocation2 + $0x10] sm:$0xf] %vm1409_vm4, %v1405_v8  ;;  %v1456_v43 = vsel %vm1427_vm5, %v1423_v4, 0.0  ;;  %v1406_v5 = vpack.c.bf16 %v1398_v11, %v1398_v11  ;;  %v1424_v10 = vmul.f32 %v1398_v11, %v6596_v59 }
 0x4c4   : > { %v1433_v12 = vrot.slane %v1432_v13, 1  ;;  %v1439_v18 = vadd.f32 %v1438_v42, %v1437_v37  ;;  %v1447_v20 = vrot.slane %v1446_v14, 1  ;;  %v1457_v22 = vrot.slane %v1456_v43, 4  ;;  %1416 = vst.msk [vmem:[#allocation2 + $0x18] sm:$0xf] %vm1409_vm4, %v1407_v16 }
 0x4c5   : > { %v1453_v23 = vadd.f32 %v1452_v17, %v1451_v0  ;;  %1415 = vst.msk [vmem:[#allocation2 + $0x14] sm:$0xf] %vm1409_vm4, %v1406_v5  ;;  %v1463_v15 = vsel %vm1427_vm5, %v1424_v10, 0.0  ;;  %v1425_v19 = vmul.f32 %v1399_v58, %v6596_v59  ;;  %v1408_v26 = vpack.c.bf16 %v1400_v63, %v1400_v63 }
 0x4c6   : > { %v1440_v27 = vrot.slane %v1439_v18, 1  ;;  %v1458_v28 = vadd.f32 %v1457_v22, %v1456_v43  ;;  %v1464_v33 = vrot.slane %v1463_v15, 4  ;;  %v1426_v38 = vmul.f32 %v1400_v63, %v6596_v59  ;;  %v1418_v43 = vld [vmem:[%s859_s9] sm:$0xff]  ;;  %v1604_v22 = vpop.permute.xlu1 %1603  ;;  %s5626_s9 = sshll.u32 %s5764_s0, 4  ;;  %s5627_s9 = int_to_ptr.vmem [resolvable:$false] %s5626_s9 }
 0x4c7   : > { %v1454_v29 = vrot.slane %v1453_v23, 1  ;;  %v1470_v34 = vsel %vm1427_vm5, %v1425_v19, 0.0  ;;  %1417 = vst.msk [vmem:[#allocation2 + $0x1c] sm:$0xf] %vm1409_vm4, %v1408_v26  ;;  %v1434_v40 = vadd.f32 %v1433_v12, %v1432_v13  ;;  %v1448_v47 = vadd.f32 %v1447_v20, %v1446_v14  ;;  %s5628_s16 = scalar_lea.vmem %s5627_s9, 32  ;;  %p5629_p0 = scmp.lt.s32.totalorder %s7390_s6, %s5627_s9 }
 0x4c8   : > { %v1441_v44 = vadd.f32 %v1440_v27, %v1439_v18  ;;  %v1459_v45 = vrot.slane %v1458_v28, 2  ;;  %v1471_v46 = vrot.slane %v1470_v34, 4  ;;  %v1465_v49 = vadd.f32 %v1464_v33, %v1463_v15  ;;  %p5630_p8 = scmp.lt.s32.totalorder %s5628_s16, %s5622_s22 }
 0x4c9   : > { %v1455_v48 = vadd.f32 %v1454_v29, %v1453_v23  ;;  %v1477_v50 = vsel %vm1427_vm5, %v1426_v38, 0.0  ;;  %v1606_v15 = vsub.f32 %v6518_v6, %v1604_v22 }
 0x4ca   : > { %v1493_v51 = vsel %vm1492_vm6, %v1441_v44, %v1434_v40  ;;  %v1460_v52 = vadd.f32 %v1459_v45, %v1458_v28  ;;  %v1472_v53 = vadd.f32 %v1471_v46, %v1470_v34  ;;  %v1478_v54 = vrot.slane %v1477_v50, 4  ;;  %v1615_v23 = vpop.permute.xlu1 %1614  ;;  %p5631_p7 = por %p5630_p8, %p5629_p0 }
 0x4cb   : > { %v1495_v55 = vsel %vm1494_vm7, %v1448_v47, %v1493_v51  ;;  %v1466_v30 = vrot.slane %v1465_v49, 2  ;;  %v1617_v19 = vsub.f32 %v6524_v9, %v1615_v23  ;;  %v1607_v27 = vmul.f32 %v1606_v15, %v1606_v15 }
 0x4cc   : > { %v1497_v56 = vsel %vm1496_vm8, %v1455_v48, %v1495_v55  ;;  %v1461_v59 = vrot.slane %v1460_v52, 1  ;;  %v1473_v57 = vrot.slane %v1472_v53, 2  ;;  %v1479_v58 = vadd.f32 %v1478_v54, %v1477_v50  ;;  %p5632_p6 = pnand %p5631_p7, %p5625_p13 }
 0x4cd   : > { %v1467_v60 = vadd.f32 %v1466_v30, %v1465_v49  ;;  %v1618_v28 = vmul.f32 %v1617_v19, %v1617_v19 }
 0x4ce   : > { %v1462_v37 = vadd.f32 %v1461_v59, %v1460_v52  ;;  %v1474_v62 = vadd.f32 %v1473_v57, %v1472_v53  ;;  %v1480_v63 = vrot.slane %v1479_v58, 2  ;;  %v1627_v26 = vpop.permute.xlu1 %1626  ;;  %v4439_v53 = vld [vmem:[#allocation24] ss:$0 sm:$0xff] }
 0x4cf   : > { %v1468_v0 = vrot.slane %v1467_v60, 1  ;;  %v1629_v29 = vsub.f32 %v6521_v7, %v1627_v26  ;;  %v1619_v33 = vadd.f32 %v1618_v28, %v1607_v27 }
 0x4d0   : > { %v1499_v8 = vsel %vm1498_vm9, %v1462_v37, %v1497_v56  ;;  %v1475_v4 = vrot.slane %v1474_v62, 1  ;;  %v1481_v11 = vadd.f32 %v1480_v63, %v1479_v58 }
 0x4d1   : > { %v1469_v13 = vadd.f32 %v1468_v0, %v1467_v60  ;;  %v1630_v34 = vmul.f32 %v1629_v29, %v1629_v29 }
 0x4d2   : > { %v1476_v42 = vadd.f32 %v1475_v4, %v1474_v62  ;;  %v1482_v14 = vrot.slane %v1481_v11, 1 }
 0x4d3   : > { %v1501_v16 = vsel %vm1500_vm10, %v1469_v13, %v1499_v8  ;;  %v1631_v38 = vadd.f32 %v1630_v34, %v1619_v33 }
 0x4d4   : > { %v1503_v17 = vsel %vm1502_vm11, %v1476_v42, %v1501_v16  ;;  %v1483_v5 = vadd.f32 %v1482_v14, %v1481_v11 }
 0x4d5   : > { %v1632_v40 = vmax.f32 %v1631_v38, 1e-12  ;;  %v2290_v38 = vld [vmem:[%s6462_s10] sm:$0xf] }
 0x4d6   : > { %v1505_v10 = vsel %vm1504_vm12, %v1483_v5, %v1503_v17 }
 0x4d7   : > { %v1507_v12 = vadd.f32 %v1505_v10, %v1418_v43  ;;  %4997 = vrsqrt.f32 %v1632_v40  ;;  %vm1635_vm13 = vcmp.eq.f32.partialorder %v1632_v40, inf  ;;  %v1638_v46 = vand.u32 2147483648, %v1632_v40 }
 0x4d8   : > { %vm1637_vm14 = vcmp.eq.f32.partialorder %v1632_v40, 0.0 }
 0x4d9   : > { %1508 = vst.msk [vmem:[#allocation5] sm:$0xff] %vm1427_vm5, %v1507_v12 }
 0x4e0   : > { %v1509_v18 = vld [vmem:[#allocation5] sm:$0xff] }
 0x4e1   : > { %v1510_v20 = vpack.c.bf16 %v1509_v18, %v1509_v18  ;;  %v4998_v44 = vpop.eup %4997 }
 0x4e2   : > { %v1634_v45 = vmul.f32 %v4998_v44, %v1632_v40  ;;  %v2292_v44 = vpack.i.b16 %v2290_v38, %v2290_v38 }
 0x4e3   : > { %4623 = vmatmul.mubr.msk.bf16.vlgmr.msra.gmra.mrb[0].mxu1 %vm1427_vm5, %v1510_v20 }
 0x4e4   : > { %v1636_v47 = vsel %vm1635_vm13, %v1632_v40, %v1634_v45  ;;  %v2301_v40 = vshrl.u32 %v2290_v38, 16 }
 0x4e5   : > { %v1639_v48 = vsel %vm1637_vm14, %v1638_v46, %v1636_v47 }
 0x4e6   : > { %4999 = vrcp.f32 %v1639_v48  ;;  %v2302_v45 = vpack.i.b16 %v2301_v40, %v2301_v40 }
 0x4e8   : > { %v2321_v47 = vrot.slane %v2302_v45, %v6543_v32 }
 0x4f0   : > { %v5000_v6 = vpop.eup %4999 }
 0x4f1   : > { %v6641_v9 = vmul.f32 %v5000_v6, %v1606_v15  ;;  %v6645_v7 = vmul.f32 %v5000_v6, %v1629_v29  ;;  %v1643_v60 = vmul.f32 %v5000_v6, %v1617_v19 }
 0x4f3   : > { %v1679_v49 = vrot.slane %v6641_v9, %v6543_v32  ;;  %v1946_v50 = vrot.slane %v6645_v7, %v6532_v24  ;;  %v1693_v51 = vrot.slane %v6641_v9, %v6551_v36  ;;  %v1960_v52 = vrot.slane %v6645_v7, %v6535_v25 }
 0x4f4   : > { %v1672_v58 = vrot.slane %v6641_v9, %v6532_v24  ;;  %v1809_v37 = vrot.slane %v1643_v60, %v6532_v24  ;;  %v1816_v62 = vrot.slane %v1643_v60, %v6543_v32  ;;  %v1686_v63 = vrot.slane %v6641_v9, %v6535_v25 }
 0x4f5   : > { %1681 = vbcast.lane.b32.xlu1 %v1679_v49, 256  ;;  %v1823_v0 = vrot.slane %v1643_v60, %v6535_v25  ;;  %v1953_v8 = vrot.slane %v6645_v7, %v6543_v32  ;;  %v1830_v4 = vrot.slane %v1643_v60, %v6551_v36  ;;  %v1700_v11 = vrot.slane %v6641_v9, %v6540_v31  ;;  %v4943_v49 = vld [vmem:[#allocation25] sm:$0xff]  }
 0x4f6   : > { %v1967_v13 = vrot.slane %v6645_v7, %v6551_v36  ;;  %v1844_v42 = vrot.slane %v1643_v60, %v6556_v39  ;;  %v1714_v14 = vrot.slane %v6641_v9, %v6548_v35  ;;  %v1981_v16 = vrot.slane %v6645_v7, %v6556_v39  ;;  %4626 = vmatprep.subr.bf16.mxu1 %v4943_v49 }
 0x4f7   : > { %v1858_v17 = vrot.slane %v1643_v60, %v6560_v41  ;;  %v1995_v43 = vrot.slane %v6645_v7, %v6560_v41  ;;  %v1837_v22 = vrot.slane %v1643_v60, %v6540_v31  ;;  %v1707_v23 = vrot.slane %v6641_v9, %v6556_v39  ;;  %4627 = vmatpush3.bf16.msra.mxu1 %v4943_v49 }
 0x4f8   : > { %v1974_v15 = vrot.slane %v6645_v7, %v6540_v31  ;;  %v1851_v19 = vrot.slane %v1643_v60, %v6548_v35  ;;  %v1721_v26 = vrot.slane %v6641_v9, %v6560_v41  ;;  %v1988_v27 = vrot.slane %v6645_v7, %v6548_v35  ;;  %v4941_v9 = vld [vmem:[#allocation27] sm:$0xff]  }
 0x4f9   : > { %1948 = vbcast.lane.b32.xlu1 %v1946_v50, 256  ;;  %v2328_v7 = vrot.slane %v2292_v44, %v6535_v25  ;;  %v2335_v50 = vrot.slane %v2302_v45, %v6535_v25  ;;  %4634 = vmatprep.subr.bf16.mxu0 %v4941_v9 }
 0x4fa   : > { %4635 = vmatpush3.bf16.msra.mxu0 %v4941_v9 }
 0x4fd   : > { %1695 = vbcast.lane.b32.xlu1 %v1693_v51, 256 }
 0x501   : > { %1962 = vbcast.lane.b32.xlu1 %v1960_v52, 256  ;;  %v4942_v52 = vld [vmem:[#allocation27 + $0x8] sm:$0xff]  }
 0x502   : > { %4636 = vmatprep.subr.bf16.mxu0 %v4942_v52 }
 0x503   : > { %4637 = vmatpush3.bf16.msra.mxu0 %v4942_v52 }
 0x567   : > { %v6712_v48 = vpop.permute.xlu1 %1681 }
 0x56b   : > { %v6718_v51 = vpop.permute.xlu1 %1948 }
 0x5b6   : > { %v1571_v54 = vpop.f32.mrb[0].mxu1 }
 0x5b7   : > { %v1572_v55 = vadd.f32 %v4439_v53, %v1571_v54  ;;  %v4624_v30 = vpop.f32.mrb[1].mxu1  ;;  %v4944_v53 = vld [vmem:[#allocation25 + $0x8] sm:$0xff]  }
 0x5b8   : > { %v1574_v56 = vpop.f32.mrb[2].mxu1  ;;  %v2349_v30 = vrot.slane %v2302_v45, %v6551_v36  ;;  %4628 = vmatprep.subr.bf16.mxu1 %v4944_v53 }
 0x5b9   : > { %v4625_v59 = vpop.f32.mrb[3].mxu1  ;;  %v1577_v57 = vsel %vm1427_vm5, %v1572_v55, 0.0  ;;  %4629 = vmatpush3.bf16.msra.mxu1 %v4944_v53  ;;  %v1696_v56 = vpop.permute.xlu1 %1695 }
 0x5ba   : > { %1578 = vadd.xlane.f32.xlu0 %v1577_v57 }
 0x5bd   : > { %v6724_v57 = vpop.permute.xlu1 %1962 }
 0x5d0   : > { %1674 = vbcast.lane.b32.xlu0 %v1672_v58, 256 }
 0x5d4   : > { %1811 = vbcast.lane.b32.xlu0 %v1809_v37, 256 }
 0x5d8   : > { %1818 = vbcast.lane.b32.xlu0 %v1816_v62, 256 }
 0x5dc   : > { %1688 = vbcast.lane.b32.xlu0 %v1686_v63, 256 }
 0x5e0   : > { %1825 = vbcast.lane.b32.xlu0 %v1823_v0, 256 }
 0x5e4   : > { %1955 = vbcast.lane.b32.xlu0 %v1953_v8, 256 }
 0x5e8   : > { %1832 = vbcast.lane.b32.xlu0 %v1830_v4, 256 }
 0x5ec   : > { %1702 = vbcast.lane.b32.xlu0 %v1700_v11, 256 }
 0x5f0   : > { %1969 = vbcast.lane.b32.xlu0 %v1967_v13, 256 }
 0x5f4   : > { %1846 = vbcast.lane.b32.xlu0 %v1844_v42, 256 }
 0x5f8   : > { %1716 = vbcast.lane.b32.xlu0 %v1714_v14, 256 }
 0x5fc   : > { %1983 = vbcast.lane.b32.xlu0 %v1981_v16, 256 }
 0x600   : > { %1860 = vbcast.lane.b32.xlu0 %v1858_v17, 256 }
 0x604   : > { %1997 = vbcast.lane.b32.xlu0 %v1995_v43, 256 }
 0x608   : > { %2259 = vperm.xlu0 %4929, %v6510_v3  }
 0x60c   : > { %4937 = vset.pattern.permute.xlu0 %v5758_v1 }
 0x647   : > { %v1579_v5 = vpop.xlane.xlu0 %1578 }
 0x648   : > { %v1581_v10 = vmul.f32 0.03125, %v1579_v5 }
 0x64a   : > { %v6678_v12 = vsub.f32 %v1572_v55, %v1581_v10  ;;  %v2342_v55 = vrot.slane %v2292_v44, %v6551_v36 }
 0x64b   : > { %v6697_v28 = vpop.permute.xlu0 %1674 }
 0x64c   : > { %v1583_v18 = vmul.f32 %v6678_v12, %v6678_v12 }
 0x64e   : > { %v1584_v20 = vsel %vm1427_vm5, %v1583_v18, 0.0 }
 0x64f   : > { %1585 = vadd.xlane.f32.xlu1 %v1584_v20  ;;  %v6699_v29 = vpop.permute.xlu0 %1811  ;;  %v4491_v20 = vld [vmem:[#allocation2] sm:$0xff]  }
 0x650   : > { %v4492_v38 = vunpack.c.l.bf16 %v4491_v20 }
 0x653   : > { %v6701_v33 = vpop.permute.xlu0 %1818 }
 0x657   : > { %v6703_v34 = vpop.permute.xlu0 %1688 }
 0x65b   : > { %v6706_v46 = vpop.permute.xlu0 %1825 }
 0x65f   : > { %v6714_v6 = vpop.permute.xlu0 %1955 }
 0x660   : > { %1839 = vbcast.lane.b32.xlu1 %v1837_v22, 256  ;;  %v4454_v22 = vld [vmem:[%s6469_s19] ss:$0 sm:$0xff] }
 0x663   : > { %v6720_v54 = vpop.permute.xlu0 %1832 }
 0x664   : > { %1709 = vbcast.lane.b32.xlu1 %v1707_v23, 256 }
 0x667   : > { %v1703_v59 = vpop.permute.xlu0 %1702 }
 0x668   : > { %1976 = vbcast.lane.b32.xlu1 %v1974_v15, 256 }
 0x66b   : > { %v6726_v58 = vpop.permute.xlu0 %1969 }
 0x66c   : > { %1853 = vbcast.lane.b32.xlu1 %v1851_v19, 256  ;;  %v4554_v19 = vld [vmem:[#allocation2 + $0x8] sm:$0xff]  }
 0x66f   : > { %v6728_v0 = vpop.permute.xlu0 %1846 }
 0x670   : > { %1723 = vbcast.lane.b32.xlu1 %v1721_v26, 256  ;;  %v6750_v26 = vld [vmem:[#allocation2 + $0x10] sm:$0xff]  }
 0x671   : > { %v4500_v49 = vunpack.c.l.bf16 %v6750_v26 }
 0x673   : > { %v6732_v4 = vpop.permute.xlu0 %1716 }
 0x674   : > { %1990 = vbcast.lane.b32.xlu1 %v1988_v27, 256  ;;  %v6752_v27 = vld [vmem:[#allocation2 + $0x18] sm:$0xff]  }
 0x677   : > { %v6739_v16 = vpop.permute.xlu0 %1983 }
 0x678   : > { %2248 = vperm.xlu1 %4934, %v6510_v3  }
 0x67b   : > { %v6743_v5 = vpop.permute.xlu0 %1860 }
 0x67c   : > { %4935 = vset.pattern.permute.xlu1 %v5759_v2  ;;  %v2297_v2 = vrot.slane %v2292_v44, %v6532_v24 }
 0x67d   : > { %2271 = vperm.xlu1 %4935, %v6510_v3   ;;  %v2307_v3 = vrot.slane %v2302_v45, %v6532_v24 }
 0x67e   : > { %2299 = vbcast.lane.c.b16.xlu0 %v2297_v2, 256  ;;  %v4493_v2 = vunpack.c.h.bf16 %v4491_v20 }
 0x67f   : > { %v6747_v18 = vpop.permute.xlu0 %1997 }
 0x681   : > { %4936 = vset.pattern.permute.xlu1 %v5758_v1  ;;  %v2314_v1 = vrot.slane %v2292_v44, %v6543_v32 }
 0x682   : > { %2309 = vbcast.lane.c.b16.xlu1 %v2307_v3, 256  ;;  %v4496_v3 = vunpack.c.l.bf16 %v4554_v19 }
 0x683   : > { %2316 = vbcast.lane.c.b16.xlu0 %v2314_v1, 256  ;;  %v4497_v1 = vunpack.c.h.bf16 %v4554_v19 }
 0x686   : > { %2323 = vbcast.lane.c.b16.xlu1 %v2321_v47, 256  ;;  %v5763_v47 = vmov 1966171168  }
 0x687   : > { %2330 = vbcast.lane.c.b16.xlu0 %v2328_v7, 256  ;;  %v2260_v44 = vpop.permute.xlu0 %2259  ;;  %v6758_v9 = vunpack.c.l.s4 %v5763_v47  ;;  %v4501_v7 = vunpack.c.h.bf16 %v6750_v26 }
 0x68a   : > { %2337 = vbcast.lane.c.b16.xlu1 %v2335_v50, 256 }
 0x68b   : > { %2344 = vbcast.lane.c.b16.xlu0 %v2342_v55, 256 }
 0x68e   : > { %2351 = vbcast.lane.c.b16.xlu1 %v2349_v30, 256 }
 0x6dc   : > { %v1586_v60 = vpop.xlane.xlu1 %1585 }
 0x6dd   : > { %v1587_v37 = vmul.f32 0.03125, %v1586_v60  ;;  %v5049_v60 = vld [vmem:[%s6469_s19 + $0x1] ss:$0 sm:$0xff] }
 0x6df   : > { %v1588_v62 = vadd.f32 1e-05, %v1587_v37  ;;  %v6776_v37 = vsub.f32 %v5049_v60, %v2260_v44 }
 0x6e0   : > { %v1840_v63 = vpop.permute.xlu1 %1839 }
 0x6e1   : > { %5001 = vrsqrt.f32 %v1588_v62 }
 0x6e4   : > { %v6730_v8 = vpop.permute.xlu1 %1709 }
 0x6e8   : > { %v6734_v11 = vpop.permute.xlu1 %1976 }
 0x6eb   : > { %v5002_v13 = vpop.eup %5001 }
 0x6ec   : > { %v1590_v42 = vmul.f32 %v5002_v13, %v6678_v12  ;;  %v6737_v14 = vpop.permute.xlu1 %1853 }
 0x6ee   : > { %v1591_v17 = vmul.f32 0.5, %v1590_v42 }
 0x6f0   : > { %5003 = vtanh.f32 %v1591_v17  ;;  %v6741_v43 = vpop.permute.xlu1 %1723 }
 0x6f4   : > { %v6745_v10 = vpop.permute.xlu1 %1990 }
 0x6f8   : > { %v2249_v23 = vpop.permute.xlu1 %2248 }
 0x6f9   : > { %v6754_v40 = vsub.f32 %v4454_v22, %v2249_v23 }
 0x6fa   : > { %v5004_v15 = vpop.eup %5003 }
 0x6fb   : > { %v1593_v12 = vadd.f32 1.0, %v5004_v15  ;;  %v2252_v42 = vmul.f32 %v6754_v40, %v6754_v40 }
 0x6fd   : > { %v6756_v45 = vmul.f32 %v1593_v12, %v1591_v17 }
 0x6ff   : > { %v6764_v52 = vmul.f32 %v4492_v38, %v6756_v45  ;;  %v6767_v53 = vmul.f32 %v4493_v2, %v6756_v45  ;;  %v6770_v55 = vmul.f32 %v4496_v3, %v6756_v45  ;;  %v6773_v30 = vmul.f32 %v4497_v1, %v6756_v45 }
 0x700   : > { %v6779_v62 = vmul.f32 %v4500_v49, %v6756_v45 }
 0x701   : > { %v1862_v17 = vmul.f32 %v6699_v29, %v6764_v52  ;;  %v1863_v20 = vmul.f32 %v6701_v33, %v6767_v53  ;;  %v1864_v22 = vmul.f32 %v6706_v46, %v6770_v55  ;;  %v1865_v23 = vmul.f32 %v6720_v54, %v6773_v30 }
 0x702   : > { %v1729_v15 = vmul.f32 %v1703_v59, %v6779_v62  ;;  %v1866_v19 = vmul.f32 %v1840_v63, %v6779_v62  ;;  %v1726_v12 = vmul.f32 %v6712_v48, %v6767_v53  ;;  %v1728_v26 = vmul.f32 %v1696_v56, %v6773_v30 }
 0x703   : > { %v1870_v29 = vsel %vm1427_vm5, %v1862_v17, 0.0  ;;  %v1877_v38 = vsel %vm1427_vm5, %v1863_v20, 0.0  ;;  %v1884_v33 = vsel %vm1427_vm5, %v1864_v22, 0.0  ;;  %v1891_v46 = vsel %vm1427_vm5, %v1865_v23, 0.0 }
 0x704   : > { %v1761_v44 = vsel %vm1427_vm5, %v1729_v15, 0.0  ;;  %v1871_v54 = vrot.slane %v1870_v29, 4  ;;  %v1878_v2 = vrot.slane %v1877_v38, 4  ;;  %v1885_v59 = vrot.slane %v1884_v33, 4 }
 0x705   : > { %v1762_v3 = vrot.slane %v1761_v44, 4  ;;  %v1892_v63 = vrot.slane %v1891_v46, 4  ;;  %v1898_v1 = vsel %vm1427_vm5, %v1866_v19, 0.0  ;;  %v1740_v48 = vsel %vm1427_vm5, %v1726_v12, 0.0 }
 0x706   : > { %v1872_v56 = vadd.f32 %v1871_v54, %v1870_v29  ;;  %v1879_v47 = vadd.f32 %v1878_v2, %v1877_v38  ;;  %v1886_v49 = vadd.f32 %v1885_v59, %v1884_v33  ;;  %v1899_v60 = vrot.slane %v1898_v1, 4 }
 0x707   : > { %v1763_v17 = vadd.f32 %v1762_v3, %v1761_v44  ;;  %v1893_v20 = vadd.f32 %v1892_v63, %v1891_v46  ;;  %v1741_v22 = vrot.slane %v1740_v48, 4  ;;  %v1754_v23 = vsel %vm1427_vm5, %v1728_v26, 0.0  ;;  %v4456_v63 = vld [vmem:[%s6469_s19 + $0x2] ss:$0 sm:$0xff] }
 0x708   : > { %v1873_v61 = vrot.slane %v1872_v56, 2  ;;  %v1880_v15 = vrot.slane %v1879_v47, 2  ;;  %v1887_v13 = vrot.slane %v1886_v49, 2  ;;  %v1900_v50 = vadd.f32 %v1899_v60, %v1898_v1  ;;  %v2272_v1 = vpop.permute.xlu1 %2271 }
 0x709   : > { %v1764_v35 = vrot.slane %v1763_v17, 2  ;;  %v1894_v41 = vrot.slane %v1893_v20, 2  ;;  %v1742_v31 = vadd.f32 %v1741_v22, %v1740_v48  ;;  %v1755_v19 = vrot.slane %v1754_v23, 4 }
 0x70a   : > { %v1874_v39 = vadd.f32 %v1873_v61, %v1872_v56  ;;  %v1881_v12 = vadd.f32 %v1880_v15, %v1879_v47  ;;  %v1888_v29 = vadd.f32 %v1887_v13, %v1886_v49  ;;  %v1901_v38 = vrot.slane %v1900_v50, 2 }
 0x70b   : > { %v2263_v33 = vmul.f32 %v6776_v37, %v6776_v37  ;;  %v1895_v46 = vadd.f32 %v1894_v41, %v1893_v20  ;;  %v1743_v44 = vrot.slane %v1742_v31, 2  ;;  %v1756_v54 = vadd.f32 %v1755_v19, %v1754_v23 }
 0x70c   : > { %v1875_v26 = vrot.slane %v1874_v39, 1  ;;  %v1882_v2 = vrot.slane %v1881_v12, 1  ;;  %v1889_v59 = vrot.slane %v1888_v29, 1  ;;  %v1666_v3 = vmul.f32 %v4501_v7, %v6756_v45 }
 0x70d   : > { %v6809_v60 = vadd.f32 %v1764_v35, %v1763_v17  ;;  %v1896_v48 = vrot.slane %v1895_v46, 1  ;;  %v6811_v61 = vadd.f32 %v1901_v38, %v1900_v50  ;;  %v1744_v13 = vadd.f32 %v1743_v44, %v1742_v31 }
 0x70e   : > { %v1876_v56 = vadd.f32 %v1875_v26, %v1874_v39  ;;  %v1883_v47 = vadd.f32 %v1882_v2, %v1881_v12  ;;  %v1757_v49 = vrot.slane %v1756_v54, 2  ;;  %v6813_v22 = vadd.f32 %v2263_v33, %v2252_v42 }
 0x70f   : > { %v1890_v41 = vadd.f32 %v1889_v59, %v1888_v29  ;;  %v1745_v20 = vrot.slane %v1744_v13, 1  ;;  %v7589_v23 = vunpack.c.l.bf16 %v6752_v27  ;;  %v6820_v7 = vsub.f32 %v4456_v63, %v2272_v1 }
 0x710   : > { %v1934_v35 = vsel %vm1492_vm6, %v1883_v47, %v1876_v56  ;;  %v1725_v50 = vmul.f32 %v6697_v28, %v6764_v52  ;;  %v1727_v31 = vmul.f32 %v6703_v34, %v6770_v55  ;;  %v7590_v39 = vunpack.c.h.bf16 %v6752_v27 }
 0x711   : > { %v6818_v15 = vmul.f32 %v7589_v23, %v6756_v45  ;;  %v1766_v17 = vrot.slane %v6809_v60, 1  ;;  %v1897_v19 = vadd.f32 %v1896_v48, %v1895_v46  ;;  %v1903_v12 = vrot.slane %v6811_v61, 1 }
 0x712   : > { %v6830_v42 = vmul.f32 %v7590_v39, %v6756_v45  ;;  %v1730_v29 = vmul.f32 %v6730_v8, %v1666_v3  ;;  %v1758_v38 = vadd.f32 %v1757_v49, %v1756_v54  ;;  %v1733_v33 = vsel %vm1427_vm5, %v1725_v50, 0.0 }
 0x713   : > { %v1747_v28 = vsel %vm1427_vm5, %v1727_v31, 0.0  ;;  %v1867_v44 = vmul.f32 %v6728_v0, %v1666_v3  ;;  %v1935_v34 = vsel %vm1494_vm7, %v1890_v41, %v1934_v35  ;;  %v1746_v26 = vadd.f32 %v1745_v20, %v1744_v13 }
 0x714   : > { %v1734_v27 = vrot.slane %v1733_v33, 4  ;;  %v1748_v45 = vrot.slane %v1747_v28, 4  ;;  %v1768_v2 = vsel %vm1427_vm5, %v1730_v29, 0.0  ;;  %v2004_v59 = vmul.f32 %v6739_v16, %v1666_v3 }
 0x715   : > { %v1905_v46 = vsel %vm1427_vm5, %v1867_v44, 0.0  ;;  %v1999_v8 = vmul.f32 %v6718_v51, %v6764_v52  ;;  %v1769_v1 = vrot.slane %v1768_v2, 4  ;;  %v1759_v56 = vrot.slane %v1758_v38, 1 }
 0x716   : > { %v1735_v54 = vadd.f32 %v1734_v27, %v1733_v33  ;;  %v1749_v63 = vadd.f32 %v1748_v45, %v1747_v28  ;;  %v1906_v48 = vrot.slane %v1905_v46, 4  ;;  %v2042_v0 = vsel %vm1427_vm5, %v2004_v59, 0.0 }
 0x717   : > { %v2001_v13 = vmul.f32 %v6724_v57, %v6770_v55  ;;  %v2007_v47 = vsel %vm1427_vm5, %v1999_v8, 0.0  ;;  %v1770_v20 = vadd.f32 %v1769_v1, %v1768_v2  ;;  %v2043_v16 = vrot.slane %v2042_v0, 4 }
 0x718   : > { %v1736_v49 = vrot.slane %v1735_v54, 2  ;;  %v1750_v41 = vrot.slane %v1749_v63, 2  ;;  %v1907_v23 = vadd.f32 %v1906_v48, %v1905_v46  ;;  %v2008_v3 = vrot.slane %v2007_v47, 4 }
 0x719   : > { %v2021_v51 = vsel %vm1427_vm5, %v2001_v13, 0.0  ;;  %v2000_v52 = vmul.f32 %v6714_v6, %v6767_v53  ;;  %v1771_v31 = vrot.slane %v1770_v20, 2  ;;  %v2044_v29 = vadd.f32 %v2043_v16, %v2042_v0 }
 0x71a   : > { %v1737_v35 = vadd.f32 %v1736_v49, %v1735_v54  ;;  %v1751_v50 = vadd.f32 %v1750_v41, %v1749_v63  ;;  %v1908_v39 = vrot.slane %v1907_v23, 2  ;;  %v2009_v33 = vadd.f32 %v2008_v3, %v2007_v47 }
 0x71b   : > { %v2022_v57 = vrot.slane %v2021_v51, 4  ;;  %v2002_v55 = vmul.f32 %v6726_v58, %v6773_v30  ;;  %v1772_v27 = vadd.f32 %v1771_v31, %v1770_v20  ;;  %v2045_v2 = vrot.slane %v2044_v29, 2 }
 0x71c   : > { %v1738_v28 = vrot.slane %v1737_v35, 1  ;;  %v1752_v44 = vrot.slane %v1751_v50, 1  ;;  %v1909_v45 = vadd.f32 %v1908_v39, %v1907_v23  ;;  %v2010_v46 = vrot.slane %v2009_v33, 2 }
 0x71d   : > { %v2023_v59 = vadd.f32 %v2022_v57, %v2021_v51  ;;  %v2014_v8 = vsel %vm1427_vm5, %v2000_v52, 0.0  ;;  %v1936_v6 = vsel %vm1496_vm8, %v1897_v19, %v1935_v34  ;;  %v2003_v63 = vmul.f32 %v6734_v11, %v6779_v62 }
 0x71e   : > { %v1739_v53 = vadd.f32 %v1738_v28, %v1737_v35  ;;  %v1753_v54 = vadd.f32 %v1752_v44, %v1751_v50  ;;  %v1773_v1 = vrot.slane %v1772_v27, 1  ;;  %v1910_v48 = vrot.slane %v1909_v45, 1 }
 0x71f   : > { %v2011_v0 = vadd.f32 %v2010_v46, %v2009_v33  ;;  %v2015_v58 = vrot.slane %v2014_v8, 4  ;;  %v1760_v30 = vadd.f32 %v1759_v56, %v1758_v38  ;;  %v2024_v47 = vrot.slane %v2023_v59, 2 }
 0x720   : > { %v1797_v13 = vsel %vm1492_vm6, %v1746_v26, %v1739_v53  ;;  %v2028_v49 = vsel %vm1427_vm5, %v2002_v55, 0.0  ;;  %v1767_v41 = vadd.f32 %v1766_v17, %v6809_v60  ;;  %v1904_v20 = vadd.f32 %v1903_v12, %v6811_v61 }
 0x721   : > { %v1798_v19 = vsel %vm1494_vm7, %v1753_v54, %v1797_v13  ;;  %v6862_v34 = vadd.f32 %v2045_v2, %v2044_v29  ;;  %v2016_v62 = vadd.f32 %v2015_v58, %v2014_v8  ;;  %v2029_v23 = vrot.slane %v2028_v49, 4 }
 0x722   : > { %v1799_v11 = vsel %vm1496_vm8, %v1760_v30, %v1798_v19  ;;  %v2035_v16 = vsel %vm1427_vm5, %v2003_v63, 0.0  ;;  %v1937_v38 = vsel %vm1498_vm9, %v1904_v20, %v1936_v6  ;;  %v1774_v26 = vadd.f32 %v1773_v1, %v1772_v27 }
 0x723   : > { %v1911_v56 = vadd.f32 %v1910_v48, %v1909_v45  ;;  %v2012_v3 = vrot.slane %v2011_v0, 1  ;;  %v2025_v51 = vadd.f32 %v2024_v47, %v2023_v59  ;;  %v2017_v52 = vrot.slane %v2016_v62, 2 }
 0x724   : > { %v2030_v60 = vadd.f32 %v2029_v23, %v2028_v49  ;;  %v2036_v17 = vrot.slane %v2035_v16, 4  ;;  %v1800_v61 = vsel %vm1498_vm9, %v1767_v41, %v1799_v11  ;;  %v2047_v12 = vrot.slane %v6862_v34, 1 }
 0x725   : > { %v1731_v35 = vmul.f32 %v6732_v4, %v6818_v15  ;;  %v1868_v50 = vmul.f32 %v6737_v14, %v6818_v15  ;;  %v2018_v31 = vadd.f32 %v2017_v52, %v2016_v62  ;;  %v1732_v33 = vmul.f32 %v6741_v43, %v6830_v42 }
 0x726   : > { %v2031_v39 = vrot.slane %v2030_v60, 2  ;;  %v2037_v29 = vadd.f32 %v2036_v17, %v2035_v16  ;;  %v1869_v28 = vmul.f32 %v6743_v5, %v6830_v42  ;;  %v2006_v44 = vmul.f32 %v6747_v18, %v6830_v42 }
 0x727   : > { %v1775_v57 = vsel %vm1427_vm5, %v1731_v35, 0.0  ;;  %v1912_v55 = vsel %vm1427_vm5, %v1868_v50, 0.0  ;;  %v2013_v4 = vadd.f32 %v2012_v3, %v2011_v0  ;;  %v2026_v27 = vrot.slane %v2025_v51, 1 }
 0x728   : > { %v2019_v45 = vrot.slane %v2018_v31, 1  ;;  %v1776_v14 = vrot.slane %v1775_v57, 4  ;;  %v1913_v2 = vrot.slane %v1912_v55, 4  ;;  %v1782_v46 = vsel %vm1427_vm5, %v1732_v33, 0.0 }
 0x729   : > { %v1919_v59 = vsel %vm1427_vm5, %v1869_v28, 0.0  ;;  %v2056_v43 = vsel %vm1427_vm5, %v2006_v44, 0.0  ;;  %v2032_v6 = vadd.f32 %v2031_v39, %v2030_v60  ;;  %v2038_v53 = vrot.slane %v2037_v29, 2 }
 0x72a   : > { %v2020_v8 = vadd.f32 %v2019_v45, %v2018_v31  ;;  %v1777_v54 = vadd.f32 %v1776_v14, %v1775_v57  ;;  %v1914_v63 = vadd.f32 %v1913_v2, %v1912_v55  ;;  %v1783_v5 = vrot.slane %v1782_v46, 4 }
 0x72b   : > { %v1920_v1 = vrot.slane %v1919_v59, 4  ;;  %v2057_v48 = vrot.slane %v2056_v43, 4  ;;  %v1801_v18 = vsel %vm1500_vm10, %v1774_v26, %v1800_v61  ;;  %v2027_v42 = vadd.f32 %v2026_v27, %v2025_v51 }
 0x72c   : > { %v1778_v0 = vrot.slane %v1777_v54, 2  ;;  %v1938_v58 = vsel %vm1500_vm10, %v1911_v56, %v1937_v38  ;;  %v2071_v30 = vsel %vm1492_vm6, %v2020_v8, %v2013_v4  ;;  %v1915_v13 = vrot.slane %v1914_v63, 2 }
 0x72d   : > { %v1784_v47 = vadd.f32 %v1783_v5, %v1782_v46  ;;  %v1921_v49 = vadd.f32 %v1920_v1, %v1919_v59  ;;  %v2033_v41 = vrot.slane %v2032_v6, 1  ;;  %v2039_v20 = vadd.f32 %v2038_v53, %v2037_v29 }
 0x72e   : > { %v1779_v19 = vadd.f32 %v1778_v0, %v1777_v54  ;;  %v2058_v11 = vadd.f32 %v2057_v48, %v2056_v43  ;;  %v1916_v62 = vadd.f32 %v1915_v13, %v1914_v63  ;;  %v2005_v3 = vmul.f32 %v6745_v10, %v6818_v15 }
 0x72f   : > { %v1785_v23 = vrot.slane %v1784_v47, 2  ;;  %v1922_v16 = vrot.slane %v1921_v49, 2  ;;  %v2072_v26 = vsel %vm1494_vm7, %v2027_v42, %v2071_v30  ;;  %v2275_v38 = vmul.f32 %v6820_v7, %v6820_v7 }
 0x730   : > { %v1780_v51 = vrot.slane %v1779_v19, 1  ;;  %v2059_v52 = vrot.slane %v2058_v11, 2  ;;  %v1917_v56 = vrot.slane %v1916_v62, 1  ;;  %v2049_v61 = vsel %vm1427_vm5, %v2005_v3, 0.0 }
 0x731   : > { %v1786_v60 = vadd.f32 %v1785_v23, %v1784_v47  ;;  %v1923_v17 = vadd.f32 %v1922_v16, %v1921_v49  ;;  %v2034_v35 = vadd.f32 %v2033_v41, %v2032_v6  ;;  %v2040_v50 = vrot.slane %v2039_v20, 1 }
 0x732   : > { %v1781_v31 = vadd.f32 %v1780_v51, %v1779_v19  ;;  %v2050_v39 = vrot.slane %v2049_v61, 4  ;;  %v1918_v29 = vadd.f32 %v1917_v56, %v1916_v62  ;;  %v2276_v10 = vadd.f32 %v2275_v38, %v6813_v22 }
 0x733   : > { %v1787_v33 = vrot.slane %v1786_v60, 1  ;;  %v1924_v57 = vrot.slane %v1923_v17, 1  ;;  %v2073_v15 = vsel %vm1496_vm8, %v2034_v35, %v2072_v26  ;;  %v2060_v28 = vadd.f32 %v2059_v52, %v2058_v11 }
 0x734   : > { %v1802_v55 = vsel %vm1502_vm11, %v1781_v31, %v1801_v18  ;;  %v2051_v44 = vadd.f32 %v2050_v39, %v2049_v61  ;;  %v1939_v4 = vsel %vm1502_vm11, %v1918_v29, %v1938_v58  ;;  %v2277_v14 = vmax.f32 %v2276_v10, 1e-12 }
 0x735   : > { %v1788_v27 = vadd.f32 %v1787_v33, %v1786_v60  ;;  %v1925_v45 = vadd.f32 %v1924_v57, %v1923_v17  ;;  %v2041_v2 = vadd.f32 %v2040_v50, %v2039_v20  ;;  %v2358_v22 = vunpack.c.0.s8 %v6758_v9 }
 0x736   : > { %v2052_v46 = vrot.slane %v2051_v44, 2  ;;  %5005 = vrsqrt.f32 %v2277_v14  ;;  %v2048_v53 = vadd.f32 %v2047_v12, %v6862_v34  ;;  %v2061_v54 = vrot.slane %v2060_v28, 1 }
 0x737   : > { %v1803_v59 = vsel %vm1504_vm12, %v1788_v27, %v1802_v55  ;;  %v1940_v43 = vsel %vm1504_vm12, %v1925_v45, %v1939_v4  ;;  %v2074_v8 = vsel %vm1498_vm9, %v2041_v2, %v2073_v15  ;;  %v6908_v1 = vsub.s32 %v2358_v22, %v6529_v21 }
 0x738   : > { %1805 = vst.msk [vmem:[#allocation3] sm:$0xff] %vm1427_vm5, %v1803_v59  ;;  %1942 = vst.msk [vmem:[#allocation3 + $0x8] sm:$0xff] %vm1427_vm5, %v1940_v43  ;;  %v2053_v6 = vadd.f32 %v2052_v46, %v2051_v44  ;;  %v2075_v5 = vsel %vm1500_vm10, %v2048_v53, %v2074_v8  ;;  %v2062_v9 = vadd.f32 %v2061_v54, %v2060_v28  ;;  %vm2280_vm15 = vcmp.eq.f32.partialorder %v2277_v14, inf }
 0x739   : > { %v2283_v41 = vand.u32 2147483648, %v2277_v14  ;;  %vm2282_vm0 = vcmp.eq.f32.partialorder %v2277_v14, 0.0 }
 0x73a   : > { %v2054_v63 = vrot.slane %v2053_v6, 1 }
 0x73c   : > { %v2055_v48 = vadd.f32 %v2054_v63, %v2053_v6 }
 0x73e   : > { %v2076_v18 = vsel %vm1502_vm11, %v2055_v48, %v2075_v5  ;;  %v7591_v5 = vld [vmem:[#allocation61_spill] sm:$0xff]  ;;  %v7592_v48 = vld [vmem:[#allocation59_spill] sm:$0xff] }
 0x73f   : > { %v2077_v42 = vsel %vm1504_vm12, %v2062_v9, %v2076_v18  ;;  %v2080_v0 = vld [vmem:[#allocation3] sm:$0xff]  ;;  %v2081_v58 = vld [vmem:[#allocation3 + $0x8] sm:$0xff] }
 0x740   : > { %2079 = vst.msk [vmem:[#allocation3 + $0x10] sm:$0xff] %vm1427_vm5, %v2077_v42  ;;  %v2083_v30 = vpack.c.bf16 %v2081_v58, %v2080_v0  ;;  %v2362_v34 = vrot.slane %v2080_v0, %v6908_v1  ;;  %v2525_v12 = vrot.slane %v2081_v58, %v6908_v1  ;;  %v2355_v13 = vcombine.high %v2080_v0, %v2080_v0  ;;  %v5006_v47 = vpop.eup %5005  ;;  %v7593_v42 = vld [vmem:[#allocation62_spill] sm:$0xff] }
 0x741   : > { %v2518_v49 = vcombine.high %v2081_v58, %v2081_v58  ;;  %v2279_v21 = vmul.f32 %v5006_v47, %v2277_v14  ;;  %v7594_v58 = vld [vmem:[#allocation60_spill] sm:$0xff] }
 0x742   : > { %4630 = vmatprep.mubr.msk.bf16.mxu1 %vm1427_vm5, %v2083_v30  ;;  %4638 = vmatprep.mubr.msk.bf16.mxu0 %vm1427_vm5, %v2083_v30  ;;  %v2370_v20 = vcombine.high %v2362_v34, %v2362_v34  ;;  %v6918_v19 = vrot.slane %v2362_v34, %v6908_v1  ;;  %v2533_v11 = vcombine.high %v2525_v12, %v2525_v12 }
 0x743   : > { %v6921_v62 = vrot.slane %v2525_v12, %v6908_v1  ;;  %v2369_v23 = vrot.slane %v2355_v13, %v6908_v1  ;;  %v2281_v16 = vsel %vm2280_vm15, %v2277_v14, %v2279_v21  ;;  %v2532_v26 = vrot.slane %v2518_v49, %v6908_v1  ;;  %v4948_v49 = vld [vmem:[#allocation28 + $0x10] sm:$0xff]   ;;  %v4949_v21 = vld [vmem:[#allocation28 + $0x18] sm:$0xff]  }
 0x744   : > { %v6925_v3 = vrot.slane %v2370_v20, %v6908_v1  ;;  %v2284_v51 = vsel %vm2282_vm0, %v2283_v41, %v2281_v16  ;;  %v6929_v52 = vrot.slane %v2533_v11, %v6908_v1  ;;  %4642 = vmatprep.subr.bf16.mxu1 %v4948_v49  ;;  %v6986_v41 = vpop.permute.xlu1 %2309  ;;  %v6988_v20 = vpop.permute.xlu0 %2299 }
 0x745   : > { %5007 = vrcp.f32 %v2284_v51  ;;  %v2371_v17 = vcombine.high %v2369_v23, %v2369_v23  ;;  %v6933_v61 = vrot.slane %v2369_v23, %v6908_v1  ;;  %v2534_v39 = vcombine.high %v2532_v26, %v2532_v26  ;;  %v6998_v51 = vld [vmem:[#allocation28] sm:$0xff]  }
 0x746   : > { %v6944_v29 = vrot.slane %v2532_v26, %v6908_v1 }
 0x747   : > { %v2082_v38 = vld [vmem:[#allocation3 + $0x10] sm:$0xff]  ;;  %v6941_v31 = vrot.slane %v2371_v17, %v6908_v1  ;;  %v6950_v57 = vrot.slane %v2534_v39, %v6908_v1  ;;  %v2463_v39 = vrot.slane %v6918_v19, %v6532_v24 }
 0x748   : > { %v2084_v56 = vpack.c.bf16 %v2082_v38, %v2082_v38  ;;  %v2688_v60 = vrot.slane %v2082_v38, %v6908_v1  ;;  %v2681_v15 = vcombine.high %v2082_v38, %v2082_v38  ;;  %v6990_v11 = vpop.permute.xlu1 %2323  ;;  %v6992_v23 = vpop.permute.xlu0 %2316 }
 0x74a   : > { %4631 = vmatmul.mubr.msk.bf16.vlgmr.msra.gmra.mrb[4].mxu1 %vm1427_vm5, %v2084_v56  ;;  %4639 = vmatmul.mubr.msk.bf16.vlgmr.msra.gmra.mrb[8].mxu0 %vm1427_vm5, %v2084_v56  ;;  %v2696_v35 = vcombine.high %v2688_v60, %v2688_v60  ;;  %v6938_v50 = vrot.slane %v2688_v60, %v6908_v1  ;;  %v2695_v28 = vrot.slane %v2681_v15, %v6908_v1 }
 0x74b   : > { %4643 = vmatpush3.bf16.msra.mxu1 %v4948_v49  ;;  %v2626_v15 = vrot.slane %v6921_v62, %v6532_v24 }
 0x74c   : > { %v6947_v33 = vrot.slane %v2696_v35, %v6908_v1  ;;  %v2697_v2 = vcombine.high %v2695_v28, %v2695_v28  ;;  %v6960_v46 = vrot.slane %v2695_v28, %v6908_v1  ;;  %4644 = vmatprep.subr.bf16.mxu1 %v4949_v21  ;;  %v6994_v16 = vpop.permute.xlu1 %2337  ;;  %v6996_v26 = vpop.permute.xlu0 %2330  ;;  %v2467_v35 = vrot.slane %v6925_v3, %v6532_v24 }
 0x74e   : > { %v6965_v43 = vrot.slane %v2697_v2, %v6908_v1  ;;  %v2400_v2 = vcombine.high %v6918_v19, %v6918_v19 }
 0x74f   : > { %v5008_v10 = vpop.eup %5007  ;;  %4645 = vmatpush3.bf16.msra.mxu1 %v4949_v21 }
 0x750   : > { %v2287_v55 = vmul.f32 %v5008_v10, %v6754_v40  ;;  %v2288_v27 = vmul.f32 %v5008_v10, %v6776_v37  ;;  %v2289_v37 = vmul.f32 %v5008_v10, %v6820_v7  ;;  %4654 = vmatprep.subr.bf16.mxu1 %v6998_v51  ;;  %v7001_v38 = vpop.permute.xlu1 %2351  ;;  %v7003_v56 = vpop.permute.xlu0 %2344  ;;  %v2630_v10 = vrot.slane %v6929_v52, %v6532_v24 }
 0x752   : > { %v2414_v44 = vrot.slane %v2287_v55, %v6543_v32  ;;  %v2407_v4 = vrot.slane %v2287_v55, %v6532_v24  ;;  %v2577_v45 = vrot.slane %v2288_v27, %v6543_v32  ;;  %v2570_v14 = vrot.slane %v2288_v27, %v6532_v24 }
 0x753   : > { %v2428_v40 = vrot.slane %v2287_v55, %v6551_v36  ;;  %v2421_v59 = vrot.slane %v2287_v55, %v6535_v25  ;;  %v2591_v22 = vrot.slane %v2288_v27, %v6551_v36  ;;  %v2584_v8 = vrot.slane %v2288_v27, %v6535_v25 }
 0x754   : > { %2416 = vbcast.lane.b32.xlu1 %v2414_v44, 256  ;;  %2409 = vbcast.lane.b32.xlu0 %v2407_v4, 256  ;;  %v2740_v6 = vrot.slane %v2289_v37, %v6543_v32  ;;  %v2733_v53 = vrot.slane %v2289_v37, %v6532_v24  ;;  %v2754_v54 = vrot.slane %v2289_v37, %v6551_v36 }
 0x755   : > { %v2747_v63 = vrot.slane %v2289_v37, %v6535_v25  ;;  %v2442_v7 = vrot.slane %v2287_v55, %v7591_v5  ;;  %v2435_v9 = vrot.slane %v2287_v55, %v7592_v48  ;;  %v2605_v18 = vrot.slane %v2288_v27, %v7591_v5 }
 0x756   : > { %v2598_v32 = vrot.slane %v2288_v27, %v7592_v48  ;;  %v2456_v0 = vrot.slane %v2287_v55, %v7593_v42  ;;  %v2449_v36 = vrot.slane %v2287_v55, %v7594_v58  ;;  %v2619_v25 = vrot.slane %v2288_v27, %v7593_v42 }
 0x757   : > { %v2612_v30 = vrot.slane %v2288_v27, %v7594_v58  ;;  %v2768_v34 = vrot.slane %v2289_v37, %v7591_v5  ;;  %v2761_v12 = vrot.slane %v2289_v37, %v7592_v48  ;;  %v2782_v13 = vrot.slane %v2289_v37, %v7593_v42 }
 0x758   : > { %2579 = vbcast.lane.b32.xlu1 %v2577_v45, 256  ;;  %2572 = vbcast.lane.b32.xlu0 %v2570_v14, 256  ;;  %v2775_v47 = vrot.slane %v2289_v37, %v7594_v58  ;;  %v2402_v14 = vcombine.high %v6925_v3, %v6925_v3  ;;  %v2565_v37 = vcombine.high %v6929_v52, %v6929_v52 }
 0x759   : > { %v2789_v52 = vrot.slane %v6938_v50, %v6532_v24  ;;  %v2728_v58 = vcombine.high %v6947_v33, %v6947_v33 }
 0x75c   : > { %2430 = vbcast.lane.b32.xlu1 %v2428_v40, 256  ;;  %2423 = vbcast.lane.b32.xlu0 %v2421_v59, 256 }
 0x760   : > { %2593 = vbcast.lane.b32.xlu1 %v2591_v22, 256  ;;  %2586 = vbcast.lane.b32.xlu0 %v2584_v8, 256  ;;  %v2563_v22 = vcombine.high %v6921_v62, %v6921_v62  ;;  %v2726_v62 = vcombine.high %v6938_v50, %v6938_v50  ;;  %v2801_v50 = vrot.slane %v2728_v58, %v6532_v24 }
 0x762   : > { %v2634_v3 = vrot.slane %v2563_v22, %v6532_v24  ;;  %v2797_v21 = vrot.slane %v2726_v62, %v6532_v24  ;;  %v2646_v22 = vrot.slane %v6950_v57, %v6532_v24 }
 0x764   : > { %2742 = vbcast.lane.b32.xlu1 %v2740_v6, 256  ;;  %2735 = vbcast.lane.b32.xlu0 %v2733_v53, 256  ;;  %v2475_v53 = vrot.slane %v2402_v14, %v6532_v24 }
 0x768   : > { %2756 = vbcast.lane.b32.xlu1 %v2754_v54, 256  ;;  %2749 = vbcast.lane.b32.xlu0 %v2747_v63, 256  ;;  %v2471_v54 = vrot.slane %v2400_v2, %v6532_v24  ;;  %v2638_v63 = vrot.slane %v2565_v37, %v6532_v24  ;;  %v2483_v37 = vrot.slane %v6941_v31, %v6532_v24 }
 0x76c   : > { %2444 = vbcast.lane.b32.xlu1 %v2442_v7, 256  ;;  %2437 = vbcast.lane.b32.xlu0 %v2435_v9, 256 }
 0x770   : > { %2607 = vbcast.lane.b32.xlu1 %v2605_v18, 256  ;;  %2600 = vbcast.lane.b32.xlu0 %v2598_v32, 256 }
 0x774   : > { %2458 = vbcast.lane.b32.xlu1 %v2456_v0, 256  ;;  %2451 = vbcast.lane.b32.xlu0 %v2449_v36, 256  ;;  %v2793_v0 = vrot.slane %v6947_v33, %v6532_v24 }
 0x778   : > { %2621 = vbcast.lane.b32.xlu1 %v2619_v25, 256  ;;  %2614 = vbcast.lane.b32.xlu0 %v2612_v30, 256  ;;  %v2843_v30 = vunpack.c.l.bf16 %v6986_v41 }
 0x77c   : > { %2770 = vbcast.lane.b32.xlu1 %v2768_v34, 256  ;;  %2763 = vbcast.lane.b32.xlu0 %v2761_v12, 256  ;;  %v2842_v34 = vunpack.c.l.bf16 %v6988_v20 }
 0x780   : > { %2784 = vbcast.lane.b32.xlu1 %v2782_v13, 256  ;;  %2777 = vbcast.lane.b32.xlu0 %v2775_v47, 256 }
 0x7c6   : > { %v2417_v60 = vpop.permute.xlu1 %2416  ;;  %v2410_v17 = vpop.permute.xlu0 %2409 }
 0x7c7   : > { %v2501_v44 = vmul.f32 %v2467_v35, %v2417_v60  ;;  %v2500_v4 = vmul.f32 %v2463_v39, %v2410_v17  ;;  %v2845_v60 = vunpack.c.l.bf16 %v6990_v11  ;;  %v2844_v17 = vunpack.c.l.bf16 %v6992_v23 }
 0x7ca   : > { %v2580_v55 = vpop.permute.xlu1 %2579  ;;  %v2573_v28 = vpop.permute.xlu0 %2572 }
 0x7cb   : > { %v2664_v27 = vmul.f32 %v2630_v10, %v2580_v55  ;;  %v2663_v45 = vmul.f32 %v2626_v15, %v2573_v28 }
 0x7cd   : > { %v2672_v40 = vadd.f32 %v2664_v27, %v2501_v44  ;;  %v2671_v59 = vadd.f32 %v2663_v45, %v2500_v4 }
 0x7ce   : > { %v2431_v8 = vpop.permute.xlu1 %2430  ;;  %v2424_v6 = vpop.permute.xlu0 %2423 }
 0x7cf   : > { %v2503_v7 = vmul.f32 %v2475_v53, %v2431_v8  ;;  %v2502_v48 = vmul.f32 %v2471_v54, %v2424_v6  ;;  %v2642_v8 = vrot.slane %v6944_v29, %v6532_v24 }
 0x7d2   : > { %v2594_v5 = vpop.permute.xlu1 %2593  ;;  %v2587_v19 = vpop.permute.xlu0 %2586 }
 0x7d3   : > { %v2666_v9 = vmul.f32 %v2638_v63, %v2594_v5  ;;  %v2665_v18 = vmul.f32 %v2634_v3, %v2587_v19  ;;  %v2403_v19 = vcombine.high %v6941_v31, %v6941_v31 }
 0x7d5   : > { %v2674_v32 = vadd.f32 %v2666_v9, %v2503_v7  ;;  %v2673_v42 = vadd.f32 %v2665_v18, %v2502_v48  ;;  %v2401_v7 = vcombine.high %v6933_v61, %v6933_v61  ;;  %v2566_v18 = vcombine.high %v6950_v57, %v6950_v57 }
 0x7d6   : > { %v2743_v36 = vpop.permute.xlu1 %2742  ;;  %v2736_v25 = vpop.permute.xlu0 %2735  ;;  %v2805_v57 = vrot.slane %v6960_v46, %v6532_v24 }
 0x7d7   : > { %v2827_v12 = vmul.f32 %v2793_v0, %v2743_v36  ;;  %v2826_v13 = vmul.f32 %v2789_v52, %v2736_v25  ;;  %v2564_v52 = vcombine.high %v6944_v29, %v6944_v29  ;;  %v2487_v0 = vrot.slane %v2401_v7, %v6532_v24 }
 0x7d8   : > { %v2654_v58 = vrot.slane %v2566_v18, %v6532_v24  ;;  %v2727_v29 = vcombine.high %v6960_v46, %v6960_v46 }
 0x7d9   : > { %v2835_v47 = vadd.f32 %v2827_v12, %v2672_v40  ;;  %v2834_v49 = vadd.f32 %v2826_v13, %v2671_v59  ;;  %v2479_v40 = vrot.slane %v6933_v61, %v6532_v24  ;;  %v2650_v31 = vrot.slane %v2564_v52, %v6532_v24 }
 0x7da   : > { %v2757_v35 = vpop.permute.xlu1 %2756  ;;  %v2750_v33 = vpop.permute.xlu0 %2749 }
 0x7db   : > { %v7041_v39 = vmul.f32 %v2843_v30, %v2835_v47  ;;  %v7045_v10 = vmul.f32 %v2842_v34, %v2834_v49  ;;  %v2829_v15 = vmul.f32 %v2801_v50, %v2757_v35  ;;  %v2828_v55 = vmul.f32 %v2797_v21, %v2750_v33 }
 0x7dc   : > { %v2809_v21 = vrot.slane %v6965_v43, %v6532_v24  ;;  %v2729_v35 = vcombine.high %v6965_v43, %v6965_v43 }
 0x7dd   : > { %v2858_v28 = vpack.c.bf16 %v7041_v39, %v7045_v10  ;;  %v2837_v44 = vadd.f32 %v2829_v15, %v2674_v32  ;;  %v2836_v4 = vadd.f32 %v2828_v55, %v2673_v42  ;;  %v2491_v42 = vrot.slane %v2403_v19, %v6532_v24  ;;  %v4957_v39 = vld [vmem:[#allocation31 + $0x10] sm:$0xff]   ;;  %v4958_v10 = vld [vmem:[#allocation31 + $0x18] sm:$0xff]  }
 0x7de   : > { %v2445_v27 = vpop.permute.xlu1 %2444  ;;  %v2438_v45 = vpop.permute.xlu0 %2437  ;;  %v2847_v55 = vunpack.c.l.bf16 %v6994_v16  ;;  %v2817_v46 = vrot.slane %v2729_v35, %v6532_v24 }
 0x7df   : > { %v7051_v14 = vmul.f32 %v2845_v60, %v2837_v44  ;;  %v7055_v2 = vmul.f32 %v2844_v17, %v2836_v4  ;;  %v2505_v54 = vmul.f32 %v2483_v37, %v2445_v27  ;;  %v2504_v63 = vmul.f32 %v2479_v40, %v2438_v45 }
 0x7e0   : > { %v2846_v44 = vunpack.c.l.bf16 %v6996_v26  ;;  %v2813_v37 = vrot.slane %v2727_v29, %v6532_v24 }
 0x7e1   : > { %v2859_v59 = vpack.c.bf16 %v7051_v14, %v7055_v2 }
 0x7e2   : > { %v2608_v6 = vpop.permute.xlu1 %2607  ;;  %v2601_v53 = vpop.permute.xlu0 %2600 }
 0x7e3   : > { %v2668_v3 = vmul.f32 %v2646_v22, %v2608_v6  ;;  %v2667_v5 = vmul.f32 %v2642_v8, %v2601_v53  ;;  %v2849_v22 = vunpack.c.l.bf16 %v7001_v38  ;;  %v2848_v8 = vunpack.c.l.bf16 %v7003_v56  ;;  %v4955_v38 = vld [vmem:[#allocation31] sm:$0xff]   ;;  %v4956_v56 = vld [vmem:[#allocation31 + $0x8] sm:$0xff]  }
 0x7e4   : > { %4666 = vmatprep.subr.bf16.mxu0 %v4955_v38 }
 0x7e5   : > { %v2676_v48 = vadd.f32 %v2668_v3, %v2505_v54  ;;  %v2675_v9 = vadd.f32 %v2667_v5, %v2504_v63  ;;  %4667 = vmatpush3.bf16.msra.mxu0 %v4955_v38 }
 0x7e6   : > { %v2459_v62 = vpop.permute.xlu1 %2458  ;;  %v2452_v32 = vpop.permute.xlu0 %2451  ;;  %4668 = vmatprep.subr.bf16.mxu0 %v4956_v56 }
 0x7e7   : > { %v2507_v25 = vmul.f32 %v2491_v42, %v2459_v62  ;;  %v2506_v12 = vmul.f32 %v2487_v0, %v2452_v32 }
 0x7e9   : > { %4669 = vmatpush3.bf16.msra.mxu0 %v4956_v56 }
 0x7ea   : > { %v2622_v36 = vpop.permute.xlu1 %2621  ;;  %v2615_v61 = vpop.permute.xlu0 %2614  ;;  %4670 = vmatprep.subr.bf16.mxu0 %v4957_v39 }
 0x7eb   : > { %v2670_v13 = vmul.f32 %v2654_v58, %v2622_v36  ;;  %v2669_v47 = vmul.f32 %v2650_v31, %v2615_v61 }
 0x7ed   : > { %v2678_v49 = vadd.f32 %v2670_v13, %v2507_v25  ;;  %v2677_v50 = vadd.f32 %v2669_v47, %v2506_v12  ;;  %4671 = vmatpush3.bf16.msra.mxu0 %v4957_v39 }
 0x7ee   : > { %v2771_v33 = vpop.permute.xlu1 %2770  ;;  %v2764_v15 = vpop.permute.xlu0 %2763  ;;  %4672 = vmatprep.subr.bf16.mxu0 %v4958_v10 }
 0x7ef   : > { %v2831_v4 = vmul.f32 %v2809_v21, %v2771_v33  ;;  %v2830_v27 = vmul.f32 %v2805_v57, %v2764_v15 }
 0x7f1   : > { %v2839_v45 = vadd.f32 %v2831_v4, %v2676_v48  ;;  %v2838_v40 = vadd.f32 %v2830_v27, %v2675_v9  ;;  %4673 = vmatpush3.bf16.msra.mxu0 %v4958_v10 }
 0x7f2   : > { %v2785_v6 = vpop.permute.xlu1 %2784  ;;  %v2778_v43 = vpop.permute.xlu0 %2777 }
 0x7f3   : > { %v7095_v53 = vmul.f32 %v2847_v55, %v2839_v45  ;;  %v7099_v54 = vmul.f32 %v2846_v44, %v2838_v40  ;;  %v2833_v63 = vmul.f32 %v2817_v46, %v2785_v6  ;;  %v2832_v3 = vmul.f32 %v2813_v37, %v2778_v43 }
 0x7f5   : > { %v2860_v5 = vpack.c.bf16 %v7095_v53, %v7099_v54  ;;  %v2841_v19 = vadd.f32 %v2833_v63, %v2678_v49  ;;  %v2840_v7 = vadd.f32 %v2832_v3, %v2677_v50 }
 0x7f7   : > { %v7105_v48 = vmul.f32 %v2849_v22, %v2841_v19  ;;  %v7109_v9 = vmul.f32 %v2848_v8, %v2840_v7 }
 0x7f9   : > { %v2861_v18 = vpack.c.bf16 %v7105_v48, %v7109_v9 }
 0x81d   : > { %v7113_v52 = vpop.f32.mrb[4].mxu1  ;;  %v4640_v62 = vpop.f32.mrb[8].mxu0 }
 0x81e   : > { %2221 = vst.msk [vmem:[#allocation4 + $0x10] sm:$0xff] %vm1427_vm5, %v4640_v62  ;;  %v7116_v32 = vpop.f32.mrb[5].mxu1  ;;  %v2205_v42 = vpop.f32.mrb[9].mxu0 }
 0x81f   : > { %2219 = vst.msk [vmem:[#allocation4] sm:$0xff] %vm1427_vm5, %v2205_v42  ;;  %v4633_v0 = vpop.f32.mrb[6].mxu1  ;;  %v4641_v58 = vpop.f32.mrb[10].mxu0 }
 0x820   : > { %v7119_v31 = vpop.f32.mrb[7].mxu1  ;;  %v2208_v36 = vpop.f32.mrb[11].mxu0 }
 0x821   : > { %2220 = vst.msk [vmem:[#allocation4 + $0x8] sm:$0xff] %vm1427_vm5, %v2208_v36 }
 0x825   : > { %v3076_v61 = vld [vmem:[#allocation4 + $0x10] sm:$0xff] }
 0x826   : > { %v2862_v25 = vld [vmem:[#allocation4] sm:$0xff]  ;;  %v3085_v12 = vrot.slane %v3076_v61, %v6908_v1  ;;  %v3078_v13 = vcombine.high %v3076_v61, %v3076_v61 }
 0x827   : > { %v2871_v47 = vrot.slane %v2862_v25, %v6908_v1  ;;  %v2864_v57 = vcombine.high %v2862_v25, %v2862_v25 }
 0x828   : > { %v2969_v29 = vld [vmem:[#allocation4 + $0x8] sm:$0xff]  ;;  %v3093_v49 = vcombine.high %v3085_v12, %v3085_v12  ;;  %v3101_v50 = vrot.slane %v3085_v12, %v6908_v1  ;;  %v7126_v21 = vrot.slane %v3078_v13, %v6908_v1 }
 0x829   : > { %v2879_v35 = vcombine.high %v2871_v47, %v2871_v47  ;;  %v2887_v33 = vrot.slane %v2871_v47, %v6908_v1  ;;  %v2978_v15 = vrot.slane %v2969_v29, %v6908_v1  ;;  %v2878_v4 = vrot.slane %v2864_v57, %v6908_v1 }
 0x82a   : > { %v3115_v27 = vrot.slane %v3093_v49, %v6908_v1  ;;  %v3123_v45 = vcombine.high %v3101_v50, %v3101_v50  ;;  %v3130_v40 = vrot.slane %v3101_v50, %v6532_v24  ;;  %v2971_v46 = vcombine.high %v2969_v29, %v2969_v29 }
 0x82b   : > { %v2901_v37 = vrot.slane %v2879_v35, %v6908_v1  ;;  %v2909_v6 = vcombine.high %v2887_v33, %v2887_v33  ;;  %v2916_v43 = vrot.slane %v2887_v33, %v6532_v24  ;;  %v2986_v63 = vcombine.high %v2978_v15, %v2978_v15 }
 0x82c   : > { %v2994_v3 = vrot.slane %v2978_v15, %v6908_v1  ;;  %v3125_v19 = vcombine.high %v3115_v27, %v3115_v27  ;;  %v3134_v7 = vrot.slane %v3115_v27, %v6532_v24  ;;  %v3167_v62 = vmul.f32 %v7113_v52, %v3130_v40 }
 0x82d   : > { %v2911_v42 = vcombine.high %v2901_v37, %v2901_v37  ;;  %v2920_v0 = vrot.slane %v2901_v37, %v6532_v24  ;;  %v2953_v58 = vmul.f32 %v2916_v43, %v7116_v32  ;;  %v3008_v36 = vrot.slane %v2986_v63, %v6908_v1 }
 0x82e   : > { %v3016_v61 = vcombine.high %v2994_v3, %v2994_v3  ;;  %v3023_v25 = vrot.slane %v2994_v3, %v6532_v24  ;;  %v3168_v12 = vmul.f32 %v7113_v52, %v3134_v7  ;;  %v2924_v13 = vrot.slane %v2909_v6, %v6532_v24 }
 0x82f   : > { %v2954_v47 = vmul.f32 %v2920_v0, %v7116_v32  ;;  %v3018_v57 = vcombine.high %v3008_v36, %v3008_v36  ;;  %v3027_v29 = vrot.slane %v3008_v36, %v6532_v24  ;;  %v2928_v49 = vrot.slane %v2911_v42, %v6532_v24 }
 0x830   : > { %v3060_v50 = vmul.f32 %v3023_v25, %v7119_v31  ;;  %v2955_v35 = vmul.f32 %v2924_v13, %v7116_v32  ;;  %v3031_v33 = vrot.slane %v3016_v61, %v6532_v24  ;;  %v3138_v15 = vrot.slane %v3123_v45, %v6532_v24 }
 0x831   : > { %v3061_v27 = vmul.f32 %v3027_v29, %v7119_v31  ;;  %v2956_v40 = vmul.f32 %v2928_v49, %v7116_v32  ;;  %v3035_v37 = vrot.slane %v3018_v57, %v6532_v24  ;;  %v3142_v6 = vrot.slane %v3125_v19, %v6532_v24 }
 0x832   : > { %v3068_v43 = vadd.f32 %v3060_v50, %v2953_v58  ;;  %v3062_v63 = vmul.f32 %v3031_v33, %v7119_v31  ;;  %v3169_v3 = vmul.f32 %v7113_v52, %v3138_v15  ;;  %v2880_v7 = vcombine.high %v2878_v4, %v2878_v4 }
 0x833   : > { %v3069_v42 = vadd.f32 %v3061_v27, %v2954_v47  ;;  %v3063_v0 = vmul.f32 %v3035_v37, %v7119_v31  ;;  %v3170_v36 = vmul.f32 %v7113_v52, %v3142_v6  ;;  %v2894_v45 = vrot.slane %v2878_v4, %v6908_v1 }
 0x834   : > { %v3175_v61 = vadd.f32 %v3167_v62, %v3068_v43  ;;  %v3070_v25 = vadd.f32 %v3062_v63, %v2955_v35  ;;  %v2908_v13 = vrot.slane %v2880_v7, %v6908_v1  ;;  %v2985_v57 = vrot.slane %v2971_v46, %v6908_v1  ;;  %v4954_v7 = vld [vmem:[#allocation28 + $0x8] sm:$0xff]  }
 0x835   : > { %v3176_v19 = vadd.f32 %v3168_v12, %v3069_v42  ;;  %v3071_v58 = vadd.f32 %v3063_v0, %v2956_v40  ;;  %v2932_v29 = vrot.slane %v2894_v45, %v6532_v24  ;;  %v3094_v49 = vcombine.high %v7126_v21, %v7126_v21 }
 0x836   : > { %v3183_v47 = vmul.f32 %v3175_v61, %v2842_v34  ;;  %v3177_v50 = vadd.f32 %v3169_v3, %v3070_v25  ;;  %v2936_v33 = vrot.slane %v2908_v13, %v6532_v24  ;;  %v2987_v4 = vcombine.high %v2985_v57, %v2985_v57 }
 0x837   : > { %v3184_v62 = vmul.f32 %v3176_v19, %v2843_v30  ;;  %v3178_v35 = vadd.f32 %v3170_v36, %v3071_v58  ;;  %v2957_v46 = vmul.f32 %v2932_v29, %v7116_v32  ;;  %v3001_v12 = vrot.slane %v2985_v57, %v6908_v1 }
 0x838   : > { %v3185_v15 = vmul.f32 %v3177_v50, %v2844_v17  ;;  %v2958_v27 = vmul.f32 %v2936_v33, %v7116_v32  ;;  %v3015_v20 = vrot.slane %v2987_v4, %v6908_v1  ;;  %v3108_v34 = vrot.slane %v7126_v21, %v6908_v1 }
 0x839   : > { %v3191_v40 = vpack.c.bf16 %v3184_v62, %v3183_v47  ;;  %v3186_v41 = vmul.f32 %v3178_v35, %v2845_v60  ;;  %v3039_v30 = vrot.slane %v3001_v12, %v6532_v24  ;;  %v3122_v37 = vrot.slane %v3094_v49, %v6908_v1 }
 0x83a   : > { %v3043_v6 = vrot.slane %v3015_v20, %v6532_v24  ;;  %v3146_v23 = vrot.slane %v3108_v34, %v6532_v24  ;;  %v2910_v17 = vcombine.high %v2894_v45, %v2894_v45  ;;  %v2912_v43 = vcombine.high %v2908_v13, %v2908_v13 }
 0x83b   : > { %4646 = vmatprep.mubr.msk.bf16.mxu1 %vm1427_vm5, %v3191_v40  ;;  %v3192_v63 = vpack.c.bf16 %v3186_v41, %v3185_v15  ;;  %v3064_v3 = vmul.f32 %v3039_v30, %v7119_v31  ;;  %v3150_v21 = vrot.slane %v3122_v37, %v6532_v24  ;;  %v3017_v11 = vcombine.high %v3001_v12, %v3001_v12 }
 0x83c   : > { %v3065_v60 = vmul.f32 %v3043_v6, %v7119_v31  ;;  %v3171_v42 = vmul.f32 %v7113_v52, %v3146_v23  ;;  %v2940_v1 = vrot.slane %v2910_v17, %v6532_v24  ;;  %v2944_v0 = vrot.slane %v2912_v43, %v6532_v24 }
 0x83d   : > { %4647 = vmatmul.mubr.msk.bf16.vlgmr.msra.gmra.mrb[8].mxu1 %vm1427_vm5, %v3192_v63  ;;  %v3072_v36 = vadd.f32 %v3064_v3, %v2957_v46  ;;  %v3172_v45 = vmul.f32 %v7113_v52, %v3150_v21  ;;  %v3019_v61 = vcombine.high %v3015_v20, %v3015_v20  ;;  %v3047_v25 = vrot.slane %v3017_v11, %v6532_v24 }
 0x83e   : > { %4655 = vmatpush3.bf16.msra.mxu1 %v6998_v51  ;;  %v3073_v13 = vadd.f32 %v3065_v60, %v2958_v27  ;;  %v2959_v57 = vmul.f32 %v2940_v1, %v7116_v32  ;;  %v2960_v19 = vmul.f32 %v2944_v0, %v7116_v32  ;;  %v3124_v58 = vcombine.high %v3108_v34, %v3108_v34 }
 0x83f   : > { %v3179_v29 = vadd.f32 %v3171_v42, %v3072_v36  ;;  %4656 = vmatprep.subr.bf16.mxu1 %v4954_v7  ;;  %v3051_v49 = vrot.slane %v3019_v61, %v6532_v24  ;;  %v3066_v47 = vmul.f32 %v3047_v25, %v7119_v31  ;;  %v3126_v50 = vcombine.high %v3122_v37, %v3122_v37 }
 0x840   : > { %v3180_v33 = vadd.f32 %v3172_v45, %v3073_v13  ;;  %v3154_v4 = vrot.slane %v3124_v58, %v6532_v24  ;;  %v7595_v20 = vmov 0.0  }
 0x841   : > { %v3067_v62 = vmul.f32 %v3051_v49, %v7119_v31  ;;  %v3074_v35 = vadd.f32 %v3066_v47, %v2959_v57  ;;  %v3158_v51 = vrot.slane %v3126_v50, %v6532_v24  ;;  %v3187_v46 = vmul.f32 %v3179_v29, %v2846_v44  ;;  %4682 = vmatprep.subr.bf16.mxu0 %v7595_v20  ;;  %v4959_v49 = vld [vmem:[#allocation34] sm:$0xff]  }
 0x842   : > { %v3188_v32 = vmul.f32 %v3180_v33, %v2847_v55  ;;  %v3173_v12 = vmul.f32 %v7113_v52, %v3154_v4  ;;  %4657 = vmatpush3.bf16.msra.mxu1 %v4954_v7 }
 0x843   : > { %v3075_v15 = vadd.f32 %v3067_v62, %v2960_v19  ;;  %v3174_v27 = vmul.f32 %v7113_v52, %v3158_v51  ;;  %4690 = vmatprep.subr.bf16.mxu1 %v7595_v20 }
 0x844   : > { %v3193_v34 = vpack.c.bf16 %v3188_v32, %v3187_v46  ;;  %v3181_v40 = vadd.f32 %v3173_v12, %v3074_v35  ;;  %v4960_v46 = vld [vmem:[#allocation34 + $0x8] sm:$0xff]  }
 0x845   : > { %v3182_v31 = vadd.f32 %v3174_v27, %v3075_v15 }
 0x846   : > { %4650 = vmatprep.mubr.msk.bf16.mxu1 %vm1427_vm5, %v3193_v34  ;;  %v3189_v24 = vmul.f32 %v3181_v40, %v2848_v8 }
 0x847   : > { %v3190_v16 = vmul.f32 %v3182_v31, %v2849_v22  ;;  %v7241_v31 = vld [vmem:[#allocation5] sm:$0xff] }
 0x849   : > { %v3194_v26 = vpack.c.bf16 %v3190_v16, %v3189_v24  ;;  %v3604_v24 = vpack.c.bf16 %v7241_v31, %v7241_v31  ;;  %v4470_v16 = vld [vmem:[#allocation33] ss:$0 sm:$0xff] }
 0x84b   : > { %4651 = vmatmul.mubr.msk.bf16.gmra.mrb[12].mxu1 %vm1427_vm5, %v3194_v26 }
 0x84c   : > { %4658 = vmatprep.mubr.msk.bf16.mxu1 %vm1427_vm5, %v2858_v28  ;;  %v4469_v28 = vld [vmem:[#allocation30] ss:$0 sm:$0xff] }
 0x853   : > { %4659 = vmatmul.mubr.msk.bf16.vlgmr.msra.gmra.mrb[8].mxu1 %vm1427_vm5, %v2859_v59 }
 0x854   : > { %4662 = vmatprep.mubr.msk.bf16.mxu1 %vm1427_vm5, %v2860_v5 }
 0x85b   : > { %4663 = vmatmul.mubr.msk.bf16.gmra.mrb[12].mxu1 %vm1427_vm5, %v2861_v18 }
 0x85c   : > { %4694 = vmatprep.mubr.msk.bf16.mxu1 %vm5762_vm3, %v7595_v20 }
 0x926   : > { %v4660_v14 = vpop.f32.mrb[8].mxu1 }
 0x927   : > { %v3381_v2 = vadd.f32 %v4660_v14, %v4469_v28  ;;  %v3342_v59 = vpop.f32.mrb[9].mxu1 }
 0x928   : > { %v3379_v55 = vadd.f32 %v4469_v28, %v3342_v59  ;;  %v4661_v44 = vpop.f32.mrb[10].mxu1 }
 0x929   : > { %v3389_v22 = vmul.f32 0.5, %v3381_v2  ;;  %v3382_v8 = vadd.f32 %v4661_v44, %v4469_v28  ;;  %v3345_v53 = vpop.f32.mrb[11].mxu1 }
 0x92a   : > { %v3387_v54 = vmul.f32 0.5, %v3379_v55  ;;  %v3380_v5 = vadd.f32 %v4469_v28, %v3345_v53 }
 0x92b   : > { %5009 = vtanh.f32 %v3389_v22  ;;  %v3390_v48 = vmul.f32 0.5, %v3382_v8 }
 0x92c   : > { %5011 = vtanh.f32 %v3387_v54  ;;  %v3388_v9 = vmul.f32 0.5, %v3380_v5 }
 0x92d   : > { %5013 = vtanh.f32 %v3390_v48 }
 0x92e   : > { %5015 = vtanh.f32 %v3388_v9  ;;  %v4664_v18 = vpop.f32.mrb[12].mxu1 }
 0x92f   : > { %v3385_v52 = vadd.f32 %v4664_v18, %v4469_v28  ;;  %v3358_v41 = vpop.f32.mrb[13].mxu1 }
 0x930   : > { %v3383_v30 = vadd.f32 %v4469_v28, %v3358_v41  ;;  %v4665_v37 = vpop.f32.mrb[14].mxu1 }
 0x931   : > { %v3393_v6 = vmul.f32 0.5, %v3385_v52  ;;  %v3386_v23 = vadd.f32 %v4665_v37, %v4469_v28  ;;  %v3361_v17 = vpop.f32.mrb[15].mxu1 }
 0x932   : > { %v3391_v43 = vmul.f32 0.5, %v3383_v30  ;;  %v3384_v63 = vadd.f32 %v4469_v28, %v3361_v17 }
 0x933   : > { %5017 = vtanh.f32 %v3393_v6  ;;  %v3394_v3 = vmul.f32 0.5, %v3386_v23  ;;  %v4479_v23 = vld [vmem:[#allocation36] ss:$0 sm:$0xff] }
 0x934   : > { %5019 = vtanh.f32 %v3391_v43  ;;  %v3392_v21 = vmul.f32 0.5, %v3384_v63 }
 0x935   : > { %v5010_v7 = vpop.eup %5009  ;;  %5021 = vtanh.f32 %v3394_v3 }
 0x936   : > { %v5012_v11 = vpop.eup %5011  ;;  %v3405_v60 = vadd.f32 1.0, %v5010_v7  ;;  %5023 = vtanh.f32 %v3392_v21 }
 0x937   : > { %v5014_v42 = vpop.eup %5013  ;;  %v3403_v1 = vadd.f32 1.0, %v5012_v11 }
 0x938   : > { %v5016_v0 = vpop.eup %5015  ;;  %v3406_v36 = vadd.f32 1.0, %v5014_v42  ;;  %v3413_v61 = vmul.f32 %v3405_v60, %v3389_v22 }
 0x939   : > { %v3404_v45 = vadd.f32 1.0, %v5016_v0  ;;  %v3411_v13 = vmul.f32 %v3403_v1, %v3387_v54 }
 0x93a   : > { %v3414_v25 = vmul.f32 %v3406_v36, %v3390_v48 }
 0x93b   : > { %v3412_v57 = vmul.f32 %v3404_v45, %v3388_v9 }
 0x93c   : > { %v3420_v19 = vpack.c.bf16 %v3414_v25, %v3413_v61 }
 0x93d   : > { %v5018_v58 = vpop.eup %5017  ;;  %v3419_v29 = vpack.c.bf16 %v3412_v57, %v3411_v13 }
 0x93e   : > { %v5020_v47 = vpop.eup %5019  ;;  %v3409_v50 = vadd.f32 1.0, %v5018_v58 }
 0x93f   : > { %v5022_v33 = vpop.eup %5021  ;;  %v3407_v4 = vadd.f32 1.0, %v5020_v47  ;;  %4674 = vmatprep.mubr.msk.bf16.mxu0 %vm3453_vm1, %v3419_v29 }
 0x940   : > { %v5024_v62 = vpop.eup %5023  ;;  %v3410_v35 = vadd.f32 1.0, %v5022_v33  ;;  %4675 = vmatmul.mubr.msk.bf16.vlgmr.msra.gmra.mrb[12].mxu0 %vm3453_vm1, %v3420_v19  ;;  %v3417_v32 = vmul.f32 %v3409_v50, %v3393_v6 }
 0x941   : > { %v3408_v51 = vadd.f32 1.0, %v5024_v62  ;;  %4683 = vmatpush3.bf16.msra.mxu0 %v4959_v49  ;;  %v3415_v15 = vmul.f32 %v3407_v4, %v3391_v43  ;;  %v4557_v43 = vld [vmem:[#allocation2 + $0x8] sm:$0xff]  }
 0x942   : > { %v3418_v12 = vmul.f32 %v3410_v35, %v3394_v3  ;;  %4684 = vmatprep.subr.bf16.mxu0 %v7595_v20  ;;  %v4512_v45 = vunpack.c.l.bf16 %v4557_v43  ;;  %v4513_v50 = vunpack.c.h.bf16 %v4557_v43  ;;  %v4961_v43 = vld [vmem:[#allocation34 + $0x10] sm:$0xff]  }
 0x943   : > { %v3416_v27 = vmul.f32 %v3408_v51, %v3392_v21  ;;  %v4507_v21 = vld [vmem:[#allocation2] sm:$0xff]   ;;  %4691 = vmatpush3.bf16.msra.mxu1 %v4961_v43 }
 0x944   : > { %v3422_v34 = vpack.c.bf16 %v3418_v12, %v3417_v32  ;;  %v4508_v57 = vunpack.c.l.bf16 %v4507_v21  ;;  %v4509_v62 = vunpack.c.h.bf16 %v4507_v21  ;;  %4692 = vmatprep.subr.bf16.mxu1 %v7595_v20 }
 0x945   : > { %v3421_v40 = vpack.c.bf16 %v3416_v27, %v3415_v15  ;;  %4685 = vmatpush3.bf16.msra.mxu0 %v4960_v46  ;;  %v4559_v15 = vld [vmem:[#allocation2 + $0x18] sm:$0xff]  }
 0x947   : > { %4678 = vmatprep.mubr.msk.bf16.mxu0 %vm3453_vm1, %v3421_v40 }
 0x948   : > { %4679 = vmatmul.mubr.msk.bf16.gmra.mrb[16].mxu0 %vm3453_vm1, %v3422_v34 }
 0x949   : > { %4686 = vmatprep.mubr.msk.bf16.mxu0 %vm5762_vm3, %v7595_v20  ;;  %v3770_v20 = vrot.slane %v7241_v31, 2  ;;  %vm4056_vm3 = vcmask 0  }
 0x950   : > { %4687 = vmatmul.mubr.msk.bf16.vlgmr.msra.gmra.mrb[20].mxu0 %vm1427_vm5, %v3604_v24  ;;  %v4558_v24 = vld [vmem:[#allocation2 + $0x10] sm:$0xff]  }
 0xa13   : > { %v4676_v26 = vpop.f32.mrb[12].mxu0 }
 0xa14   : > { %v3509_v38 = vadd.f32 %v4676_v26, %v4470_v16  ;;  %v3500_v56 = vpop.f32.mrb[13].mxu0 }
 0xa15   : > { %v3501_v39 = vadd.f32 %v4470_v16, %v3500_v56  ;;  %v4677_v10 = vpop.f32.mrb[14].mxu0 }
 0xa16   : > { %v3533_v28 = vmul.f32 0.5, %v3509_v38  ;;  %v3512_v14 = vadd.f32 %v4677_v10, %v4470_v16  ;;  %v3503_v2 = vpop.f32.mrb[15].mxu0  ;;  %v4520_v10 = vunpack.c.l.bf16 %v4559_v15 }
 0xa17   : > { %v3531_v59 = vmul.f32 0.5, %v3501_v39  ;;  %v3504_v55 = vadd.f32 %v4470_v16, %v3503_v2  ;;  %v4516_v2 = vunpack.c.l.bf16 %v4558_v24 }
 0xa18   : > { %5025 = vtanh.f32 %v3533_v28  ;;  %v3534_v44 = vmul.f32 0.5, %v3512_v14 }
 0xa19   : > { %5027 = vtanh.f32 %v3531_v59  ;;  %v3532_v22 = vmul.f32 0.5, %v3504_v55 }
 0xa1a   : > { %5029 = vtanh.f32 %v3534_v44 }
 0xa1b   : > { %5031 = vtanh.f32 %v3532_v22  ;;  %v4680_v8 = vpop.f32.mrb[16].mxu0 }
 0xa1c   : > { %v3525_v53 = vadd.f32 %v4680_v8, %v4470_v16  ;;  %v3516_v54 = vpop.f32.mrb[17].mxu0 }
 0xa1d   : > { %v3517_v5 = vadd.f32 %v4470_v16, %v3516_v54  ;;  %v4681_v48 = vpop.f32.mrb[18].mxu0  ;;  %v4517_v54 = vunpack.c.h.bf16 %v4558_v24 }
 0xa1e   : > { %v3537_v9 = vmul.f32 0.5, %v3525_v53  ;;  %v3528_v18 = vadd.f32 %v4681_v48, %v4470_v16  ;;  %v3519_v52 = vpop.f32.mrb[19].mxu0 }
 0xa1f   : > { %v3535_v41 = vmul.f32 0.5, %v3517_v5  ;;  %v3520_v30 = vadd.f32 %v4470_v16, %v3519_v52 }
 0xa20   : > { %5033 = vtanh.f32 %v3537_v9  ;;  %v3538_v37 = vmul.f32 0.5, %v3528_v18 }
 0xa21   : > { %5035 = vtanh.f32 %v3535_v41  ;;  %v3536_v6 = vmul.f32 0.5, %v3520_v30 }
 0xa22   : > { %v5026_v17 = vpop.eup %5025  ;;  %5037 = vtanh.f32 %v3538_v37 }
 0xa23   : > { %v5028_v63 = vpop.eup %5027  ;;  %v3549_v3 = vadd.f32 1.0, %v5026_v17  ;;  %5039 = vtanh.f32 %v3536_v6  ;;  %v3665_v7 = vpop.f32.mrb[20].mxu0 }
 0xa24   : > { %v5030_v11 = vpop.eup %5029  ;;  %v3547_v60 = vadd.f32 1.0, %v5028_v63  ;;  %v3666_v42 = vadd.f32 %v4479_v23, %v3665_v7  ;;  %v4688_v1 = vpop.f32.mrb[21].mxu0  ;;  %v4962_v63 = vld [vmem:[#allocation34 + $0x18] sm:$0xff]  }
 0xa25   : > { %v5032_v0 = vpop.eup %5031  ;;  %v3557_v36 = vmul.f32 %v3549_v3, %v3533_v28  ;;  %v3550_v61 = vadd.f32 1.0, %v5030_v11  ;;  %v3668_v25 = vpop.f32.mrb[22].mxu0  ;;  %4693 = vmatpush3.bf16.msra.mxu1 %v4962_v63 }
 0xa26   : > { %v3555_v13 = vmul.f32 %v3547_v60, %v3531_v59  ;;  %v3548_v19 = vadd.f32 1.0, %v5032_v0  ;;  %v4689_v58 = vpop.f32.mrb[23].mxu0  ;;  %v3671_v29 = vsel %vm1427_vm5, %v3666_v42, 0.0 }
 0xa27   : > { %v3581_v49 = vmul.f32 %v4512_v45, %v3557_v36  ;;  %v3558_v47 = vmul.f32 %v3550_v61, %v3534_v44  ;;  %3672 = vadd.xlane.f32.xlu0 %v3671_v29  ;;  %v3769_v61 = vrot.slane %v7241_v31, 1  ;;  %v3772_v58 = vrot.slane %v7241_v31, 4 }
 0xa28   : > { %v3579_v33 = vmul.f32 %v4508_v57, %v3555_v13  ;;  %v3556_v4 = vmul.f32 %v3548_v19, %v3532_v22  ;;  %v4521_v22 = vunpack.c.h.bf16 %v4559_v15  ;;  %v3771_v19 = vrot.slane %v7241_v31, 3 }
 0xa29   : > { %v3589_v35 = vpack.c.bf16 %v3581_v49, %v3581_v49  ;;  %v3582_v51 = vmul.f32 %v4513_v50, %v3558_v47  ;;  %v3773_v29 = vrot.slane %v7241_v31, 5 }
 0xa2a   : > { %v5034_v46 = vpop.eup %5033  ;;  %v3587_v32 = vpack.c.bf16 %v3579_v33, %v3579_v33  ;;  %v3580_v12 = vmul.f32 %v4509_v62, %v3556_v4 }
 0xa2b   : > { %v5036_v27 = vpop.eup %5035  ;;  %3597 = vst.msk [vmem:[#allocation2 + $0x8] sm:$0xf] %vm1409_vm4, %v3589_v35  ;;  %v3590_v34 = vpack.c.bf16 %v3582_v51, %v3582_v51  ;;  %v3553_v40 = vadd.f32 1.0, %v5034_v46 }
 0xa2c   : > { %v5038_v16 = vpop.eup %5037  ;;  %3595 = vst.msk [vmem:[#allocation2] sm:$0xf] %vm1409_vm4, %v3587_v32  ;;  %v3588_v26 = vpack.c.bf16 %v3580_v12, %v3580_v12  ;;  %v3551_v38 = vadd.f32 1.0, %v5036_v27 }
 0xa2d   : > { %v5040_v56 = vpop.eup %5039  ;;  %3598 = vst.msk [vmem:[#allocation2 + $0xc] sm:$0xf] %vm1409_vm4, %v3590_v34  ;;  %v3561_v39 = vmul.f32 %v3553_v40, %v3537_v9  ;;  %v3554_v28 = vadd.f32 1.0, %v5038_v16 }
 0xa2e   : > { %3596 = vst.msk [vmem:[#allocation2 + $0x4] sm:$0xf] %vm1409_vm4, %v3588_v26  ;;  %v3559_v14 = vmul.f32 %v3551_v38, %v3535_v41  ;;  %v3552_v59 = vadd.f32 1.0, %v5040_v56 }
 0xa2f   : > { %v3585_v55 = vmul.f32 %v4520_v10, %v3561_v39  ;;  %v3562_v44 = vmul.f32 %v3554_v28, %v3538_v37 }
 0xa30   : > { %v3583_v8 = vmul.f32 %v4516_v2, %v3559_v14  ;;  %v3560_v53 = vmul.f32 %v3552_v59, %v3536_v6 }
 0xa31   : > { %v3593_v5 = vpack.c.bf16 %v3585_v55, %v3585_v55  ;;  %v3586_v48 = vmul.f32 %v4521_v22, %v3562_v44 }
 0xa32   : > { %v3591_v18 = vpack.c.bf16 %v3583_v8, %v3583_v8  ;;  %v3584_v52 = vmul.f32 %v4517_v54, %v3560_v53 }
 0xa33   : > { %3601 = vst.msk [vmem:[#allocation2 + $0x18] sm:$0xf] %vm1409_vm4, %v3593_v5  ;;  %v3594_v9 = vpack.c.bf16 %v3586_v48, %v3586_v48 }
 0xa34   : > { %3599 = vst.msk [vmem:[#allocation2 + $0x10] sm:$0xf] %vm1409_vm4, %v3591_v18  ;;  %v3592_v30 = vpack.c.bf16 %v3584_v52, %v3584_v52  ;;  %v7257_v0 = vld [vmem:[#allocation2 + $0x8] sm:$0xff]  }
 0xa35   : > { %3602 = vst.msk [vmem:[#allocation2 + $0x1c] sm:$0xf] %vm1409_vm4, %v3594_v9  ;;  %v7259_v36 = vld [vmem:[#allocation2] sm:$0xff]   ;;  %v4528_v57 = vunpack.c.l.bf16 %v7257_v0  ;;  %v4529_v50 = vunpack.c.h.bf16 %v7257_v0 }
 0xa36   : > { %3600 = vst.msk [vmem:[#allocation2 + $0x14] sm:$0xf] %vm1409_vm4, %v3592_v30  ;;  %v4524_v49 = vunpack.c.l.bf16 %v7259_v36  ;;  %v4525_v47 = vunpack.c.h.bf16 %v7259_v36 }
 0xa3c   : > { %v7261_v45 = vld [vmem:[#allocation2 + $0x18] sm:$0xff]  }
 0xa3d   : > { %v7265_v13 = vld [vmem:[#allocation2 + $0x10] sm:$0xff]   ;;  %v4536_v4 = vunpack.c.l.bf16 %v7261_v45  ;;  %v4537_v62 = vunpack.c.h.bf16 %v7261_v45 }
 0xa3e   : > { %v4532_v35 = vunpack.c.l.bf16 %v7265_v13  ;;  %v4533_v51 = vunpack.c.h.bf16 %v7265_v13 }
 0xab4   : > { %v3673_v41 = vpop.xlane.xlu0 %3672 }
 0xab5   : > { %v3674_v37 = vmul.f32 0.03125, %v3673_v41 }
 0xab7   : > { %v3675_v23 = vsub.f32 %v3666_v42, %v3674_v37 }
 0xab9   : > { %v3676_v17 = vmul.f32 %v3675_v23, %v3675_v23 }
 0xabb   : > { %v3677_v6 = vsel %vm1427_vm5, %v3676_v17, 0.0 }
 0xabc   : > { %3678 = vadd.xlane.f32.xlu1 %v3677_v6 }
 0xb49   : > { %v3679_v3 = vpop.xlane.xlu1 %3678 }
 0xb4a   : > { %v3680_v21 = vmul.f32 0.03125, %v3679_v3 }
 0xb4c   : > { %v3681_v7 = vadd.f32 1e-05, %v3680_v21 }
 0xb4e   : > { %5041 = vrsqrt.f32 %v3681_v7 }
 0xb58   : > { %v5042_v11 = vpop.eup %5041 }
 0xb59   : > { %v3683_v60 = vmul.f32 %v5042_v11, %v3675_v23 }
 0xb5b   : > { %v3684_v1 = vmul.f32 0.5, %v3683_v60 }
 0xb5d   : > { %5043 = vtanh.f32 %v3684_v1 }
 0xb67   : > { %v5044_v42 = vpop.eup %5043 }
 0xb68   : > { %v3686_v25 = vadd.f32 1.0, %v5044_v42 }
 0xb6a   : > { %v3687_v33 = vmul.f32 %v3686_v25, %v3684_v1 }
 0xb6c   : > { %v3704_v46 = vmul.f32 %v4524_v49, %v3687_v33  ;;  %v3705_v32 = vmul.f32 %v4525_v47, %v3687_v33  ;;  %v3706_v12 = vmul.f32 %v4528_v57, %v3687_v33  ;;  %v3707_v15 = vmul.f32 %v4529_v50, %v3687_v33 }
 0xb6d   : > { %v3708_v27 = vmul.f32 %v4532_v35, %v3687_v33  ;;  %v3709_v34 = vmul.f32 %v4533_v51, %v3687_v33  ;;  %v3710_v40 = vmul.f32 %v4536_v4, %v3687_v33  ;;  %v3711_v24 = vmul.f32 %v4537_v62, %v3687_v33 }
 0xb6e   : > { %v3712_v16 = vsel %vm1427_vm5, %v3704_v46, 0.0  ;;  %v3719_v26 = vsel %vm1427_vm5, %v3705_v32, 0.0  ;;  %v3726_v38 = vsel %vm1427_vm5, %v3706_v12, 0.0  ;;  %v3733_v56 = vsel %vm1427_vm5, %v3707_v15, 0.0 }
 0xb6f   : > { %v3713_v39 = vrot.slane %v3712_v16, 4  ;;  %v3720_v10 = vrot.slane %v3719_v26, 4  ;;  %v3727_v28 = vrot.slane %v3726_v38, 4  ;;  %v3734_v14 = vrot.slane %v3733_v56, 4 }
 0xb70   : > { %v3740_v2 = vsel %vm1427_vm5, %v3708_v27, 0.0  ;;  %v3747_v59 = vsel %vm1427_vm5, %v3709_v34, 0.0  ;;  %v3754_v55 = vsel %vm1427_vm5, %v3710_v40, 0.0  ;;  %v3761_v44 = vsel %vm1427_vm5, %v3711_v24, 0.0 }
 0xb71   : > { %v3714_v22 = vadd.f32 %v3713_v39, %v3712_v16  ;;  %v3721_v8 = vadd.f32 %v3720_v10, %v3719_v26  ;;  %v3728_v53 = vadd.f32 %v3727_v28, %v3726_v38  ;;  %v3735_v54 = vadd.f32 %v3734_v14, %v3733_v56 }
 0xb72   : > { %v3741_v5 = vrot.slane %v3740_v2, 4  ;;  %v3748_v48 = vrot.slane %v3747_v59, 4  ;;  %v3755_v18 = vrot.slane %v3754_v55, 4  ;;  %v3762_v52 = vrot.slane %v3761_v44, 4 }
 0xb73   : > { %v3715_v9 = vrot.slane %v3714_v22, 2  ;;  %v3722_v30 = vrot.slane %v3721_v8, 2  ;;  %v3729_v41 = vrot.slane %v3728_v53, 2  ;;  %v3736_v37 = vrot.slane %v3735_v54, 2 }
 0xb74   : > { %v3742_v23 = vadd.f32 %v3741_v5, %v3740_v2  ;;  %v3749_v17 = vadd.f32 %v3748_v48, %v3747_v59  ;;  %v3756_v6 = vadd.f32 %v3755_v18, %v3754_v55  ;;  %v3763_v43 = vadd.f32 %v3762_v52, %v3761_v44 }
 0xb75   : > { %v3716_v63 = vadd.f32 %v3715_v9, %v3714_v22  ;;  %v3723_v3 = vadd.f32 %v3722_v30, %v3721_v8  ;;  %v3730_v21 = vadd.f32 %v3729_v41, %v3728_v53  ;;  %v3737_v7 = vadd.f32 %v3736_v37, %v3735_v54 }
 0xb76   : > { %v3743_v11 = vrot.slane %v3742_v23, 2  ;;  %v3750_v60 = vrot.slane %v3749_v17, 2  ;;  %v3757_v1 = vrot.slane %v3756_v6, 2  ;;  %v3764_v42 = vrot.slane %v3763_v43, 2 }
 0xb77   : > { %v3717_v25 = vrot.slane %v3716_v63, 1  ;;  %v3724_v33 = vrot.slane %v3723_v3, 1  ;;  %v3731_v46 = vrot.slane %v3730_v21, 1  ;;  %v3738_v32 = vrot.slane %v3737_v7, 1 }
 0xb78   : > { %v3744_v12 = vadd.f32 %v3743_v11, %v3742_v23  ;;  %v3751_v15 = vadd.f32 %v3750_v60, %v3749_v17  ;;  %v3758_v27 = vadd.f32 %v3757_v1, %v3756_v6  ;;  %v3765_v34 = vadd.f32 %v3764_v42, %v3763_v43 }
 0xb79   : > { %v3718_v40 = vadd.f32 %v3717_v25, %v3716_v63  ;;  %v3725_v24 = vadd.f32 %v3724_v33, %v3723_v3  ;;  %v3732_v16 = vadd.f32 %v3731_v46, %v3730_v21  ;;  %v3739_v26 = vadd.f32 %v3738_v32, %v3737_v7  ;;  %v4483_v21 = vld [vmem:[#allocation36 + $0x1] ss:$0 sm:$0xff]  ;;  %v4032_v33 = vld [vmem:[%s904_s29] sm:$0xff] }
 0xb7a   : > { %v3745_v38 = vrot.slane %v3744_v12, 1  ;;  %v3752_v56 = vrot.slane %v3751_v15, 1  ;;  %v3759_v39 = vrot.slane %v3758_v27, 1  ;;  %v3766_v10 = vrot.slane %v3765_v34, 1  ;;  %4035 = vperm.xlu1 %4936, %v4032_v33  }
 0xb7b   : > { %v3774_v28 = vrot.slane %v7241_v31, 6  ;;  %v3785_v14 = vadd.f32 %v3769_v61, %v3725_v24  ;;  %v3786_v2 = vadd.f32 %v3770_v20, %v3732_v16  ;;  %v3787_v59 = vadd.f32 %v3771_v19, %v3739_v26 }
 0xb7c   : > { %v3746_v55 = vadd.f32 %v3745_v38, %v3744_v12  ;;  %v3753_v44 = vadd.f32 %v3752_v56, %v3751_v15  ;;  %v3760_v22 = vadd.f32 %v3759_v39, %v3758_v27  ;;  %v3767_v8 = vadd.f32 %v3766_v10, %v3765_v34 }
 0xb7d   : > { %v3775_v53 = vrot.slane %v7241_v31, 7  ;;  %v3784_v54 = vadd.f32 %v3718_v40, %v7241_v31  ;;  %v3800_v5 = vrot.slane %v3785_v14, 7  ;;  %v3802_v48 = vrot.slane %v3786_v2, 6 }
 0xb7e   : > { %v3788_v18 = vadd.f32 %v3772_v58, %v3746_v55  ;;  %v3789_v61 = vadd.f32 %v3773_v29, %v3753_v44  ;;  %v3790_v20 = vadd.f32 %v3774_v28, %v3760_v22  ;;  %v3804_v9 = vrot.slane %v3787_v59, 5 }
 0xb7f   : > { %v3791_v52 = vadd.f32 %v3775_v53, %v3767_v8  ;;  %v3801_v19 = vsel %vm1492_vm6, %v3800_v5, %v3784_v54 }
 0xb80   : > { %v3803_v30 = vsel %vm1494_vm7, %v3802_v48, %v3801_v19  ;;  %v3806_v41 = vrot.slane %v3788_v18, 4  ;;  %v3808_v23 = vrot.slane %v3789_v61, 3  ;;  %v3810_v6 = vrot.slane %v3790_v20, 2 }
 0xb81   : > { %v3805_v37 = vsel %vm1496_vm8, %v3804_v9, %v3803_v30  ;;  %v3812_v58 = vrot.slane %v3791_v52, 1 }
 0xb82   : > { %v3807_v17 = vsel %vm1498_vm9, %v3806_v41, %v3805_v37 }
 0xb83   : > { %v3809_v43 = vsel %vm1500_vm10, %v3808_v23, %v3807_v17 }
 0xb84   : > { %v3811_v31 = vsel %vm1502_vm11, %v3810_v6, %v3809_v43 }
 0xb85   : > { %v3813_v29 = vsel %vm1504_vm12, %v3812_v58, %v3811_v31 }
 0xb86   : > { %3815 = vst.msk [vmem:[#allocation5] sm:$0xff] %vm1427_vm5, %v3813_v29 }
 0xb8d   : > { %v7323_v63 = vld [vmem:[#allocation5] sm:$0xff] }
 0xb8e   : > { %v3817_v3 = vpack.c.bf16 %v7323_v63, %v7323_v63  ;;  %v3984_v10 = vrot.slane %v7323_v63, 1  ;;  %v3985_v14 = vrot.slane %v7323_v63, 2  ;;  %v3986_v2 = vrot.slane %v7323_v63, 3 }
 0xb8f   : > { %v3987_v59 = vrot.slane %v7323_v63, 4  ;;  %v3988_v55 = vrot.slane %v7323_v63, 5 }
 0xb90   : > { %4695 = vmatmul.mubr.msk.bf16.vlgmr.msra.gmra.mrb[16].mxu1 %vm1427_vm5, %v3817_v3 }
 0xc63   : > { %v3880_v7 = vpop.f32.mrb[16].mxu1 }
 0xc64   : > { %v3881_v11 = vadd.f32 %v4483_v21, %v3880_v7  ;;  %v4696_v60 = vpop.f32.mrb[17].mxu1 }
 0xc65   : > { %v3883_v1 = vpop.f32.mrb[18].mxu1 }
 0xc66   : > { %v4697_v42 = vpop.f32.mrb[19].mxu1  ;;  %v3886_v25 = vsel %vm1427_vm5, %v3881_v11, 0.0 }
 0xc67   : > { %3887 = vadd.xlane.f32.xlu0 %v3886_v25 }
 0xcf4   : > { %v3888_v46 = vpop.xlane.xlu0 %3887 }
 0xcf5   : > { %v3889_v32 = vmul.f32 0.03125, %v3888_v46 }
 0xcf7   : > { %v3890_v12 = vsub.f32 %v3881_v11, %v3889_v32 }
 0xcf9   : > { %v3891_v15 = vmul.f32 %v3890_v12, %v3890_v12 }
 0xcfb   : > { %v3892_v27 = vsel %vm1427_vm5, %v3891_v15, 0.0 }
 0xcfc   : > { %3893 = vadd.xlane.f32.xlu0 %v3892_v27 }
 0xd89   : > { %v3894_v34 = vpop.xlane.xlu0 %3893 }
 0xd8a   : > { %v3895_v40 = vmul.f32 0.03125, %v3894_v34 }
 0xd8c   : > { %v3896_v24 = vadd.f32 1e-05, %v3895_v40 }
 0xd8e   : > { %5045 = vrsqrt.f32 %v3896_v24 }
 0xd98   : > { %v5046_v16 = vpop.eup %5045 }
 0xd99   : > { %v3898_v26 = vmul.f32 %v5046_v16, %v3890_v12 }
 0xd9b   : > { %v3899_v38 = vmul.f32 0.5, %v3898_v26 }
 0xd9d   : > { %5047 = vtanh.f32 %v3899_v38 }
 0xda7   : > { %v5048_v56 = vpop.eup %5047 }
 0xda8   : > { %v3901_v39 = vadd.f32 1.0, %v5048_v56 }
 0xdaa   : > { %v3902_v28 = vmul.f32 %v3901_v39, %v3899_v38 }
 0xdac   : > { %v3919_v44 = vmul.f32 %v4524_v49, %v3902_v28  ;;  %v3920_v22 = vmul.f32 %v4525_v47, %v3902_v28  ;;  %v3921_v8 = vmul.f32 %v4528_v57, %v3902_v28  ;;  %v3922_v53 = vmul.f32 %v4529_v50, %v3902_v28 }
 0xdad   : > { %v3923_v54 = vmul.f32 %v4532_v35, %v3902_v28  ;;  %v3924_v5 = vmul.f32 %v4533_v51, %v3902_v28  ;;  %v3925_v48 = vmul.f32 %v4536_v4, %v3902_v28  ;;  %v3926_v49 = vmul.f32 %v4537_v62, %v3902_v28 }
 0xdae   : > { %v3927_v36 = vsel %vm1427_vm5, %v3919_v44, 0.0  ;;  %v3934_v47 = vsel %vm1427_vm5, %v3920_v22, 0.0  ;;  %v3941_v57 = vsel %vm1427_vm5, %v3921_v8, 0.0  ;;  %v3948_v0 = vsel %vm1427_vm5, %v3922_v53, 0.0 }
 0xdaf   : > { %v3928_v50 = vrot.slane %v3927_v36, 4  ;;  %v3935_v18 = vrot.slane %v3934_v47, 4  ;;  %v3942_v35 = vrot.slane %v3941_v57, 4  ;;  %v3949_v61 = vrot.slane %v3948_v0, 4 }
 0xdb0   : > { %v3955_v13 = vsel %vm1427_vm5, %v3923_v54, 0.0  ;;  %v3962_v51 = vsel %vm1427_vm5, %v3924_v5, 0.0  ;;  %v3969_v4 = vsel %vm1427_vm5, %v3925_v48, 0.0  ;;  %v3976_v45 = vsel %vm1427_vm5, %v3926_v49, 0.0 }
 0xdb1   : > { %v3929_v62 = vadd.f32 %v3928_v50, %v3927_v36  ;;  %v3936_v20 = vadd.f32 %v3935_v18, %v3934_v47  ;;  %v3943_v52 = vadd.f32 %v3942_v35, %v3941_v57  ;;  %v3950_v19 = vadd.f32 %v3949_v61, %v3948_v0 }
 0xdb2   : > { %v3956_v9 = vrot.slane %v3955_v13, 4  ;;  %v3963_v30 = vrot.slane %v3962_v51, 4  ;;  %v3970_v41 = vrot.slane %v3969_v4, 4  ;;  %v3977_v37 = vrot.slane %v3976_v45, 4 }
 0xdb3   : > { %v3930_v23 = vrot.slane %v3929_v62, 2  ;;  %v3937_v17 = vrot.slane %v3936_v20, 2  ;;  %v3944_v6 = vrot.slane %v3943_v52, 2  ;;  %v3951_v43 = vrot.slane %v3950_v19, 2 }
 0xdb4   : > { %v3957_v58 = vadd.f32 %v3956_v9, %v3955_v13  ;;  %v3964_v31 = vadd.f32 %v3963_v30, %v3962_v51  ;;  %v3971_v29 = vadd.f32 %v3970_v41, %v3969_v4  ;;  %v3978_v3 = vadd.f32 %v3977_v37, %v3976_v45  ;;  %v4036_v9 = vpop.permute.xlu1 %4035 }
 0xdb5   : > { %v3931_v21 = vadd.f32 %v3930_v23, %v3929_v62  ;;  %v3938_v7 = vadd.f32 %v3937_v17, %v3936_v20  ;;  %v3945_v11 = vadd.f32 %v3944_v6, %v3943_v52  ;;  %v3952_v60 = vadd.f32 %v3951_v43, %v3950_v19 }
 0xdb6   : > { %v3958_v1 = vrot.slane %v3957_v58, 2  ;;  %v3965_v42 = vrot.slane %v3964_v31, 2  ;;  %v3972_v25 = vrot.slane %v3971_v29, 2  ;;  %v3979_v33 = vrot.slane %v3978_v3, 2 }
 0xdb7   : > { %v3932_v46 = vrot.slane %v3931_v21, 1  ;;  %v3939_v32 = vrot.slane %v3938_v7, 1  ;;  %v3946_v12 = vrot.slane %v3945_v11, 1  ;;  %v3953_v15 = vrot.slane %v3952_v60, 1 }
 0xdb8   : > { %v3959_v27 = vadd.f32 %v3958_v1, %v3957_v58  ;;  %v3966_v34 = vadd.f32 %v3965_v42, %v3964_v31  ;;  %v3973_v40 = vadd.f32 %v3972_v25, %v3971_v29  ;;  %v3980_v24 = vadd.f32 %v3979_v33, %v3978_v3  ;;  %v4046_v31 = vld [vmem:[#allocation37] sm:$0x1] }
 0xdb9   : > { %v3933_v16 = vadd.f32 %v3932_v46, %v3931_v21  ;;  %v3940_v26 = vadd.f32 %v3939_v32, %v3938_v7  ;;  %v3947_v38 = vadd.f32 %v3946_v12, %v3945_v11  ;;  %v3954_v56 = vadd.f32 %v3953_v15, %v3952_v60  ;;  %v4052_v7 = vld [vmem:[#allocation6] sm:$0x1] }
 0xdba   : > { %v3960_v39 = vrot.slane %v3959_v27, 1  ;;  %v3967_v28 = vrot.slane %v3966_v34, 1  ;;  %v3974_v44 = vrot.slane %v3973_v40, 1  ;;  %v3981_v22 = vrot.slane %v3980_v24, 1 }
 0xdbb   : > { %v4000_v8 = vadd.f32 %v3984_v10, %v3940_v26  ;;  %v3989_v53 = vrot.slane %v7323_v63, 6  ;;  %v4001_v54 = vadd.f32 %v3985_v14, %v3947_v38  ;;  %v4002_v5 = vadd.f32 %v3986_v2, %v3954_v56 }
 0xdbc   : > { %v3961_v48 = vadd.f32 %v3960_v39, %v3959_v27  ;;  %v3968_v49 = vadd.f32 %v3967_v28, %v3966_v34  ;;  %v3975_v36 = vadd.f32 %v3974_v44, %v3973_v40  ;;  %v3982_v47 = vadd.f32 %v3981_v22, %v3980_v24 }
 0xdbd   : > { %v3999_v57 = vadd.f32 %v3933_v16, %v7323_v63  ;;  %v4015_v0 = vrot.slane %v4000_v8, 7  ;;  %v3990_v50 = vrot.slane %v7323_v63, 7  ;;  %v4017_v18 = vrot.slane %v4001_v54, 6 }
 0xdbe   : > { %v4003_v10 = vadd.f32 %v3987_v59, %v3961_v48  ;;  %v4004_v35 = vadd.f32 %v3988_v55, %v3968_v49  ;;  %v4005_v14 = vadd.f32 %v3989_v53, %v3975_v36  ;;  %v4019_v13 = vrot.slane %v4002_v5, 5 }
 0xdbf   : > { %v4006_v61 = vadd.f32 %v3990_v50, %v3982_v47  ;;  %v4016_v2 = vsel %vm1492_vm6, %v4015_v0, %v3999_v57 }
 0xdc0   : > { %v4018_v51 = vsel %vm1494_vm7, %v4017_v18, %v4016_v2  ;;  %v4021_v4 = vrot.slane %v4003_v10, 4  ;;  %v4023_v62 = vrot.slane %v4004_v35, 3  ;;  %v4025_v52 = vrot.slane %v4005_v14, 2 }
 0xdc1   : > { %v4020_v45 = vsel %vm1496_vm8, %v4019_v13, %v4018_v51  ;;  %v4027_v59 = vrot.slane %v4006_v61, 1 }
 0xdc2   : > { %v4022_v20 = vsel %vm1498_vm9, %v4021_v4, %v4020_v45 }
 0xdc3   : > { %v4024_v19 = vsel %vm1500_vm10, %v4023_v62, %v4022_v20 }
 0xdc4   : > { %v4026_v63 = vsel %vm1502_vm11, %v4025_v52, %v4024_v19 }
 0xdc5   : > { %v4028_v55 = vsel %vm1504_vm12, %v4027_v59, %v4026_v63 }
 0xdc6   : > { %4030 = vst.msk [vmem:[#allocation5] sm:$0xff] %vm1427_vm5, %v4028_v55 }
 0xdcd   : > { %v4031_v30 = vld [vmem:[#allocation5] sm:$0xff] }
 0xdce   : > { %v4038_v41 = vmul.f32 %v4036_v9, %v4031_v30 }
 0xdd0   : > { %v4039_v37 = vsel %vm1427_vm5, %v4038_v41, 0.0 }
 0xdd1   : > { %v4040_v23 = vrot.slane %v4039_v37, 4 }
 0xdd3   : > { %v4041_v17 = vadd.f32 %v4040_v23, %v4039_v37 }
 0xdd5   : > { %v4042_v6 = vrot.slane %v4041_v17, 2 }
 0xdd7   : > { %v4043_v43 = vadd.f32 %v4042_v6, %v4041_v17 }
 0xdd9   : > { %v4044_v58 = vrot.slane %v4043_v43, 1 }
 0xddb   : > { %v4045_v29 = vadd.f32 %v4044_v58, %v4043_v43 }
 0xddd   : > { %v4047_v3 = vmul.f32 %v4046_v31, %v4045_v29 }
 0xddf   : > { %v4049_v21 = vsel %vm4048_vm2, %v4047_v3, 0.0 }
 0xde0   : > { %4050 = vadd.xlane.f32.xlu0 %v4049_v21 }
 0xe6d   : > { %v4051_v11 = vpop.xlane.xlu0 %4050 }
 0xe6e   : > { %v4053_v60 = vadd.f32 %v4052_v7, %v4051_v11 }
 0xe70   : > { %v4054_v1 = vmul.f32 2.0, %v4053_v60 }
 0xe72   : > { %v4055_v42 = vadd.f32 0.5, %v4054_v1 }
 0xe74   : > { %4057 = vst.msk [vmem:[%s1042_s25] sm:$0x1] %vm4056_vm3, %v4055_v42 }
 0xe75   : > { %5635 = shalt.err (!%p5632_p6)
}
 0xe76   : > { %s5636_s15 = scalar_lea.hbm %s7388_s26, 16  ;;  %s5640_s13 = scalar_lea.hbm %s7596_s17, 32 }
 0xe77   : > { %p5637_p2 = scmp.ne.s32.totalorder %s7388_s26, %s5636_s15  ;;  %p5641_p3 = scmp.lt.u32.totalorder %s7388_s26, %s7596_s17 }
 0xe78   : > { %p5642_p10 = scmp.lt.u32.totalorder %s5640_s13, %s5636_s15  ;;  %p5644_p12 = scmp.lt.u32.totalorder %s5636_s15, %s7388_s26 }
 0xe79   : > { %p5638_p11 = pnand %p5637_p2, %p7597_p9 }
 0xe7a   : > { %p5643_p1 = por %p5642_p10, %p5641_p3 }
 0xe7b   : > { %p5639_p4 = pneg %p5638_p11 }
 0xe7c   : > { %p5645_p5 = por %p5644_p12, %p5643_p1 }
 0xe7e   : > { %p5646_p13 = pnand %p5645_p5, %p5639_p4 }
 0xe80   : > { %5649 = shalt.err (!%p5646_p13)
}
 0xe81   : > { %4774 = dma.vmem_to_hbm [thread:$0]  (%p7597_p9), %s7390_s6, 16, %s7388_s26, %s4059_s18  }
 0xe82 PF: > { %s7598_s14 = sld [smem:[#allocation53_spill]]  ;;  %s7599_s19 = sld [smem:[#allocation58_spill]] }
 0xe83   : > { %p7601_p8 = scmp.ge.s32.totalorder %s5732_s3, 2 }
 0xe88   : > { %s4083_s27 = sand.u32 1, %s7598_s14   ;;  %p7600_p0 = scmp.ne.s32.totalorder %s7599_s19, 0 }
 0xe89   : > { %s4084_s29 = scalar_lea.sflag [#allocation9], %s4083_s27 }
 0xe8a   : > { %p4839_p7 = pnand %p7601_p8, %p7600_p0 }
 0xe8c   : > { %5715 = dma.done.wait (!%p4839_p7), %s4084_s29, 16  }
 0xe8d   : > { %5717 = vsyncadd (!%p4839_p7), %s4084_s29, 4294967280  ;;  %s7602_s3 = sld [smem:[#allocation56_spill]]  ;;  %s7603_s2 = sld [smem:[#allocation54_spill]] }
 0xe8e   : > { %s7604_s27 = sld [smem:[#allocation57_spill]]  ;;  %s7605_s26 = smov %s5724_s20 }
 0xe93   : > { %p52_p6 = scmp.ge.s32.totalorder %s7602_s3, 4   ;;  %s7606_s20 = smov %s7603_s2 }
 0xe95   :  { %54 = sbr.rel (!%p52_p6) target bundleno = 40 (0x28), region = 268 }
 0xe9c   :  { %4088 = vsyncpa [#allocation8], 1 }
 0xe9d   :  { %4090 = vsyncpa [#allocation8 + $0x1], 1 }
 0xe9e   :  { %4091 = vsyncpa [#allocation11], 1 }
 0xe9f   :  { %4093 = vsyncpa [#allocation11 + $0x1], 1 }
 0xea0   :  { %4094 = vsyncpa [#allocation14], 1 }
 0xea1   :  { %4096 = vsyncpa [#allocation14 + $0x1], 1 }
 0xea2   :  { %4097 = vsyncpa [#allocation17], 1 }
 0xea3   :  { %4099 = vsyncpa [#allocation17 + $0x1], 1 }
 0xea4   :  { %4100 = vsyncpa [#allocation20], 1 }
 0xea5   :  { %4101 = vsyncpa [#allocation23], 1 }
 0xea6   :  { %4102 = vsyncpa [#allocation26], 1 }
 0xea7   :  { %4103 = vsyncpa [#allocation29], 1 }
 0xea8   :  { %4104 = vsyncpa [#allocation32], 1 }
 0xea9   :  { %4105 = vsyncpa [#allocation35], 1 }
 0xeaa   :  { %4106 = vsyncpa [#allocation38], 1 }
 0xeab   :  { %4107 = vsyncpa [#allocation9], 1 }
 0xeac   :  { %4109 = vsyncpa [#allocation9 + $0x1], 1 }

</bundles_post_ra>
